<compile_context>
chip_gen: v7x
topology: tpu7x:2x2x1
jax: 0.10.0
libtpu: 0.0.40
codegen_flags: <defaults>
</compile_context>

<pallas_src>
import functools

import jax
import jax.numpy as jnp
from jax.experimental import pallas as pl
from jax.experimental.pallas import tpu as pltpu


def _round_up(x, m):
    return ((x + m - 1) // m) * m


# ---------------------------------------------------------------------------
# Kernels
# ---------------------------------------------------------------------------
def _layer1_kernel(a_ref, dis_k_ref, dis_i_ref, w1t_ref, b1_ref, w2t_ref,
                   xw2_ref, acc_ref):
    # acc += A_tile @ (dis_k (x) W1^T); finalize: xw2 = dis_i * relu(dis_i*acc + b1) @ W2^T
    k = pl.program_id(1)

    @pl.when(k == 0)
    def _():
        acc_ref[...] = jnp.zeros_like(acc_ref)

    # Layer-1 input features are all-ones -> the column-side operand of the
    # aggregation matmul is a rank-1 broadcast; build it in-register (VPU only).
    xw1 = (dis_k_ref[...] * w1t_ref[...]).astype(jnp.bfloat16)      # (tile_k, Fp)
    acc_ref[...] += jnp.dot(a_ref[...], xw1,
                            preferred_element_type=jnp.float32)

    @pl.when(k == pl.num_programs(1) - 1)
    def _():
        h1 = jnp.maximum(dis_i_ref[...] * acc_ref[...] + b1_ref[...], 0.0)
        # Fused layer-2 linear: tiny (Fp x Fp) matmul rides in the otherwise
        # idle MXU slot of this memory-bound kernel.
        xw2 = jnp.dot(h1.astype(jnp.bfloat16), w2t_ref[...],
                      preferred_element_type=jnp.float32)
        xw2_ref[...] = (dis_i_ref[...] * xw2).astype(xw2_ref.dtype)


def _layer2_kernel(a_ref, xw_ref, dis_i_ref, b2_ref, out_ref, acc_ref, *, tile_k):
    # acc += A_tile @ XW2[k-slice]; finalize: out = relu(dis_i * acc + b2)
    k = pl.program_id(1)

    @pl.when(k == 0)
    def _():
        acc_ref[...] = jnp.zeros_like(acc_ref)

    kk = pl.multiple_of(k * tile_k, tile_k)
    acc_ref[...] += jnp.dot(a_ref[...], xw_ref[pl.ds(kk, tile_k), :],
                            preferred_element_type=jnp.float32)

    @pl.when(k == pl.num_programs(1) - 1)
    def _():
        out_ref[...] = jnp.maximum(
            dis_i_ref[...] * acc_ref[...] + b2_ref[...], 0.0
        ).astype(out_ref.dtype)


# ---------------------------------------------------------------------------
# Pallas-call wrappers
# ---------------------------------------------------------------------------
def _layer1(adj, dis, w1t_p, b1_p, w2t_p, *, tile_m, tile_k):
    n_pad = adj.shape[0]
    fp = w1t_p.shape[1]
    cost = pl.CostEstimate(
        flops=2 * n_pad * n_pad * fp + 2 * n_pad * fp * fp,
        transcendentals=0,
        bytes_accessed=2 * n_pad * n_pad + 2 * n_pad * fp
        + 8 * n_pad + 4 * fp * (fp + 2),
    )
    return pl.pallas_call(
        _layer1_kernel,
        out_shape=jax.ShapeDtypeStruct((n_pad, fp), jnp.bfloat16),
        grid_spec=pltpu.PrefetchScalarGridSpec(
            num_scalar_prefetch=0,
            grid=(n_pad // tile_m, n_pad // tile_k),
            in_specs=[
                pl.BlockSpec((tile_m, tile_k), lambda i, k: (i, k)),  # A_hat (bf16)
                pl.BlockSpec((tile_k, 1), lambda i, k: (k, 0)),       # D^-1/2 (source)
                pl.BlockSpec((tile_m, 1), lambda i, k: (i, 0)),       # D^-1/2 (target)
                pl.BlockSpec((1, fp), lambda i, k: (0, 0)),           # W1^T row (padded)
                pl.BlockSpec((1, fp), lambda i, k: (0, 0)),           # b1 (padded)
                pl.BlockSpec((fp, fp), lambda i, k: (0, 0)),          # W2^T (padded)
            ],
            out_specs=pl.BlockSpec((tile_m, fp), lambda i, k: (i, 0)),
            scratch_shapes=[pltpu.VMEM((tile_m, fp), jnp.float32)],
        ),
        compiler_params=pltpu.CompilerParams(
            dimension_semantics=("parallel", "arbitrary")),
        cost_estimate=cost,
    )(adj, dis, dis, w1t_p, b1_p, w2t_p)


def _layer2(adj, xw2, dis, b2_p, *, tile_m, tile_k):
    n_pad = adj.shape[0]
    fp = xw2.shape[1]
    cost = pl.CostEstimate(
        flops=2 * n_pad * n_pad * fp,
        transcendentals=0,
        bytes_accessed=2 * n_pad * n_pad + 2 * n_pad * fp
        + 4 * n_pad * fp + 4 * n_pad + 4 * fp,
    )
    return pl.pallas_call(
        functools.partial(_layer2_kernel, tile_k=tile_k),
        out_shape=jax.ShapeDtypeStruct((n_pad, fp), jnp.float32),
        grid_spec=pltpu.PrefetchScalarGridSpec(
            num_scalar_prefetch=0,
            grid=(n_pad // tile_m, n_pad // tile_k),
            in_specs=[
                pl.BlockSpec((tile_m, tile_k), lambda i, k: (i, k)),  # A_hat (bf16)
                pl.BlockSpec((n_pad, fp), lambda i, k: (0, 0)),       # XW2 resident in VMEM
                pl.BlockSpec((tile_m, 1), lambda i, k: (i, 0)),       # D^-1/2 (target)
                pl.BlockSpec((1, fp), lambda i, k: (0, 0)),           # b2 (padded)
            ],
            out_specs=pl.BlockSpec((tile_m, fp), lambda i, k: (i, 0)),
            scratch_shapes=[pltpu.VMEM((tile_m, fp), jnp.float32)],
        ),
        compiler_params=pltpu.CompilerParams(
            dimension_semantics=("parallel", "arbitrary")),
        cost_estimate=cost,
    )(adj, xw2, dis, b2_p)


# ---------------------------------------------------------------------------
# Full forward
# ---------------------------------------------------------------------------
@functools.partial(jax.jit, static_argnames=("num_nodes", "tile_m", "tile_k"))
def bppgcn_forward(edge_index, edge_attr, w1, b1, w2, b2, *,
                   num_nodes, tile_m=256, tile_k=512):
    """BPPGCN forward.  w1:(H,1) b1:(H,) w2:(H,H) b2:(H,) (nn.Linear layout)."""
    assert tile_k % tile_m == 0 and tile_m % 128 == 0
    n_pad = _round_up(max(num_nodes, tile_k), tile_k)
    hidden = w1.shape[0]
    fp = _round_up(hidden, 128)

    # --- graph preprocessing (outside the kernels) ----------------------------
    # TODO(synk): the data-dependent scatter of edges into a dense adjacency has
    # no clean Pallas TPU equivalent; it is done with jnp scatter-add here.
    src = edge_index[0]
    tgt = edge_index[1]
    w = edge_attr.astype(jnp.float32)

    # Weighted degree via an edge segment-sum (avoids an N^2 dense reduction).
    deg = jnp.zeros((n_pad,), jnp.float32).at[tgt].add(w)
    deg = deg.at[jnp.arange(num_nodes)].add(1.0)                 # self loops
    d_inv_sqrt = jnp.where(deg > 0.0, jax.lax.rsqrt(jnp.maximum(deg, 1e-12)), 0.0)
    dis = d_inv_sqrt.reshape(n_pad, 1)                           # zero on padded rows

    # Dense A_hat[target, source] built directly in the matmul dtype (bf16).
    adj = jnp.zeros((n_pad, n_pad), jnp.bfloat16)
    adj = adj.at[tgt, src].add(w.astype(jnp.bfloat16))
    diag = jnp.arange(num_nodes)
    adj = adj.at[diag, diag].add(1.0)                            # self loops, weight 1.0

    # Parameters, zero-padded on the feature axis to fp (lane-dense stores).
    w1t_p = jnp.zeros((1, fp), jnp.float32).at[:, :hidden].set(
        w1.astype(jnp.float32).T.reshape(1, hidden))
    b1_p = jnp.zeros((1, fp), jnp.float32).at[:, :hidden].set(
        b1.astype(jnp.float32).reshape(1, hidden))
    w2t_p = jnp.zeros((fp, fp), jnp.bfloat16).at[:hidden, :hidden].set(
        w2.astype(jnp.bfloat16).T)
    b2_p = jnp.zeros((1, fp), jnp.float32).at[:, :hidden].set(
        b2.astype(jnp.float32).reshape(1, hidden))

    # --- layer 1 aggregation (+ fused layer-2 linear) -> XW2 ------------------
    xw2 = _layer1(adj, dis, w1t_p, b1_p, w2t_p, tile_m=tile_m, tile_k=tile_k)
    # --- layer 2 aggregation ---------------------------------------------------
    h2 = _layer2(adj, xw2, dis, b2_p, tile_m=tile_m, tile_k=tile_k)

    return h2[:num_nodes, :hidden]


if __name__ == "__main__":
    key = jax.random.PRNGKey(0)
    ks = jax.random.split(key, 7)

    num_nodes = 1000          # padded to 1024 -> aggregation grid (4, 2)
    num_edges = 4000
    hidden_dim = 64           # module default

    src = jax.random.randint(ks[0], (num_edges,), 0, num_nodes, dtype=jnp.int32)
    dst = jax.random.randint(ks[1], (num_edges,), 0, num_nodes, dtype=jnp.int32)
    dst = jnp.where(dst == src, (dst + 1) % num_nodes, dst)      # no explicit self loops
    edge_index = jnp.stack([src, dst])                            # (2, E)
    edge_attr = jax.random.uniform(ks[2], (num_edges,), minval=0.5, maxval=1.5)

    # GCNConv parameters (nn.Linear weight layout: (out_features, in_features))
    w1 = jax.random.normal(ks[3], (hidden_dim, 1), jnp.float32) * 0.5
    b1 = jax.random.normal(ks[4], (hidden_dim,), jnp.float32) * 0.1
    w2 = jax.random.normal(ks[5], (hidden_dim, hidden_dim), jnp.float32) / jnp.sqrt(hidden_dim)
    b2 = jax.random.normal(ks[6], (hidden_dim,), jnp.float32) * 0.1

    out = jax.block_until_ready(
        bppgcn_forward(edge_index, edge_attr, w1, b1, w2, b2,
                       num_nodes=num_nodes, tile_m=256, tile_k=512))

    # ---- pure-JAX f32 reference mirroring PyG GCNConv exactly -----------------
    adj_ref = jnp.zeros((num_nodes, num_nodes), jnp.float32)
    adj_ref = adj_ref.at[dst, src].add(edge_attr) + jnp.eye(num_nodes, dtype=jnp.float32)
    deg_ref = adj_ref.sum(axis=1)
    dis_ref = jnp.where(deg_ref > 0, 1.0 / jnp.sqrt(deg_ref), 0.0)
    m = dis_ref[:, None] * adj_ref * dis_ref[None, :]
    x0 = jnp.ones((num_nodes, 1), jnp.float32)
    h1_ref = jnp.maximum(m @ (x0 @ w1.T) + b1, 0.0)
    ref = jnp.maximum(m @ (h1_ref @ w2.T) + b2, 0.0)

    assert out.shape == (num_nodes, hidden_dim), out.shape
    # Tolerance reflects bf16 storage of A_hat / XW2 and bf16 MXU operand precision.
    err = float(jnp.max(jnp.abs(out - ref)))
    assert jnp.allclose(out, ref, atol=3e-2, rtol=3e-2), err
    print("KERNEL_OK")
</pallas_src>

<mosaic_0001>
module attributes {stable_mosaic.version = 11 : i64} {
  func.func private @main(%arg0: i32) attributes {dimension_semantics = [#tpu.dimension_semantics<core_parallel>], iteration_bounds = array<i64: 2>, tpu.core_type = #tpu.core_type<sc_scalar_subcore>, window_params = []} {
    return
  }
}

module attributes {stable_mosaic.version = 11 : i64} {
  func.func private @main(%arg0: i32) attributes {dimension_semantics = [#tpu.dimension_semantics<core_parallel>], iteration_bounds = array<i64: 2>, tpu.core_type = #tpu.core_type<sc_scalar_subcore>, window_params = []} {
    return
  }
}

module attributes {stable_mosaic.version = 11 : i64} {
  func.func @_layer1_kernel(%arg0: i32, %arg1: i32, %arg2: memref<256x512xbf16, #tpu.memory_space<vmem>>, %arg3: memref<512x1xf32, #tpu.memory_space<vmem>>, %arg4: memref<256x1xf32, #tpu.memory_space<vmem>>, %arg5: memref<1x128xf32, #tpu.memory_space<vmem>>, %arg6: memref<1x128xf32, #tpu.memory_space<vmem>>, %arg7: memref<128x128xbf16, #tpu.memory_space<vmem>>, %arg8: memref<256x128xbf16, #tpu.memory_space<vmem>>, %arg9: memref<256x128xf32, #tpu.memory_space<vmem>>) attributes {dimension_semantics = [#tpu.dimension_semantics<parallel>, #tpu.dimension_semantics<arbitrary>], iteration_bounds = array<i64: 4, 2>, scalar_prefetch = 0 : i64, scratch_operands = 1 : i64, tpu.core_type = #tpu.core_type<tc>, window_params = [{transform_indices = @transform_0, window_bounds = array<i64: 256, 512>}, {transform_indices = @transform_1, window_bounds = array<i64: 512, 1>}, {transform_indices = @transform_2, window_bounds = array<i64: 256, 1>}, {pipeline_mode = #tpu.pipeline_mode<synchronous>, transform_indices = @transform_3, window_bounds = array<i64: 1, 128>}, {pipeline_mode = #tpu.pipeline_mode<synchronous>, transform_indices = @transform_4, window_bounds = array<i64: 1, 128>}, {pipeline_mode = #tpu.pipeline_mode<synchronous>, transform_indices = @transform_5, window_bounds = array<i64: 128, 128>}, {transform_indices = @transform_6, window_bounds = array<i64: 256, 128>}]} {
    %c0_i32 = arith.constant 0 : i32
    %0 = arith.cmpi eq, %arg1, %c0_i32 : i32
    %1 = arith.extui %0 : i1 to i32
    %c0_i32_0 = arith.constant 0 : i32
    %2 = arith.cmpi ne, %1, %c0_i32_0 : i32
    scf.if %2 {
      %cst_11 = arith.constant 0.000000e+00 : f32
      %17 = vector.broadcast %cst_11 : f32 to vector<256x128xf32>
      %c0_12 = arith.constant 0 : index
      %c0_13 = arith.constant 0 : index
      %18 = vector.load %arg9[%c0_12, %c0_13] : memref<256x128xf32, #tpu.memory_space<vmem>>, vector<256x128xf32>
      tpu.vector_store %arg9[%c0_12, %c0_13], %17 {strides = array<i32>} : memref<256x128xf32, #tpu.memory_space<vmem>>, vector<256x128xf32>,
    } else {
    }
    %c0 = arith.constant 0 : index
    %c0_1 = arith.constant 0 : index
    %3 = vector.load %arg3[%c0, %c0_1] : memref<512x1xf32, #tpu.memory_space<vmem>>, vector<512x1xf32>
    %c0_2 = arith.constant 0 : index
    %c0_3 = arith.constant 0 : index
    %4 = vector.load %arg5[%c0_2, %c0_3] : memref<1x128xf32, #tpu.memory_space<vmem>>, vector<1x128xf32>
    %5 = vector.broadcast %3 : vector<512x1xf32> to vector<512x128xf32>
    %6 = vector.broadcast %4 : vector<1x128xf32> to vector<512x128xf32>
    %7 = arith.mulf %5, %6 : vector<512x128xf32>
    %8 = arith.truncf %7 : vector<512x128xf32> to vector<512x128xbf16>
    %c0_4 = arith.constant 0 : index
    %c0_5 = arith.constant 0 : index
    %9 = vector.load %arg9[%c0_4, %c0_5] : memref<256x128xf32, #tpu.memory_space<vmem>>, vector<256x128xf32>
    %c0_6 = arith.constant 0 : index
    %c0_7 = arith.constant 0 : index
    %10 = vector.load %arg2[%c0_6, %c0_7] : memref<256x512xbf16, #tpu.memory_space<vmem>>, vector<256x512xbf16>
    %cst = arith.constant dense<0.000000e+00> : vector<256x128xf32>
    %11 = tpu.matmul %10, %8, %cst {dimension_numbers = #tpu.dot_dimension_numbers<[1], [0], [0], [1], [0, 0, 1, 1], [], []>} : vector<256x512xbf16>, vector<512x128xbf16>, vector<256x128xf32> -> vector<256x128xf32>
    %12 = arith.addf %9, %11 : vector<256x128xf32>
    %c0_8 = arith.constant 0 : index
    %c0_9 = arith.constant 0 : index
    %13 = vector.load %arg9[%c0_8, %c0_9] : memref<256x128xf32, #tpu.memory_space<vmem>>, vector<256x128xf32>
    tpu.vector_store %arg9[%c0_8, %c0_9], %12 {strides = array<i32>} : memref<256x128xf32, #tpu.memory_space<vmem>>, vector<256x128xf32>,
    %c1_i32 = arith.constant 1 : i32
    %14 = arith.cmpi eq, %arg1, %c1_i32 : i32
    %15 = arith.extui %14 : i1 to i32
    %c0_i32_10 = arith.constant 0 : i32
    %16 = arith.cmpi ne, %15, %c0_i32_10 : i32
    scf.if %16 {
      %c0_11 = arith.constant 0 : index
      %c0_12 = arith.constant 0 : index
      %17 = vector.load %arg4[%c0_11, %c0_12] : memref<256x1xf32, #tpu.memory_space<vmem>>, vector<256x1xf32>
      %c0_13 = arith.constant 0 : index
      %c0_14 = arith.constant 0 : index
      %18 = vector.load %arg9[%c0_13, %c0_14] : memref<256x128xf32, #tpu.memory_space<vmem>>, vector<256x128xf32>
      %19 = vector.broadcast %17 : vector<256x1xf32> to vector<256x128xf32>
      %20 = arith.mulf %19, %18 : vector<256x128xf32>
      %c0_15 = arith.constant 0 : index
      %c0_16 = arith.constant 0 : index
      %21 = vector.load %arg6[%c0_15, %c0_16] : memref<1x128xf32, #tpu.memory_space<vmem>>, vector<1x128xf32>
      %22 = vector.broadcast %21 : vector<1x128xf32> to vector<256x128xf32>
      %23 = arith.addf %20, %22 : vector<256x128xf32>
      %cst_17 = arith.constant 0.000000e+00 : f32
      %24 = vector.broadcast %cst_17 : f32 to vector<256x128xf32>
      %25 = arith.maximumf %23, %24 : vector<256x128xf32>
      %26 = arith.truncf %25 : vector<256x128xf32> to vector<256x128xbf16>
      %c0_18 = arith.constant 0 : index
      %c0_19 = arith.constant 0 : index
      %27 = vector.load %arg7[%c0_18, %c0_19] : memref<128x128xbf16, #tpu.memory_space<vmem>>, vector<128x128xbf16>
      %cst_20 = arith.constant dense<0.000000e+00> : vector<256x128xf32>
      %28 = tpu.matmul %26, %27, %cst_20 {dimension_numbers = #tpu.dot_dimension_numbers<[1], [0], [0], [1], [0, 0, 1, 1], [], []>} : vector<256x128xbf16>, vector<128x128xbf16>, vector<256x128xf32> -> vector<256x128xf32>
      %c0_21 = arith.constant 0 : index
      %c0_22 = arith.constant 0 : index
      %29 = vector.load %arg4[%c0_21, %c0_22] : memref<256x1xf32, #tpu.memory_space<vmem>>, vector<256x1xf32>
      %30 = vector.broadcast %29 : vector<256x1xf32> to vector<256x128xf32>
      %31 = arith.mulf %30, %28 : vector<256x128xf32>
      %32 = arith.truncf %31 : vector<256x128xf32> to vector<256x128xbf16>
      %c0_23 = arith.constant 0 : index
      %c0_24 = arith.constant 0 : index
      %33 = vector.load %arg8[%c0_23, %c0_24] : memref<256x128xbf16, #tpu.memory_space<vmem>>, vector<256x128xbf16>
      tpu.vector_store %arg8[%c0_23, %c0_24], %32 {strides = array<i32>} : memref<256x128xbf16, #tpu.memory_space<vmem>>, vector<256x128xbf16>,
    } else {
    }
    return
  }
  func.func @transform_0(%arg0: i32, %arg1: i32) -> (i32, i32) {
    %c0_i32 = arith.constant 0 : i32
    return %arg0, %arg1 : i32, i32
  }
  func.func @transform_1(%arg0: i32, %arg1: i32) -> (i32, i32) {
    %c0_i32 = arith.constant 0 : i32
    %c0_i32_0 = arith.constant 0 : i32
    return %arg1, %c0_i32 : i32, i32
  }
  func.func @transform_2(%arg0: i32, %arg1: i32) -> (i32, i32) {
    %c0_i32 = arith.constant 0 : i32
    %c0_i32_0 = arith.constant 0 : i32
    return %arg0, %c0_i32 : i32, i32
  }
  func.func @transform_3(%arg0: i32, %arg1: i32) -> (i32, i32) {
    %c0_i32 = arith.constant 0 : i32
    %c0_i32_0 = arith.constant 0 : i32
    %c0_i32_1 = arith.constant 0 : i32
    return %c0_i32, %c0_i32_0 : i32, i32
  }
  func.func @transform_4(%arg0: i32, %arg1: i32) -> (i32, i32) {
    %c0_i32 = arith.constant 0 : i32
    %c0_i32_0 = arith.constant 0 : i32
    %c0_i32_1 = arith.constant 0 : i32
    return %c0_i32, %c0_i32_0 : i32, i32
  }
  func.func @transform_5(%arg0: i32, %arg1: i32) -> (i32, i32) {
    %c0_i32 = arith.constant 0 : i32
    %c0_i32_0 = arith.constant 0 : i32
    %c0_i32_1 = arith.constant 0 : i32
    return %c0_i32, %c0_i32_0 : i32, i32
  }
  func.func @transform_6(%arg0: i32, %arg1: i32) -> (i32, i32) {
    %c0_i32 = arith.constant 0 : i32
    %c0_i32_0 = arith.constant 0 : i32
    return %arg0, %c0_i32 : i32, i32
  }
}

module attributes {stable_mosaic.version = 11 : i64} {
  func.func @_layer2_kernel(%arg0: i32, %arg1: i32, %arg2: memref<256x512xbf16, #tpu.memory_space<vmem>>, %arg3: memref<1024x128xbf16, #tpu.memory_space<vmem>>, %arg4: memref<256x1xf32, #tpu.memory_space<vmem>>, %arg5: memref<1x128xf32, #tpu.memory_space<vmem>>, %arg6: memref<256x128xf32, #tpu.memory_space<vmem>>, %arg7: memref<256x128xf32, #tpu.memory_space<vmem>>) attributes {dimension_semantics = [#tpu.dimension_semantics<parallel>, #tpu.dimension_semantics<arbitrary>], iteration_bounds = array<i64: 4, 2>, scalar_prefetch = 0 : i64, scratch_operands = 1 : i64, tpu.core_type = #tpu.core_type<tc>, window_params = [{transform_indices = @transform_0, window_bounds = array<i64: 256, 512>}, {pipeline_mode = #tpu.pipeline_mode<synchronous>, transform_indices = @transform_1, window_bounds = array<i64: 1024, 128>}, {transform_indices = @transform_2, window_bounds = array<i64: 256, 1>}, {pipeline_mode = #tpu.pipeline_mode<synchronous>, transform_indices = @transform_3, window_bounds = array<i64: 1, 128>}, {transform_indices = @transform_4, window_bounds = array<i64: 256, 128>}]} {
    %c0_i32 = arith.constant 0 : i32
    %0 = arith.cmpi eq, %arg1, %c0_i32 : i32
    %1 = arith.extui %0 : i1 to i32
    %c0_i32_0 = arith.constant 0 : i32
    %2 = arith.cmpi ne, %1, %c0_i32_0 : i32
    scf.if %2 {
      %cst_8 = arith.constant 0.000000e+00 : f32
      %15 = vector.broadcast %cst_8 : f32 to vector<256x128xf32>
      %c0_9 = arith.constant 0 : index
      %c0_10 = arith.constant 0 : index
      %16 = vector.load %arg7[%c0_9, %c0_10] : memref<256x128xf32, #tpu.memory_space<vmem>>, vector<256x128xf32>
      tpu.vector_store %arg7[%c0_9, %c0_10], %15 {strides = array<i32>} : memref<256x128xf32, #tpu.memory_space<vmem>>, vector<256x128xf32>,
    } else {
    }
    %c512_i32 = arith.constant 512 : i32
    %3 = arith.muli %arg1, %c512_i32 : i32
    %4 = tpu.assume_multiple %3, 512 : i32
    %c0 = arith.constant 0 : index
    %c0_1 = arith.constant 0 : index
    %5 = vector.load %arg7[%c0, %c0_1] : memref<256x128xf32, #tpu.memory_space<vmem>>, vector<256x128xf32>
    %c0_2 = arith.constant 0 : index
    %c0_3 = arith.constant 0 : index
    %6 = vector.load %arg2[%c0_2, %c0_3] : memref<256x512xbf16, #tpu.memory_space<vmem>>, vector<256x512xbf16>
    %7 = arith.index_cast %4 : i32 to index
    %c0_4 = arith.constant 0 : index
    %8 = vector.load %arg3[%7, %c0_4] : memref<1024x128xbf16, #tpu.memory_space<vmem>>, vector<512x128xbf16>
    %cst = arith.constant dense<0.000000e+00> : vector<256x128xf32>
    %9 = tpu.matmul %6, %8, %cst {dimension_numbers = #tpu.dot_dimension_numbers<[1], [0], [0], [1], [0, 0, 1, 1], [], []>} : vector<256x512xbf16>, vector<512x128xbf16>, vector<256x128xf32> -> vector<256x128xf32>
    %10 = arith.addf %5, %9 : vector<256x128xf32>
    %c0_5 = arith.constant 0 : index
    %c0_6 = arith.constant 0 : index
    %11 = vector.load %arg7[%c0_5, %c0_6] : memref<256x128xf32, #tpu.memory_space<vmem>>, vector<256x128xf32>
    tpu.vector_store %arg7[%c0_5, %c0_6], %10 {strides = array<i32>} : memref<256x128xf32, #tpu.memory_space<vmem>>, vector<256x128xf32>,
    %c1_i32 = arith.constant 1 : i32
    %12 = arith.cmpi eq, %arg1, %c1_i32 : i32
    %13 = arith.extui %12 : i1 to i32
    %c0_i32_7 = arith.constant 0 : i32
    %14 = arith.cmpi ne, %13, %c0_i32_7 : i32
    scf.if %14 {
      %c0_8 = arith.constant 0 : index
      %c0_9 = arith.constant 0 : index
      %15 = vector.load %arg4[%c0_8, %c0_9] : memref<256x1xf32, #tpu.memory_space<vmem>>, vector<256x1xf32>
      %c0_10 = arith.constant 0 : index
      %c0_11 = arith.constant 0 : index
      %16 = vector.load %arg7[%c0_10, %c0_11] : memref<256x128xf32, #tpu.memory_space<vmem>>, vector<256x128xf32>
      %17 = vector.broadcast %15 : vector<256x1xf32> to vector<256x128xf32>
      %18 = arith.mulf %17, %16 : vector<256x128xf32>
      %c0_12 = arith.constant 0 : index
      %c0_13 = arith.constant 0 : index
      %19 = vector.load %arg5[%c0_12, %c0_13] : memref<1x128xf32, #tpu.memory_space<vmem>>, vector<1x128xf32>
      %20 = vector.broadcast %19 : vector<1x128xf32> to vector<256x128xf32>
      %21 = arith.addf %18, %20 : vector<256x128xf32>
      %cst_14 = arith.constant 0.000000e+00 : f32
      %22 = vector.broadcast %cst_14 : f32 to vector<256x128xf32>
      %23 = arith.maximumf %21, %22 : vector<256x128xf32>
      %c0_15 = arith.constant 0 : index
      %c0_16 = arith.constant 0 : index
      %24 = vector.load %arg6[%c0_15, %c0_16] : memref<256x128xf32, #tpu.memory_space<vmem>>, vector<256x128xf32>
      tpu.vector_store %arg6[%c0_15, %c0_16], %23 {strides = array<i32>} : memref<256x128xf32, #tpu.memory_space<vmem>>, vector<256x128xf32>,
    } else {
    }
    return
  }
  func.func @transform_0(%arg0: i32, %arg1: i32) -> (i32, i32) {
    %c0_i32 = arith.constant 0 : i32
    return %arg0, %arg1 : i32, i32
  }
  func.func @transform_1(%arg0: i32, %arg1: i32) -> (i32, i32) {
    %c0_i32 = arith.constant 0 : i32
    %c0_i32_0 = arith.constant 0 : i32
    %c0_i32_1 = arith.constant 0 : i32
    return %c0_i32, %c0_i32_0 : i32, i32
  }
  func.func @transform_2(%arg0: i32, %arg1: i32) -> (i32, i32) {
    %c0_i32 = arith.constant 0 : i32
    %c0_i32_0 = arith.constant 0 : i32
    return %arg0, %c0_i32 : i32, i32
  }
  func.func @transform_3(%arg0: i32, %arg1: i32) -> (i32, i32) {
    %c0_i32 = arith.constant 0 : i32
    %c0_i32_0 = arith.constant 0 : i32
    %c0_i32_1 = arith.constant 0 : i32
    return %c0_i32, %c0_i32_0 : i32, i32
  }
  func.func @transform_4(%arg0: i32, %arg1: i32) -> (i32, i32) {
    %c0_i32 = arith.constant 0 : i32
    %c0_i32_0 = arith.constant 0 : i32
    return %arg0, %c0_i32 : i32, i32
  }
}

</mosaic_0001>

<bundles_post_ra>
// kernel: bppgcn_forward.2
= control target key start
LH: loop header
LB: loop body
LE: loop exit
PB: predicated region body
PF: predicated region fallthrough
CT: control target
= control target key end

     0   :  { %s3481_s21 = smov 0   ;;  %s3483_s22 = smov 0   ;;  %s4152_s0 = inlined_call_operand.vmem [shape: bf16[1024,1024], index: 0, kind: input, shape index: {}]   ;;  %s4153_s1 = inlined_call_operand.vmem [shape: f32[1024,1], index: 1, kind: input, shape index: {}, may-alias: {1,2}]   ;;  %s4154_s2 = inlined_call_operand.vmem [shape: f32[1024,1], index: 2, kind: input, shape index: {}, may-alias: {1,2}]   ;;  %s4155_s3 = inlined_call_operand.vmem [shape: f32[1,128], index: 3, kind: input, shape index: {}]   ;;  %s4156_s4 = inlined_call_operand.vmem [shape: f32[1,128], index: 4, kind: input, shape index: {}]   ;;  %s4157_s5 = inlined_call_operand.vmem [shape: bf16[128,128], index: 5, kind: input, shape index: {}]   ;;  %s4158_s6 = inlined_call_operand.vmem [shape: bf16[1024,128], index: 6, kind: output, shape index: {}]  }
   0x1   :  { %s3485_s23 = smov 0   ;;  %s3487_s24 = smov 0  }
   0x2   :  { %s3489_s25 = smov 0   ;;  %s3491_s26 = smov 0  }
   0x3   :  { %s3493_s27 = smov 0  }
   0x4 LB: > { %s25_s28 = sadd.s32 1, %s3433_s25  ;;  %s28_s29 = sadd.s32 1, %s3437_s26  ;;  %s3441_s27 = sphi %s3493_s27, %s16_s27   ;;  %s3437_s26 = sphi %s3491_s26, %s4164_s26   ;;  %s3433_s25 = sphi %s3489_s25, %s4163_s25   ;;  %s3429_s24 = sphi %s3487_s24, %s4162_s24   ;;  %s3425_s23 = sphi %s3485_s23, %s4161_s23   ;;  %s3421_s22 = sphi %s3483_s22, %s4160_s22   ;;  %s3417_s21 = sphi %s3481_s21, %s4159_s21  }
   0x5   : > { %p26_p0 = scmp.ge.s32.totalorder %s25_s28, 2  ;;  %p44_p1 = scmp.ne.s32.totalorder %s3421_s22, %s3417_s21 }
   0x6   : > { %p45_p2 = scmp.eq.s32.totalorder %s3441_s27, 0  ;;  %s37_s9 = sadd.s32 1, %s3421_s22 }
   0x7   : > { %s4166_s28 = smov (%p26_p0, %s25_s28), 0  ;;  %s4168_s29 = smov (!%p26_p0, %s28_s29), %s3437_s26 }
   0x8   : > { %p46_p3 = por %p45_p2, %p44_p1  ;;  %p30_p4 = scmp.ge.s32.totalorder %s4168_s29, 4 }
   0x9   : > { %s33_s30 = ssub.s32 %s3433_s25, %s4166_s28  ;;  %p2656_p6 = scmp.ge.s32.totalorder %s3441_s27, 8 }
   0xa   : > { %s4170_s29 = smov (%p30_p4, %s4168_s29), 0 }
   0xb   : > { %s32_s7 = ssub.s32 %s3437_s26, %s4170_s29  ;;  %220 = sbr.rel (%p2656_p6) target bundleno = 57 (0x39), region = 28 }
   0xc   : > { %s34_s8 = sor.u32 %s33_s30, %s32_s7 }
   0xd   : > { %p35_p5 = scmp.eq.s32.totalorder %s34_s8, 0 }
   0xf   : > { %s3532_s10 = scalar_select %p35_p5, %s3421_s22, %s37_s9  }
  0x12   : > { %223 = sbr.rel (!%p46_p3) target bundleno = 57 (0x39), region = 32  ;;  %s225_s11 = sand.u32 (%p46_p3), 1, %s3421_s22  }
  0x13   : > { %s2659_s12 = sshll.u32 (%p46_p3), %s3433_s25, 2  ;;  %s2657_s13 = sshll.u32 (%p46_p3), %s225_s11, 9 }
  0x14   : > { %s2780_s14 = sshll.u32 (%p46_p3), %s3437_s26, 8  ;;  %s3546_s20 = scalar_lea.vmem (%p46_p3), [#allocation3], %s2657_s13 }
  0x15   : > { %s231_s15 = sadd.s32 (%p46_p3), %s2780_s14, %s2659_s12 }
  0x16   : > { %s2661_s16 = sshll.u32 (%p46_p3), %s231_s15, 2 }
  0x17   : > { %s3541_s19 = scalar_lea.vmem (%p46_p3), %s4152_s0, %s2661_s16 }
  0x18   : > { %v246_v0 = vld [vmem:[%s3541_s19] sm:$0xff] (%p46_p3)  ;;  %v248_v1 = vld [vmem:[%s3541_s19 + $0x8] sm:$0xff] (%p46_p3) }
  0x19   : > { %v250_v2 = vld [vmem:[%s3541_s19 + $0x20] sm:$0xff]  ;;  %247 = vst [vmem:[%s3546_s20] sm:$0xff] %v246_v0  ;;  %249 = vst [vmem:[%s3546_s20 + $0x8] sm:$0xff] %v248_v1  ;;  %v252_v3 = vld [vmem:[%s3541_s19 + $0x28] sm:$0xff] }
  0x1a   : > { %251 = vst [vmem:[%s3546_s20 + $0x10] sm:$0xff] %v250_v2  ;;  %v254_v4 = vld [vmem:[%s3541_s19 + $0x40] sm:$0xff]  ;;  %v256_v5 = vld [vmem:[%s3541_s19 + $0x48] sm:$0xff]  ;;  %253 = vst [vmem:[%s3546_s20 + $0x18] sm:$0xff] %v252_v3 }
  0x1b   : > { %255 = vst [vmem:[%s3546_s20 + $0x20] sm:$0xff] %v254_v4  ;;  %257 = vst [vmem:[%s3546_s20 + $0x28] sm:$0xff] %v256_v5  ;;  %v258_v6 = vld [vmem:[%s3541_s19 + $0x60] sm:$0xff]  ;;  %v260_v7 = vld [vmem:[%s3541_s19 + $0x68] sm:$0xff] }
  0x1c   : > { %v262_v8 = vld [vmem:[%s3541_s19 + $0x80] sm:$0xff]  ;;  %259 = vst [vmem:[%s3546_s20 + $0x30] sm:$0xff] %v258_v6  ;;  %261 = vst [vmem:[%s3546_s20 + $0x38] sm:$0xff] %v260_v7  ;;  %v264_v9 = vld [vmem:[%s3541_s19 + $0x88] sm:$0xff] }
  0x1d   : > { %263 = vst [vmem:[%s3546_s20 + $0x40] sm:$0xff] %v262_v8  ;;  %v266_v10 = vld [vmem:[%s3541_s19 + $0xa0] sm:$0xff]  ;;  %v268_v11 = vld [vmem:[%s3541_s19 + $0xa8] sm:$0xff]  ;;  %265 = vst [vmem:[%s3546_s20 + $0x48] sm:$0xff] %v264_v9 }
  0x1e   : > { %267 = vst [vmem:[%s3546_s20 + $0x50] sm:$0xff] %v266_v10  ;;  %269 = vst [vmem:[%s3546_s20 + $0x58] sm:$0xff] %v268_v11  ;;  %v270_v12 = vld [vmem:[%s3541_s19 + $0xc0] sm:$0xff]  ;;  %v272_v13 = vld [vmem:[%s3541_s19 + $0xc8] sm:$0xff] }
  0x1f   : > { %v274_v14 = vld [vmem:[%s3541_s19 + $0xe0] sm:$0xff]  ;;  %271 = vst [vmem:[%s3546_s20 + $0x60] sm:$0xff] %v270_v12  ;;  %273 = vst [vmem:[%s3546_s20 + $0x68] sm:$0xff] %v272_v13  ;;  %v276_v15 = vld [vmem:[%s3541_s19 + $0xe8] sm:$0xff] }
  0x20   : > { %275 = vst [vmem:[%s3546_s20 + $0x70] sm:$0xff] %v274_v14  ;;  %v278_v16 = vld [vmem:[%s3541_s19 + $0x100] sm:$0xff]  ;;  %v280_v17 = vld [vmem:[%s3541_s19 + $0x108] sm:$0xff]  ;;  %277 = vst [vmem:[%s3546_s20 + $0x78] sm:$0xff] %v276_v15 }
  0x21   : > { %279 = vst [vmem:[%s3546_s20 + $0x80] sm:$0xff] %v278_v16  ;;  %281 = vst [vmem:[%s3546_s20 + $0x88] sm:$0xff] %v280_v17  ;;  %v282_v18 = vld [vmem:[%s3541_s19 + $0x120] sm:$0xff]  ;;  %v284_v19 = vld [vmem:[%s3541_s19 + $0x128] sm:$0xff] }
  0x22   : > { %v286_v20 = vld [vmem:[%s3541_s19 + $0x140] sm:$0xff]  ;;  %283 = vst [vmem:[%s3546_s20 + $0x90] sm:$0xff] %v282_v18  ;;  %285 = vst [vmem:[%s3546_s20 + $0x98] sm:$0xff] %v284_v19  ;;  %v288_v21 = vld [vmem:[%s3541_s19 + $0x148] sm:$0xff] }
  0x23   : > { %287 = vst [vmem:[%s3546_s20 + $0xa0] sm:$0xff] %v286_v20  ;;  %v290_v22 = vld [vmem:[%s3541_s19 + $0x160] sm:$0xff]  ;;  %v292_v23 = vld [vmem:[%s3541_s19 + $0x168] sm:$0xff]  ;;  %289 = vst [vmem:[%s3546_s20 + $0xa8] sm:$0xff] %v288_v21 }
  0x24   : > { %291 = vst [vmem:[%s3546_s20 + $0xb0] sm:$0xff] %v290_v22  ;;  %293 = vst [vmem:[%s3546_s20 + $0xb8] sm:$0xff] %v292_v23  ;;  %v294_v24 = vld [vmem:[%s3541_s19 + $0x180] sm:$0xff]  ;;  %v296_v25 = vld [vmem:[%s3541_s19 + $0x188] sm:$0xff] }
  0x25   : > { %v298_v26 = vld [vmem:[%s3541_s19 + $0x1a0] sm:$0xff]  ;;  %295 = vst [vmem:[%s3546_s20 + $0xc0] sm:$0xff] %v294_v24  ;;  %297 = vst [vmem:[%s3546_s20 + $0xc8] sm:$0xff] %v296_v25  ;;  %v300_v27 = vld [vmem:[%s3541_s19 + $0x1a8] sm:$0xff] }
  0x26   : > { %299 = vst [vmem:[%s3546_s20 + $0xd0] sm:$0xff] %v298_v26  ;;  %v302_v28 = vld [vmem:[%s3541_s19 + $0x1c0] sm:$0xff]  ;;  %v304_v29 = vld [vmem:[%s3541_s19 + $0x1c8] sm:$0xff]  ;;  %301 = vst [vmem:[%s3546_s20 + $0xd8] sm:$0xff] %v300_v27 }
  0x27   : > { %303 = vst [vmem:[%s3546_s20 + $0xe0] sm:$0xff] %v302_v28  ;;  %305 = vst [vmem:[%s3546_s20 + $0xe8] sm:$0xff] %v304_v29  ;;  %v306_v30 = vld [vmem:[%s3541_s19 + $0x1e0] sm:$0xff]  ;;  %v308_v31 = vld [vmem:[%s3541_s19 + $0x1e8] sm:$0xff] }
  0x28   : > { %v310_v32 = vld [vmem:[%s3541_s19 + $0x200] sm:$0xff]  ;;  %307 = vst [vmem:[%s3546_s20 + $0xf0] sm:$0xff] %v306_v30  ;;  %309 = vst [vmem:[%s3546_s20 + $0xf8] sm:$0xff] %v308_v31  ;;  %v312_v33 = vld [vmem:[%s3541_s19 + $0x208] sm:$0xff] }
  0x29   : > { %311 = vst [vmem:[%s3546_s20 + $0x100] sm:$0xff] %v310_v32  ;;  %v314_v34 = vld [vmem:[%s3541_s19 + $0x220] sm:$0xff]  ;;  %v316_v35 = vld [vmem:[%s3541_s19 + $0x228] sm:$0xff]  ;;  %313 = vst [vmem:[%s3546_s20 + $0x108] sm:$0xff] %v312_v33 }
  0x2a   : > { %315 = vst [vmem:[%s3546_s20 + $0x110] sm:$0xff] %v314_v34  ;;  %317 = vst [vmem:[%s3546_s20 + $0x118] sm:$0xff] %v316_v35  ;;  %v318_v36 = vld [vmem:[%s3541_s19 + $0x240] sm:$0xff]  ;;  %v320_v37 = vld [vmem:[%s3541_s19 + $0x248] sm:$0xff] }
  0x2b   : > { %v322_v38 = vld [vmem:[%s3541_s19 + $0x260] sm:$0xff]  ;;  %319 = vst [vmem:[%s3546_s20 + $0x120] sm:$0xff] %v318_v36  ;;  %321 = vst [vmem:[%s3546_s20 + $0x128] sm:$0xff] %v320_v37  ;;  %v324_v39 = vld [vmem:[%s3541_s19 + $0x268] sm:$0xff] }
  0x2c   : > { %323 = vst [vmem:[%s3546_s20 + $0x130] sm:$0xff] %v322_v38  ;;  %v326_v40 = vld [vmem:[%s3541_s19 + $0x280] sm:$0xff]  ;;  %v328_v41 = vld [vmem:[%s3541_s19 + $0x288] sm:$0xff]  ;;  %325 = vst [vmem:[%s3546_s20 + $0x138] sm:$0xff] %v324_v39 }
  0x2d   : > { %327 = vst [vmem:[%s3546_s20 + $0x140] sm:$0xff] %v326_v40  ;;  %329 = vst [vmem:[%s3546_s20 + $0x148] sm:$0xff] %v328_v41  ;;  %v330_v42 = vld [vmem:[%s3541_s19 + $0x2a0] sm:$0xff]  ;;  %v332_v43 = vld [vmem:[%s3541_s19 + $0x2a8] sm:$0xff] }
  0x2e   : > { %v334_v44 = vld [vmem:[%s3541_s19 + $0x2c0] sm:$0xff]  ;;  %331 = vst [vmem:[%s3546_s20 + $0x150] sm:$0xff] %v330_v42  ;;  %333 = vst [vmem:[%s3546_s20 + $0x158] sm:$0xff] %v332_v43  ;;  %v336_v45 = vld [vmem:[%s3541_s19 + $0x2c8] sm:$0xff] }
  0x2f   : > { %335 = vst [vmem:[%s3546_s20 + $0x160] sm:$0xff] %v334_v44  ;;  %v338_v46 = vld [vmem:[%s3541_s19 + $0x2e0] sm:$0xff]  ;;  %v340_v47 = vld [vmem:[%s3541_s19 + $0x2e8] sm:$0xff]  ;;  %337 = vst [vmem:[%s3546_s20 + $0x168] sm:$0xff] %v336_v45 }
  0x30   : > { %339 = vst [vmem:[%s3546_s20 + $0x170] sm:$0xff] %v338_v46  ;;  %341 = vst [vmem:[%s3546_s20 + $0x178] sm:$0xff] %v340_v47  ;;  %v342_v48 = vld [vmem:[%s3541_s19 + $0x300] sm:$0xff]  ;;  %v344_v49 = vld [vmem:[%s3541_s19 + $0x308] sm:$0xff] }
  0x31   : > { %v346_v50 = vld [vmem:[%s3541_s19 + $0x320] sm:$0xff]  ;;  %343 = vst [vmem:[%s3546_s20 + $0x180] sm:$0xff] %v342_v48  ;;  %345 = vst [vmem:[%s3546_s20 + $0x188] sm:$0xff] %v344_v49  ;;  %v348_v51 = vld [vmem:[%s3541_s19 + $0x328] sm:$0xff] }
  0x32   : > { %347 = vst [vmem:[%s3546_s20 + $0x190] sm:$0xff] %v346_v50  ;;  %v350_v52 = vld [vmem:[%s3541_s19 + $0x340] sm:$0xff]  ;;  %v352_v53 = vld [vmem:[%s3541_s19 + $0x348] sm:$0xff]  ;;  %349 = vst [vmem:[%s3546_s20 + $0x198] sm:$0xff] %v348_v51 }
  0x33   : > { %351 = vst [vmem:[%s3546_s20 + $0x1a0] sm:$0xff] %v350_v52  ;;  %353 = vst [vmem:[%s3546_s20 + $0x1a8] sm:$0xff] %v352_v53  ;;  %v354_v54 = vld [vmem:[%s3541_s19 + $0x360] sm:$0xff]  ;;  %v356_v55 = vld [vmem:[%s3541_s19 + $0x368] sm:$0xff] }
  0x34   : > { %v358_v56 = vld [vmem:[%s3541_s19 + $0x380] sm:$0xff]  ;;  %355 = vst [vmem:[%s3546_s20 + $0x1b0] sm:$0xff] %v354_v54  ;;  %357 = vst [vmem:[%s3546_s20 + $0x1b8] sm:$0xff] %v356_v55  ;;  %v360_v57 = vld [vmem:[%s3541_s19 + $0x388] sm:$0xff] }
  0x35   : > { %359 = vst [vmem:[%s3546_s20 + $0x1c0] sm:$0xff] %v358_v56  ;;  %v362_v58 = vld [vmem:[%s3541_s19 + $0x3a0] sm:$0xff]  ;;  %v364_v59 = vld [vmem:[%s3541_s19 + $0x3a8] sm:$0xff]  ;;  %361 = vst [vmem:[%s3546_s20 + $0x1c8] sm:$0xff] %v360_v57 }
  0x36   : > { %363 = vst [vmem:[%s3546_s20 + $0x1d0] sm:$0xff] %v362_v58  ;;  %365 = vst [vmem:[%s3546_s20 + $0x1d8] sm:$0xff] %v364_v59  ;;  %v366_v60 = vld [vmem:[%s3541_s19 + $0x3c0] sm:$0xff]  ;;  %v368_v61 = vld [vmem:[%s3541_s19 + $0x3c8] sm:$0xff] }
  0x37   : > { %v370_v62 = vld [vmem:[%s3541_s19 + $0x3e0] sm:$0xff]  ;;  %367 = vst [vmem:[%s3546_s20 + $0x1e0] sm:$0xff] %v366_v60  ;;  %369 = vst [vmem:[%s3546_s20 + $0x1e8] sm:$0xff] %v368_v61  ;;  %v372_v63 = vld [vmem:[%s3541_s19 + $0x3e8] sm:$0xff] }
  0x38   : > { %371 = vst [vmem:[%s3546_s20 + $0x1f0] sm:$0xff] %v370_v62  ;;  %373 = vst [vmem:[%s3546_s20 + $0x1f8] sm:$0xff] %v372_v63 }
  0x39 PF: > { %p2662_p7 = scmp.ge.s32.totalorder %s3441_s27, 1  ;;  %p396_p8 = scmp.lt.s32.totalorder %s3441_s27, 9 }
  0x3b   : > { %p397_p9 = pnand %p2662_p7, %p396_p8 }
  0x3c   : > { %s403_s30 = sand.u32 (!%p397_p9), 1, %s3417_s21   ;;  %s2664_s7 = sshll.u32 (!%p397_p9), %s3425_s23, 6 }
  0x3d   : > { %400 = sbr.rel (%p397_p9) target bundleno = 1078 (0x436), region = 63  ;;  %s2663_s8 = sshll.u32 (!%p397_p9), %s403_s30, 9 }
  0x3e   : > { %p445_p10 = scmp.lt.s32.totalorder (!%p397_p9), %s2664_s7, 127  ;;  %s2666_s9 = sshll.u32 (!%p397_p9), %s3429_s24, 5 }
  0x3f   : > { %p451_p11 = scmp.lt.s32.totalorder (!%p397_p9), %s2666_s9, 127  ;;  %s3693_s30 = scalar_lea.vmem (!%p397_p9), [#allocation3], %s2663_s8 }
  0x40   : > { %p2670_p12 = scmp.ne.s32.totalorder (!%p397_p9), %s3425_s23, 0 }
  0x44   : > { %s4172_s7 = smov (!%p445_p10, %s2664_s7), 127  ;;  %s4174_s9 = smov (!%p451_p11, %s2666_s9), 127 }
  0x45   : > { %s2665_s11 = sshll.u32 %s4172_s7, 3  ;;  %s2667_s15 = sshll.u32 %s4174_s9, 3  ;;  %v3443_v0 = vmov (!%p2670_p12), 0.0  }
  0x46   : > { %s3681_s14 = scalar_lea.vmem %s4153_s1, %s2665_s11  ;;  %s2669_s16 = sshll.u32 %s4174_s9, 2  ;;  %467 = vst [vmem:[#allocation2] sm:$0xff] (!%p2670_p12), %v3443_v0  ;;  %468 = vst [vmem:[#allocation2 + $0x8] sm:$0xff] (!%p2670_p12), %v3443_v0 }
  0x47   : > { %s3686_s19 = scalar_lea.vmem %s4154_s2, %s2667_s15  ;;  %s3691_s24 = scalar_lea.vmem %s4158_s6, %s2669_s16  ;;  %469 = vst [vmem:[#allocation2 + $0x10] sm:$0xff] (!%p2670_p12), %v3443_v0  ;;  %470 = vst [vmem:[#allocation2 + $0x18] sm:$0xff] (!%p2670_p12), %v3443_v0 }
  0x48   : > { %466 = sbr.rel (%p2670_p12) target bundleno = 86 (0x56), region = 71  ;;  %471 = vst [vmem:[#allocation2 + $0x20] sm:$0xff] (!%p2670_p12), %v3443_v0  ;;  %472 = vst [vmem:[#allocation2 + $0x28] sm:$0xff] (!%p2670_p12), %v3443_v0 }
  0x49   : > { %473 = vst [vmem:[#allocation2 + $0x30] sm:$0xff] (!%p2670_p12), %v3443_v0  ;;  %474 = vst [vmem:[#allocation2 + $0x38] sm:$0xff] (!%p2670_p12), %v3443_v0 }
  0x4a   : > { %475 = vst [vmem:[#allocation2 + $0x40] sm:$0xff] (!%p2670_p12), %v3443_v0  ;;  %476 = vst [vmem:[#allocation2 + $0x48] sm:$0xff] (!%p2670_p12), %v3443_v0 }
  0x4b   : > { %477 = vst [vmem:[#allocation2 + $0x50] sm:$0xff] (!%p2670_p12), %v3443_v0  ;;  %478 = vst [vmem:[#allocation2 + $0x58] sm:$0xff] (!%p2670_p12), %v3443_v0 }
  0x4c   : > { %479 = vst [vmem:[#allocation2 + $0x60] sm:$0xff] (!%p2670_p12), %v3443_v0  ;;  %480 = vst [vmem:[#allocation2 + $0x68] sm:$0xff] (!%p2670_p12), %v3443_v0 }
  0x4d   : > { %481 = vst [vmem:[#allocation2 + $0x70] sm:$0xff] (!%p2670_p12), %v3443_v0  ;;  %482 = vst [vmem:[#allocation2 + $0x78] sm:$0xff] (!%p2670_p12), %v3443_v0 }
  0x4e   : > { %483 = vst [vmem:[#allocation2 + $0x80] sm:$0xff] (!%p2670_p12), %v3443_v0  ;;  %484 = vst [vmem:[#allocation2 + $0x88] sm:$0xff] (!%p2670_p12), %v3443_v0 }
  0x4f   : > { %485 = vst [vmem:[#allocation2 + $0x90] sm:$0xff] %v3443_v0  ;;  %486 = vst [vmem:[#allocation2 + $0x98] sm:$0xff] %v3443_v0 }
  0x50   : > { %487 = vst [vmem:[#allocation2 + $0xa0] sm:$0xff] %v3443_v0  ;;  %488 = vst [vmem:[#allocation2 + $0xa8] sm:$0xff] %v3443_v0 }
  0x51   : > { %489 = vst [vmem:[#allocation2 + $0xb0] sm:$0xff] %v3443_v0  ;;  %490 = vst [vmem:[#allocation2 + $0xb8] sm:$0xff] %v3443_v0 }
  0x52   : > { %491 = vst [vmem:[#allocation2 + $0xc0] sm:$0xff] %v3443_v0  ;;  %492 = vst [vmem:[#allocation2 + $0xc8] sm:$0xff] %v3443_v0 }
  0x53   : > { %493 = vst [vmem:[#allocation2 + $0xd0] sm:$0xff] %v3443_v0  ;;  %494 = vst [vmem:[#allocation2 + $0xd8] sm:$0xff] %v3443_v0 }
  0x54   : > { %495 = vst [vmem:[#allocation2 + $0xe0] sm:$0xff] %v3443_v0  ;;  %496 = vst [vmem:[#allocation2 + $0xe8] sm:$0xff] %v3443_v0 }
  0x55   : > { %497 = vst [vmem:[#allocation2 + $0xf0] sm:$0xff] %v3443_v0  ;;  %498 = vst [vmem:[#allocation2 + $0xf8] sm:$0xff] %v3443_v0 }
  0x56 PF: > { %v547_v1 = vld [vmem:[%s3681_s14 + $0x180] sm:$0xff]  ;;  %v3444_v3 = vmov 0   ;;  %v548_v4 = vld [vmem:[%s3681_s14 + $0x188] sm:$0xff]  ;;  %v518_v10 = vld [vmem:[%s3681_s14 + $0x98] sm:$0xff]  ;;  %p2736_p13 = scmp.ne.s32.totalorder %s3425_s23, 1 }
  0x57   : > { %v515_v2 = vld [vmem:[%s3681_s14 + $0x80] sm:$0xff]  ;;  %3280 = vset.pattern.permute.xlu1 %v3444_v3  ;;  %3279 = vset.pattern.permute.xlu0 %v3444_v3  ;;  %v516_v5 = vld [vmem:[%s3681_s14 + $0x88] sm:$0xff]  ;;  %v517_v11 = vld [vmem:[%s3681_s14 + $0x90] sm:$0xff] }
  0x58   : > { %806 = vperm.xlu1 %3280, %v547_v1   ;;  %646 = vperm.xlu0 %3279, %v515_v2   ;;  %v500_v6 = vld [vmem:[%s3681_s14 + $0x8] sm:$0xff]  ;;  %v499_v7 = vld [vmem:[%s3681_s14] sm:$0xff]  ;;  %v550_v12 = vld [vmem:[%s3681_s14 + $0x198] sm:$0xff] }
  0x59   : > { %v532_v8 = vld [vmem:[%s3681_s14 + $0x108] sm:$0xff]  ;;  %v531_v9 = vld [vmem:[%s3681_s14 + $0x100] sm:$0xff]  ;;  %v549_v13 = vld [vmem:[%s3681_s14 + $0x190] sm:$0xff] }
  0x5a   : > { %v502_v14 = vld [vmem:[%s3681_s14 + $0x18] sm:$0xff]  ;;  %v501_v15 = vld [vmem:[%s3681_s14 + $0x10] sm:$0xff]  ;;  %v520_v18 = vld [vmem:[%s3681_s14 + $0xa8] sm:$0xff] }
  0x5b   : > { %v534_v16 = vld [vmem:[%s3681_s14 + $0x118] sm:$0xff]  ;;  %v533_v17 = vld [vmem:[%s3681_s14 + $0x110] sm:$0xff]  ;;  %v519_v19 = vld [vmem:[%s3681_s14 + $0xa0] sm:$0xff] }
  0x5c   : > { %811 = vperm.xlu1 %3280, %v548_v4   ;;  %651 = vperm.xlu0 %3279, %v516_v5   ;;  %v552_v20 = vld [vmem:[%s3681_s14 + $0x1a8] sm:$0xff]  ;;  %v551_v21 = vld [vmem:[%s3681_s14 + $0x1a0] sm:$0xff]  ;;  %v522_v26 = vld [vmem:[%s3681_s14 + $0xb8] sm:$0xff] }
  0x5d   : > { %v504_v22 = vld [vmem:[%s3681_s14 + $0x28] sm:$0xff]  ;;  %v503_v23 = vld [vmem:[%s3681_s14 + $0x20] sm:$0xff]  ;;  %v521_v27 = vld [vmem:[%s3681_s14 + $0xb0] sm:$0xff] }
  0x5e   : > { %v536_v24 = vld [vmem:[%s3681_s14 + $0x128] sm:$0xff]  ;;  %v535_v25 = vld [vmem:[%s3681_s14 + $0x120] sm:$0xff]  ;;  %v554_v28 = vld [vmem:[%s3681_s14 + $0x1b8] sm:$0xff] }
  0x5f   : > { %v553_v29 = vld [vmem:[%s3681_s14 + $0x1b0] sm:$0xff]  ;;  %v506_v30 = vld [vmem:[%s3681_s14 + $0x38] sm:$0xff]  ;;  %v524_v34 = vld [vmem:[%s3681_s14 + $0xc8] sm:$0xff] }
  0x60   : > { %571 = vperm.xlu1 %3280, %v500_v6   ;;  %566 = vperm.xlu0 %3279, %v499_v7   ;;  %v505_v31 = vld [vmem:[%s3681_s14 + $0x30] sm:$0xff]  ;;  %v538_v32 = vld [vmem:[%s3681_s14 + $0x138] sm:$0xff]  ;;  %v523_v35 = vld [vmem:[%s3681_s14 + $0xc0] sm:$0xff] }
  0x61   : > { %v537_v33 = vld [vmem:[%s3681_s14 + $0x130] sm:$0xff]  ;;  %v556_v36 = vld [vmem:[%s3681_s14 + $0x1c8] sm:$0xff]  ;;  %v555_v37 = vld [vmem:[%s3681_s14 + $0x1c0] sm:$0xff] }
  0x62   : > { %v508_v38 = vld [vmem:[%s3681_s14 + $0x48] sm:$0xff]  ;;  %v507_v39 = vld [vmem:[%s3681_s14 + $0x40] sm:$0xff]  ;;  %v526_v42 = vld [vmem:[%s3681_s14 + $0xd8] sm:$0xff] }
  0x63   : > { %v540_v40 = vld [vmem:[%s3681_s14 + $0x148] sm:$0xff]  ;;  %v539_v41 = vld [vmem:[%s3681_s14 + $0x140] sm:$0xff]  ;;  %v525_v43 = vld [vmem:[%s3681_s14 + $0xd0] sm:$0xff] }
  0x64   : > { %731 = vperm.xlu1 %3280, %v532_v8   ;;  %726 = vperm.xlu0 %3279, %v531_v9   ;;  %v558_v44 = vld [vmem:[%s3681_s14 + $0x1d8] sm:$0xff]  ;;  %v557_v45 = vld [vmem:[%s3681_s14 + $0x1d0] sm:$0xff]  ;;  %v528_v50 = vld [vmem:[%s3681_s14 + $0xe8] sm:$0xff] }
  0x65   : > { %v510_v46 = vld [vmem:[%s3681_s14 + $0x58] sm:$0xff]  ;;  %v509_v47 = vld [vmem:[%s3681_s14 + $0x50] sm:$0xff]  ;;  %v527_v51 = vld [vmem:[%s3681_s14 + $0xe0] sm:$0xff] }
  0x66   : > { %v542_v48 = vld [vmem:[%s3681_s14 + $0x158] sm:$0xff]  ;;  %v541_v49 = vld [vmem:[%s3681_s14 + $0x150] sm:$0xff]  ;;  %v560_v52 = vld [vmem:[%s3681_s14 + $0x1e8] sm:$0xff] }
  0x67   : > { %v559_v53 = vld [vmem:[%s3681_s14 + $0x1e0] sm:$0xff]  ;;  %v512_v54 = vld [vmem:[%s3681_s14 + $0x68] sm:$0xff]  ;;  %v530_v58 = vld [vmem:[%s3681_s14 + $0xf8] sm:$0xff] }
  0x68   : > { %661 = vperm.xlu1 %3280, %v518_v10   ;;  %656 = vperm.xlu0 %3279, %v517_v11   ;;  %v511_v55 = vld [vmem:[%s3681_s14 + $0x60] sm:$0xff]  ;;  %v544_v56 = vld [vmem:[%s3681_s14 + $0x168] sm:$0xff]  ;;  %v529_v59 = vld [vmem:[%s3681_s14 + $0xf0] sm:$0xff] }
  0x69   : > { %v543_v57 = vld [vmem:[%s3681_s14 + $0x160] sm:$0xff]  ;;  %v562_v60 = vld [vmem:[%s3681_s14 + $0x1f8] sm:$0xff]  ;;  %v561_v61 = vld [vmem:[%s3681_s14 + $0x1f0] sm:$0xff] }
  0x6a   : > { %v514_v62 = vld [vmem:[%s3681_s14 + $0x78] sm:$0xff]  ;;  %v513_v63 = vld [vmem:[%s3681_s14 + $0x70] sm:$0xff]  ;;  %v3765_v6 = vld [vmem:[%s4155_s3] ss:$0 sm:$0xff] }
  0x6b   : > { %v546_v0 = vld [vmem:[%s3681_s14 + $0x178] sm:$0xff]  ;;  %v545_v1 = vld [vmem:[%s3681_s14 + $0x170] sm:$0xff] }
  0x6c   : > { %821 = vperm.xlu1 %3280, %v550_v12   ;;  %816 = vperm.xlu0 %3279, %v549_v13   ;;  %v3283_v2 = vld [vmem:[%s3693_s30 + $0x4] ss:$16 sps:$4 sm:$0xff]   ;;  %v3286_v5 = vld [vmem:[%s3693_s30 + $0xc] ss:$16 sps:$4 sm:$0xff]  }
  0x6d   : > { %1434 = vmatprep.mubr.bf16.mxu0 %v3283_v2  ;;  %1595 = vmatprep.mubr.bf16.mxu1 %v3286_v5 }
  0x70   : > { %581 = vperm.xlu1 %3280, %v502_v14   ;;  %576 = vperm.xlu0 %3279, %v501_v15  }
  0x74   : > { %741 = vperm.xlu1 %3280, %v534_v16   ;;  %736 = vperm.xlu0 %3279, %v533_v17  }
  0x78   : > { %671 = vperm.xlu1 %3280, %v520_v18   ;;  %666 = vperm.xlu0 %3279, %v519_v19  }
  0x7c   : > { %831 = vperm.xlu1 %3280, %v552_v20   ;;  %826 = vperm.xlu0 %3279, %v551_v21  }
  0x80   : > { %591 = vperm.xlu1 %3280, %v504_v22   ;;  %586 = vperm.xlu0 %3279, %v503_v23  }
  0x84   : > { %751 = vperm.xlu1 %3280, %v536_v24   ;;  %746 = vperm.xlu0 %3279, %v535_v25  }
  0x88   : > { %681 = vperm.xlu1 %3280, %v522_v26   ;;  %676 = vperm.xlu0 %3279, %v521_v27  }
  0x8c   : > { %841 = vperm.xlu1 %3280, %v554_v28   ;;  %836 = vperm.xlu0 %3279, %v553_v29  }
  0x90   : > { %601 = vperm.xlu1 %3280, %v506_v30   ;;  %596 = vperm.xlu0 %3279, %v505_v31  }
  0x94   : > { %761 = vperm.xlu1 %3280, %v538_v32   ;;  %756 = vperm.xlu0 %3279, %v537_v33  }
  0x98   : > { %691 = vperm.xlu1 %3280, %v524_v34   ;;  %686 = vperm.xlu0 %3279, %v523_v35  }
  0x9c   : > { %851 = vperm.xlu1 %3280, %v556_v36   ;;  %846 = vperm.xlu0 %3279, %v555_v37  }
  0xa0   : > { %611 = vperm.xlu1 %3280, %v508_v38   ;;  %606 = vperm.xlu0 %3279, %v507_v39  }
  0xa4   : > { %771 = vperm.xlu1 %3280, %v540_v40   ;;  %766 = vperm.xlu0 %3279, %v539_v41  }
  0xa8   : > { %701 = vperm.xlu1 %3280, %v526_v42   ;;  %696 = vperm.xlu0 %3279, %v525_v43  }
  0xac   : > { %861 = vperm.xlu1 %3280, %v558_v44   ;;  %856 = vperm.xlu0 %3279, %v557_v45  }
  0xb0   : > { %621 = vperm.xlu1 %3280, %v510_v46   ;;  %616 = vperm.xlu0 %3279, %v509_v47  }
  0xb4   : > { %781 = vperm.xlu1 %3280, %v542_v48   ;;  %776 = vperm.xlu0 %3279, %v541_v49  }
  0xb8   : > { %711 = vperm.xlu1 %3280, %v528_v50   ;;  %706 = vperm.xlu0 %3279, %v527_v51  }
  0xbc   : > { %871 = vperm.xlu1 %3280, %v560_v52   ;;  %866 = vperm.xlu0 %3279, %v559_v53  }
  0xc0   : > { %631 = vperm.xlu1 %3280, %v512_v54   ;;  %626 = vperm.xlu0 %3279, %v511_v55  }
  0xc4   : > { %791 = vperm.xlu1 %3280, %v544_v56   ;;  %786 = vperm.xlu0 %3279, %v543_v57  }
  0xc8   : > { %721 = vperm.xlu1 %3280, %v530_v58   ;;  %716 = vperm.xlu0 %3279, %v529_v59  }
  0xcc   : > { %881 = vperm.xlu1 %3280, %v562_v60   ;;  %876 = vperm.xlu0 %3279, %v561_v61  }
  0xd0   : > { %641 = vperm.xlu1 %3280, %v514_v62   ;;  %636 = vperm.xlu0 %3279, %v513_v63  }
  0xd4   : > { %801 = vperm.xlu1 %3280, %v546_v0   ;;  %796 = vperm.xlu0 %3279, %v545_v1  }
  0xd7   : > { %v807_v3 = vpop.permute.xlu1 %806  ;;  %v647_v4 = vpop.permute.xlu0 %646 }
  0xd8   : > { %v938_v9 = vmul.f32 %v3765_v6, %v807_v3  ;;  %v906_v10 = vmul.f32 %v3765_v6, %v647_v4 }
  0xdb   : > { %v812_v7 = vpop.permute.xlu1 %811  ;;  %v652_v8 = vpop.permute.xlu0 %651 }
  0xdc   : > { %v939_v11 = vmul.f32 %v3765_v6, %v812_v7  ;;  %v907_v12 = vmul.f32 %v3765_v6, %v652_v8 }
  0xde   : > { %v962_v13 = vpack.c.bf16 %v907_v12, %v906_v10  ;;  %v978_v14 = vpack.c.bf16 %v939_v11, %v938_v9 }
  0xdf   : > { %v572_v15 = vpop.permute.xlu1 %571  ;;  %v567_v16 = vpop.permute.xlu0 %566 }
  0xe0   : > { %v891_v17 = vmul.f32 %v3765_v6, %v572_v15  ;;  %v890_v18 = vmul.f32 %v3765_v6, %v567_v16  ;;  %2908 = vmatprep.subr.bf16.mxu0 %v962_v13  ;;  %3020 = vmatprep.subr.bf16.mxu1 %v978_v14 }
  0xe2   : > { %v954_v19 = vpack.c.bf16 %v891_v17, %v890_v18 }
  0xe3   : > { %v732_v20 = vpop.permute.xlu1 %731  ;;  %v727_v21 = vpop.permute.xlu0 %726 }
  0xe4   : > { %v923_v22 = vmul.f32 %v3765_v6, %v732_v20  ;;  %v922_v23 = vmul.f32 %v3765_v6, %v727_v21  ;;  %2909 = vmatpush3.bf16.msra.mxu0 %v954_v19 }
  0xe6   : > { %v970_v24 = vpack.c.bf16 %v923_v22, %v922_v23 }
  0xe7   : > { %v662_v25 = vpop.permute.xlu1 %661  ;;  %v657_v26 = vpop.permute.xlu0 %656 }
  0xe8   : > { %v909_v27 = vmul.f32 %v3765_v6, %v662_v25  ;;  %v908_v28 = vmul.f32 %v3765_v6, %v657_v26  ;;  %3021 = vmatpush3.bf16.msra.mxu1 %v970_v24 }
  0xea   : > { %v963_v29 = vpack.c.bf16 %v909_v27, %v908_v28 }
  0xeb   : > { %v822_v30 = vpop.permute.xlu1 %821  ;;  %v817_v31 = vpop.permute.xlu0 %816 }
  0xec   : > { %v941_v32 = vmul.f32 %v3765_v6, %v822_v30  ;;  %v940_v33 = vmul.f32 %v3765_v6, %v817_v31  ;;  %2910 = vmatprep.subr.bf16.mxu0 %v963_v29 }
  0xee   : > { %v979_v34 = vpack.c.bf16 %v941_v32, %v940_v33 }
  0xef   : > { %v582_v35 = vpop.permute.xlu1 %581  ;;  %v577_v36 = vpop.permute.xlu0 %576 }
  0xf0   : > { %v893_v37 = vmul.f32 %v3765_v6, %v582_v35  ;;  %v892_v38 = vmul.f32 %v3765_v6, %v577_v36  ;;  %3022 = vmatprep.subr.bf16.mxu1 %v979_v34 }
  0xf2   : > { %v955_v39 = vpack.c.bf16 %v893_v37, %v892_v38 }
  0xf3   : > { %v742_v40 = vpop.permute.xlu1 %741  ;;  %v737_v41 = vpop.permute.xlu0 %736 }
  0xf4   : > { %v925_v42 = vmul.f32 %v3765_v6, %v742_v40  ;;  %v924_v43 = vmul.f32 %v3765_v6, %v737_v41  ;;  %2911 = vmatpush3.bf16.msra.mxu0 %v955_v39 }
  0xf6   : > { %v971_v44 = vpack.c.bf16 %v925_v42, %v924_v43 }
  0xf7   : > { %v672_v45 = vpop.permute.xlu1 %671  ;;  %v667_v46 = vpop.permute.xlu0 %666 }
  0xf8   : > { %v911_v47 = vmul.f32 %v3765_v6, %v672_v45  ;;  %v910_v48 = vmul.f32 %v3765_v6, %v667_v46  ;;  %3023 = vmatpush3.bf16.msra.mxu1 %v971_v44 }
  0xfa   : > { %v964_v49 = vpack.c.bf16 %v911_v47, %v910_v48 }
  0xfb   : > { %v832_v50 = vpop.permute.xlu1 %831  ;;  %v827_v51 = vpop.permute.xlu0 %826 }
  0xfc   : > { %v943_v52 = vmul.f32 %v3765_v6, %v832_v50  ;;  %v942_v53 = vmul.f32 %v3765_v6, %v827_v51  ;;  %2912 = vmatprep.subr.bf16.mxu0 %v964_v49 }
  0xfe   : > { %v980_v54 = vpack.c.bf16 %v943_v52, %v942_v53 }
  0xff   : > { %v592_v55 = vpop.permute.xlu1 %591  ;;  %v587_v56 = vpop.permute.xlu0 %586 }
 0x100   : > { %v895_v57 = vmul.f32 %v3765_v6, %v592_v55  ;;  %v894_v58 = vmul.f32 %v3765_v6, %v587_v56  ;;  %3024 = vmatprep.subr.bf16.mxu1 %v980_v54 }
 0x102   : > { %v956_v59 = vpack.c.bf16 %v895_v57, %v894_v58 }
 0x103   : > { %v752_v60 = vpop.permute.xlu1 %751  ;;  %v747_v61 = vpop.permute.xlu0 %746 }
 0x104   : > { %v927_v62 = vmul.f32 %v3765_v6, %v752_v60  ;;  %v926_v63 = vmul.f32 %v3765_v6, %v747_v61  ;;  %2913 = vmatpush3.bf16.msra.mxu0 %v956_v59 }
 0x106   : > { %v972_v0 = vpack.c.bf16 %v927_v62, %v926_v63 }
 0x107   : > { %v682_v1 = vpop.permute.xlu1 %681  ;;  %v677_v2 = vpop.permute.xlu0 %676 }
 0x108   : > { %v913_v3 = vmul.f32 %v3765_v6, %v682_v1  ;;  %v912_v4 = vmul.f32 %v3765_v6, %v677_v2  ;;  %3025 = vmatpush3.bf16.msra.mxu1 %v972_v0 }
 0x10a   : > { %v965_v5 = vpack.c.bf16 %v913_v3, %v912_v4 }
 0x10b   : > { %v842_v7 = vpop.permute.xlu1 %841  ;;  %v837_v8 = vpop.permute.xlu0 %836 }
 0x10c   : > { %v945_v9 = vmul.f32 %v3765_v6, %v842_v7  ;;  %v944_v10 = vmul.f32 %v3765_v6, %v837_v8  ;;  %2914 = vmatprep.subr.bf16.mxu0 %v965_v5 }
 0x10e   : > { %v981_v11 = vpack.c.bf16 %v945_v9, %v944_v10 }
 0x10f   : > { %v602_v12 = vpop.permute.xlu1 %601  ;;  %v597_v13 = vpop.permute.xlu0 %596 }
 0x110   : > { %v897_v14 = vmul.f32 %v3765_v6, %v602_v12  ;;  %v896_v15 = vmul.f32 %v3765_v6, %v597_v13  ;;  %3026 = vmatprep.subr.bf16.mxu1 %v981_v11 }
 0x112   : > { %v957_v16 = vpack.c.bf16 %v897_v14, %v896_v15 }
 0x113   : > { %v762_v17 = vpop.permute.xlu1 %761  ;;  %v757_v18 = vpop.permute.xlu0 %756 }
 0x114   : > { %v929_v19 = vmul.f32 %v3765_v6, %v762_v17  ;;  %v928_v20 = vmul.f32 %v3765_v6, %v757_v18  ;;  %2915 = vmatpush3.bf16.msra.mxu0 %v957_v16 }
 0x116   : > { %v973_v21 = vpack.c.bf16 %v929_v19, %v928_v20 }
 0x117   : > { %v692_v22 = vpop.permute.xlu1 %691  ;;  %v687_v23 = vpop.permute.xlu0 %686 }
 0x118   : > { %v915_v24 = vmul.f32 %v3765_v6, %v692_v22  ;;  %v914_v25 = vmul.f32 %v3765_v6, %v687_v23  ;;  %3027 = vmatpush3.bf16.msra.mxu1 %v973_v21 }
 0x11a   : > { %v966_v26 = vpack.c.bf16 %v915_v24, %v914_v25 }
 0x11b   : > { %v852_v27 = vpop.permute.xlu1 %851  ;;  %v847_v28 = vpop.permute.xlu0 %846 }
 0x11c   : > { %v947_v29 = vmul.f32 %v3765_v6, %v852_v27  ;;  %v946_v30 = vmul.f32 %v3765_v6, %v847_v28  ;;  %2916 = vmatprep.subr.bf16.mxu0 %v966_v26 }
 0x11e   : > { %v982_v31 = vpack.c.bf16 %v947_v29, %v946_v30 }
 0x11f   : > { %v612_v32 = vpop.permute.xlu1 %611  ;;  %v607_v33 = vpop.permute.xlu0 %606 }
 0x120   : > { %v899_v34 = vmul.f32 %v3765_v6, %v612_v32  ;;  %v898_v35 = vmul.f32 %v3765_v6, %v607_v33  ;;  %3028 = vmatprep.subr.bf16.mxu1 %v982_v31 }
 0x122   : > { %v958_v36 = vpack.c.bf16 %v899_v34, %v898_v35 }
 0x123   : > { %v772_v37 = vpop.permute.xlu1 %771  ;;  %v767_v38 = vpop.permute.xlu0 %766 }
 0x124   : > { %v931_v39 = vmul.f32 %v3765_v6, %v772_v37  ;;  %v930_v40 = vmul.f32 %v3765_v6, %v767_v38  ;;  %2917 = vmatpush3.bf16.msra.mxu0 %v958_v36  ;;  %v3281_v36 = vld [vmem:[%s3693_s30] ss:$16 sps:$4 sm:$0xff]  }
 0x126   : > { %v974_v41 = vpack.c.bf16 %v931_v39, %v930_v40  ;;  %v3287_v39 = vld [vmem:[%s3693_s30 + $0x24] ss:$16 sps:$4 sm:$0xff]  }
 0x127   : > { %v702_v42 = vpop.permute.xlu1 %701  ;;  %v697_v43 = vpop.permute.xlu0 %696 }
 0x128   : > { %v917_v44 = vmul.f32 %v3765_v6, %v702_v42  ;;  %v916_v45 = vmul.f32 %v3765_v6, %v697_v43  ;;  %3029 = vmatpush3.bf16.msra.mxu1 %v974_v41  ;;  %v3284_v41 = vld [vmem:[%s3693_s30 + $0x8] ss:$16 sps:$4 sm:$0xff]   ;;  %v3290_v42 = vld [vmem:[%s3693_s30 + $0x2c] ss:$16 sps:$4 sm:$0xff]   ;;  %v3289_v43 = vld [vmem:[%s3693_s30 + $0x20] ss:$16 sps:$4 sm:$0xff]  }
 0x12a   : > { %v967_v46 = vpack.c.bf16 %v917_v44, %v916_v45  ;;  %v3293_v44 = vld [vmem:[%s3693_s30 + $0x44] ss:$16 sps:$4 sm:$0xff]   ;;  %v3296_v45 = vld [vmem:[%s3693_s30 + $0x4c] ss:$16 sps:$4 sm:$0xff]  }
 0x12b   : > { %v862_v47 = vpop.permute.xlu1 %861  ;;  %v857_v48 = vpop.permute.xlu0 %856 }
 0x12c   : > { %v949_v49 = vmul.f32 %v3765_v6, %v862_v47  ;;  %v948_v50 = vmul.f32 %v3765_v6, %v857_v48  ;;  %2918 = vmatprep.subr.bf16.mxu0 %v967_v46  ;;  %v3295_v46 = vld [vmem:[%s3693_s30 + $0x40] ss:$16 sps:$4 sm:$0xff]   ;;  %v3299_v47 = vld [vmem:[%s3693_s30 + $0x64] ss:$16 sps:$4 sm:$0xff]   ;;  %v3298_v48 = vld [vmem:[%s3693_s30 + $0x48] ss:$16 sps:$4 sm:$0xff]  }
 0x12e   : > { %v983_v51 = vpack.c.bf16 %v949_v49, %v948_v50  ;;  %v3302_v49 = vld [vmem:[%s3693_s30 + $0x6c] ss:$16 sps:$4 sm:$0xff]   ;;  %v3301_v50 = vld [vmem:[%s3693_s30 + $0x60] ss:$16 sps:$4 sm:$0xff]  }
 0x12f   : > { %v622_v52 = vpop.permute.xlu1 %621  ;;  %v617_v53 = vpop.permute.xlu0 %616 }
 0x130   : > { %v901_v54 = vmul.f32 %v3765_v6, %v622_v52  ;;  %v900_v55 = vmul.f32 %v3765_v6, %v617_v53  ;;  %3030 = vmatprep.subr.bf16.mxu1 %v983_v51  ;;  %v3305_v51 = vld [vmem:[%s3693_s30 + $0x84] ss:$16 sps:$4 sm:$0xff]   ;;  %v3304_v52 = vld [vmem:[%s3693_s30 + $0x68] ss:$16 sps:$4 sm:$0xff]   ;;  %v3308_v53 = vld [vmem:[%s3693_s30 + $0x8c] ss:$16 sps:$4 sm:$0xff]  }
 0x132   : > { %v959_v56 = vpack.c.bf16 %v901_v54, %v900_v55  ;;  %v3307_v54 = vld [vmem:[%s3693_s30 + $0x80] ss:$16 sps:$4 sm:$0xff]   ;;  %v3311_v55 = vld [vmem:[%s3693_s30 + $0xa4] ss:$16 sps:$4 sm:$0xff]  }
 0x133   : > { %v782_v57 = vpop.permute.xlu1 %781  ;;  %v777_v58 = vpop.permute.xlu0 %776 }
 0x134   : > { %v933_v59 = vmul.f32 %v3765_v6, %v782_v57  ;;  %v932_v60 = vmul.f32 %v3765_v6, %v777_v58  ;;  %2919 = vmatpush3.bf16.msra.mxu0 %v959_v56  ;;  %v3310_v56 = vld [vmem:[%s3693_s30 + $0x88] ss:$16 sps:$4 sm:$0xff]   ;;  %v3314_v57 = vld [vmem:[%s3693_s30 + $0xac] ss:$16 sps:$4 sm:$0xff]   ;;  %v3313_v58 = vld [vmem:[%s3693_s30 + $0xa0] ss:$16 sps:$4 sm:$0xff]  }
 0x136   : > { %v975_v61 = vpack.c.bf16 %v933_v59, %v932_v60  ;;  %v3317_v59 = vld [vmem:[%s3693_s30 + $0xc4] ss:$16 sps:$4 sm:$0xff]   ;;  %v3316_v60 = vld [vmem:[%s3693_s30 + $0xa8] ss:$16 sps:$4 sm:$0xff]  }
 0x137   : > { %v712_v62 = vpop.permute.xlu1 %711  ;;  %v707_v63 = vpop.permute.xlu0 %706 }
 0x138   : > { %v919_v0 = vmul.f32 %v3765_v6, %v712_v62  ;;  %v918_v1 = vmul.f32 %v3765_v6, %v707_v63  ;;  %3031 = vmatpush3.bf16.msra.mxu1 %v975_v61  ;;  %v3320_v61 = vld [vmem:[%s3693_s30 + $0xcc] ss:$16 sps:$4 sm:$0xff]   ;;  %v3319_v62 = vld [vmem:[%s3693_s30 + $0xc0] ss:$16 sps:$4 sm:$0xff]   ;;  %v3323_v63 = vld [vmem:[%s3693_s30 + $0xe4] ss:$16 sps:$4 sm:$0xff]  }
 0x13a   : > { %v968_v2 = vpack.c.bf16 %v919_v0, %v918_v1  ;;  %v3322_v0 = vld [vmem:[%s3693_s30 + $0xc8] ss:$16 sps:$4 sm:$0xff]   ;;  %v3326_v1 = vld [vmem:[%s3693_s30 + $0xec] ss:$16 sps:$4 sm:$0xff]  }
 0x13b   : > { %v872_v3 = vpop.permute.xlu1 %871  ;;  %v867_v4 = vpop.permute.xlu0 %866 }
 0x13c   : > { %v951_v5 = vmul.f32 %v3765_v6, %v872_v3  ;;  %v950_v7 = vmul.f32 %v3765_v6, %v867_v4  ;;  %2920 = vmatprep.subr.bf16.mxu0 %v968_v2  ;;  %v3325_v2 = vld [vmem:[%s3693_s30 + $0xe0] ss:$16 sps:$4 sm:$0xff]   ;;  %v3329_v3 = vld [vmem:[%s3693_s30 + $0x104] ss:$16 sps:$4 sm:$0xff]   ;;  %v3328_v4 = vld [vmem:[%s3693_s30 + $0xe8] ss:$16 sps:$4 sm:$0xff]  }
 0x13e   : > { %v984_v8 = vpack.c.bf16 %v951_v5, %v950_v7  ;;  %v3332_v5 = vld [vmem:[%s3693_s30 + $0x10c] ss:$16 sps:$4 sm:$0xff]   ;;  %v3331_v7 = vld [vmem:[%s3693_s30 + $0x100] ss:$16 sps:$4 sm:$0xff]  }
 0x13f   : > { %v632_v9 = vpop.permute.xlu1 %631  ;;  %v627_v10 = vpop.permute.xlu0 %626 }
 0x140   : > { %v903_v11 = vmul.f32 %v3765_v6, %v632_v9  ;;  %v902_v12 = vmul.f32 %v3765_v6, %v627_v10  ;;  %3032 = vmatprep.subr.bf16.mxu1 %v984_v8  ;;  %v3335_v8 = vld [vmem:[%s3693_s30 + $0x124] ss:$16 sps:$4 sm:$0xff]   ;;  %v3334_v9 = vld [vmem:[%s3693_s30 + $0x108] ss:$16 sps:$4 sm:$0xff]   ;;  %v3338_v10 = vld [vmem:[%s3693_s30 + $0x12c] ss:$16 sps:$4 sm:$0xff]  }
 0x142   : > { %v960_v13 = vpack.c.bf16 %v903_v11, %v902_v12  ;;  %v3337_v11 = vld [vmem:[%s3693_s30 + $0x120] ss:$16 sps:$4 sm:$0xff]   ;;  %v3341_v12 = vld [vmem:[%s3693_s30 + $0x144] ss:$16 sps:$4 sm:$0xff]  }
 0x143   : > { %v792_v14 = vpop.permute.xlu1 %791  ;;  %v787_v15 = vpop.permute.xlu0 %786 }
 0x144   : > { %v935_v16 = vmul.f32 %v3765_v6, %v792_v14  ;;  %v934_v17 = vmul.f32 %v3765_v6, %v787_v15  ;;  %2921 = vmatpush3.bf16.msra.mxu0 %v960_v13  ;;  %v3340_v13 = vld [vmem:[%s3693_s30 + $0x128] ss:$16 sps:$4 sm:$0xff]   ;;  %v3344_v14 = vld [vmem:[%s3693_s30 + $0x14c] ss:$16 sps:$4 sm:$0xff]   ;;  %v3343_v15 = vld [vmem:[%s3693_s30 + $0x140] ss:$16 sps:$4 sm:$0xff]  }
 0x146   : > { %v976_v18 = vpack.c.bf16 %v935_v16, %v934_v17  ;;  %v3347_v16 = vld [vmem:[%s3693_s30 + $0x164] ss:$16 sps:$4 sm:$0xff]   ;;  %v3346_v17 = vld [vmem:[%s3693_s30 + $0x148] ss:$16 sps:$4 sm:$0xff]  }
 0x147   : > { %v722_v19 = vpop.permute.xlu1 %721  ;;  %v717_v20 = vpop.permute.xlu0 %716 }
 0x148   : > { %v921_v21 = vmul.f32 %v3765_v6, %v722_v19  ;;  %v920_v22 = vmul.f32 %v3765_v6, %v717_v20  ;;  %3033 = vmatpush3.bf16.msra.mxu1 %v976_v18  ;;  %v3350_v18 = vld [vmem:[%s3693_s30 + $0x16c] ss:$16 sps:$4 sm:$0xff]   ;;  %v3349_v19 = vld [vmem:[%s3693_s30 + $0x160] ss:$16 sps:$4 sm:$0xff]   ;;  %v3353_v20 = vld [vmem:[%s3693_s30 + $0x184] ss:$16 sps:$4 sm:$0xff]  }
 0x14a   : > { %v969_v23 = vpack.c.bf16 %v921_v21, %v920_v22  ;;  %v3352_v21 = vld [vmem:[%s3693_s30 + $0x168] ss:$16 sps:$4 sm:$0xff]   ;;  %v3356_v22 = vld [vmem:[%s3693_s30 + $0x18c] ss:$16 sps:$4 sm:$0xff]  }
 0x14b   : > { %v882_v24 = vpop.permute.xlu1 %881  ;;  %v877_v25 = vpop.permute.xlu0 %876 }
 0x14c   : > { %v953_v26 = vmul.f32 %v3765_v6, %v882_v24  ;;  %v952_v27 = vmul.f32 %v3765_v6, %v877_v25  ;;  %2922 = vmatprep.subr.bf16.mxu0 %v969_v23  ;;  %v3355_v23 = vld [vmem:[%s3693_s30 + $0x180] ss:$16 sps:$4 sm:$0xff]   ;;  %v3359_v24 = vld [vmem:[%s3693_s30 + $0x1a4] ss:$16 sps:$4 sm:$0xff]   ;;  %v3358_v25 = vld [vmem:[%s3693_s30 + $0x188] ss:$16 sps:$4 sm:$0xff]  }
 0x14e   : > { %v985_v28 = vpack.c.bf16 %v953_v26, %v952_v27  ;;  %v3362_v26 = vld [vmem:[%s3693_s30 + $0x1ac] ss:$16 sps:$4 sm:$0xff]   ;;  %v3361_v27 = vld [vmem:[%s3693_s30 + $0x1a0] ss:$16 sps:$4 sm:$0xff]  }
 0x14f   : > { %v642_v29 = vpop.permute.xlu1 %641  ;;  %v637_v30 = vpop.permute.xlu0 %636 }
 0x150   : > { %v905_v31 = vmul.f32 %v3765_v6, %v642_v29  ;;  %v904_v32 = vmul.f32 %v3765_v6, %v637_v30  ;;  %3034 = vmatprep.subr.bf16.mxu1 %v985_v28  ;;  %v3365_v28 = vld [vmem:[%s3693_s30 + $0x1c4] ss:$16 sps:$4 sm:$0xff]   ;;  %v3364_v29 = vld [vmem:[%s3693_s30 + $0x1a8] ss:$16 sps:$4 sm:$0xff]   ;;  %v3368_v30 = vld [vmem:[%s3693_s30 + $0x1cc] ss:$16 sps:$4 sm:$0xff]  }
 0x152   : > { %v961_v33 = vpack.c.bf16 %v905_v31, %v904_v32  ;;  %v3367_v31 = vld [vmem:[%s3693_s30 + $0x1c0] ss:$16 sps:$4 sm:$0xff]   ;;  %v3371_v32 = vld [vmem:[%s3693_s30 + $0x1e4] ss:$16 sps:$4 sm:$0xff]  }
 0x153   : > { %v802_v34 = vpop.permute.xlu1 %801  ;;  %v797_v35 = vpop.permute.xlu0 %796 }
 0x154   : > { %v937_v37 = vmul.f32 %v3765_v6, %v802_v34  ;;  %v936_v38 = vmul.f32 %v3765_v6, %v797_v35  ;;  %2923 = vmatpush3.bf16.msra.mxu0 %v961_v33  ;;  %v3292_v6 = vld [vmem:[%s3693_s30 + $0x28] ss:$16 sps:$4 sm:$0xff]   ;;  %v3374_v34 = vld [vmem:[%s3693_s30 + $0x1ec] ss:$16 sps:$4 sm:$0xff]   ;;  %v3373_v35 = vld [vmem:[%s3693_s30 + $0x1e0] ss:$16 sps:$4 sm:$0xff]  }
 0x155   : > { %v3370_v33 = vld [vmem:[%s3693_s30 + $0x1c8] ss:$16 sps:$4 sm:$0xff]  }
 0x156   : > { %v977_v40 = vpack.c.bf16 %v937_v37, %v936_v38 }
 0x157   : > { %1435 = vmatmul.mubr.bf16.vlgmr.msra.gmra.mrb[0].mxu0 %v3281_v36  ;;  %v3376_v36 = vld [vmem:[%s3693_s30 + $0x1e8] ss:$16 sps:$4 sm:$0xff]  }
 0x158   : > { %3035 = vmatpush3.bf16.msra.mxu1 %v977_v40  ;;  %1442 = vmatprep.mubr.bf16.mxu0 %v3287_v39 }
 0x15b   : > { %1596 = vmatmul.mubr.bf16.vlgmr.msra.gmra.mrb[0].mxu1 %v3284_v41 }
 0x15c   : > { %1603 = vmatprep.mubr.bf16.mxu1 %v3290_v42 }
 0x15f   : > { %1443 = vmatmul.mubr.bf16.gmra.mrb[4].mxu0 %v3289_v43 }
 0x160   : > { %1450 = vmatprep.mubr.bf16.mxu0 %v3293_v44 }
 0x163   : > { %1604 = vmatmul.mubr.bf16.gmra.mrb[4].mxu1 %v3292_v6 }
 0x164   : > { %1611 = vmatprep.mubr.bf16.mxu1 %v3296_v45 }
 0x167   : > { %1451 = vmatmul.mubr.bf16.gmra.mrb[8].mxu0 %v3295_v46  ;;  %v986_v46 = vld [vmem:[#allocation2] sm:$0xff] }
 0x168   : > { %1458 = vmatprep.mubr.bf16.mxu0 %v3299_v47 }
 0x16b   : > { %1612 = vmatmul.mubr.bf16.gmra.mrb[8].mxu1 %v3298_v48 }
 0x16c   : > { %1619 = vmatprep.mubr.bf16.mxu1 %v3302_v49 }
 0x16f   : > { %1459 = vmatmul.mubr.bf16.gmra.mrb[12].mxu0 %v3301_v50 }
 0x170   : > { %1466 = vmatprep.mubr.bf16.mxu0 %v3305_v51  ;;  %v987_v51 = vld [vmem:[#allocation2 + $0x8] sm:$0xff] }
 0x173   : > { %1620 = vmatmul.mubr.bf16.gmra.mrb[12].mxu1 %v3304_v52 }
 0x174   : > { %1627 = vmatprep.mubr.bf16.mxu1 %v3308_v53 }
 0x177   : > { %1467 = vmatmul.mubr.bf16.gmra.mrb[16].mxu0 %v3307_v54 }
 0x178   : > { %1474 = vmatprep.mubr.bf16.mxu0 %v3311_v55 }
 0x17b   : > { %1628 = vmatmul.mubr.bf16.gmra.mrb[16].mxu1 %v3310_v56 }
 0x17c   : > { %1635 = vmatprep.mubr.bf16.mxu1 %v3314_v57 }
 0x17f   : > { %1475 = vmatmul.mubr.bf16.gmra.mrb[20].mxu0 %v3313_v58 }
 0x180   : > { %1482 = vmatprep.mubr.bf16.mxu0 %v3317_v59 }
 0x183   : > { %1636 = vmatmul.mubr.bf16.gmra.mrb[20].mxu1 %v3316_v60 }
 0x184   : > { %1643 = vmatprep.mubr.bf16.mxu1 %v3320_v61 }
 0x187   : > { %1483 = vmatmul.mubr.bf16.gmra.mrb[24].mxu0 %v3319_v62 }
 0x188   : > { %1490 = vmatprep.mubr.bf16.mxu0 %v3323_v63 }
 0x18b   : > { %1644 = vmatmul.mubr.bf16.gmra.mrb[24].mxu1 %v3322_v0  ;;  %v988_v0 = vld [vmem:[#allocation2 + $0x10] sm:$0xff] }
 0x18c   : > { %1651 = vmatprep.mubr.bf16.mxu1 %v3326_v1 }
 0x18f   : > { %1491 = vmatmul.mubr.bf16.gmra.mrb[28].mxu0 %v3325_v2 }
 0x190   : > { %1498 = vmatprep.mubr.bf16.mxu0 %v3329_v3 }
 0x193   : > { %1652 = vmatmul.mubr.bf16.gmra.mrb[28].mxu1 %v3328_v4 }
 0x194   : > { %1659 = vmatprep.mubr.bf16.mxu1 %v3332_v5  ;;  %v989_v5 = vld [vmem:[#allocation2 + $0x18] sm:$0xff] }
 0x197   : > { %1499 = vmatmul.mubr.bf16.gmra.mrb[32].mxu0 %v3331_v7 }
 0x198   : > { %1506 = vmatprep.mubr.bf16.mxu0 %v3335_v8 }
 0x19b   : > { %1660 = vmatmul.mubr.bf16.gmra.mrb[32].mxu1 %v3334_v9 }
 0x19c   : > { %1667 = vmatprep.mubr.bf16.mxu1 %v3338_v10 }
 0x19f   : > { %1507 = vmatmul.mubr.bf16.gmra.mrb[36].mxu0 %v3337_v11 }
 0x1a0   : > { %1514 = vmatprep.mubr.bf16.mxu0 %v3341_v12 }
 0x1a3   : > { %1668 = vmatmul.mubr.bf16.gmra.mrb[36].mxu1 %v3340_v13 }
 0x1a4   : > { %1675 = vmatprep.mubr.bf16.mxu1 %v3344_v14 }
 0x1a7   : > { %1515 = vmatmul.mubr.bf16.gmra.mrb[40].mxu0 %v3343_v15 }
 0x1a8   : > { %1522 = vmatprep.mubr.bf16.mxu0 %v3347_v16 }
 0x1ab   : > { %1676 = vmatmul.mubr.bf16.gmra.mrb[40].mxu1 %v3346_v17 }
 0x1ac   : > { %1683 = vmatprep.mubr.bf16.mxu1 %v3350_v18 }
 0x1af   : > { %1523 = vmatmul.mubr.bf16.gmra.mrb[44].mxu0 %v3349_v19  ;;  %v990_v19 = vld [vmem:[#allocation2 + $0x20] sm:$0xff] }
 0x1b0   : > { %1530 = vmatprep.mubr.bf16.mxu0 %v3353_v20 }
 0x1b3   : > { %1684 = vmatmul.mubr.bf16.gmra.mrb[44].mxu1 %v3352_v21 }
 0x1b4   : > { %1691 = vmatprep.mubr.bf16.mxu1 %v3356_v22 }
 0x1b7   : > { %1531 = vmatmul.mubr.bf16.gmra.mrb[48].mxu0 %v3355_v23 }
 0x1b8   : > { %1538 = vmatprep.mubr.bf16.mxu0 %v3359_v24  ;;  %v991_v24 = vld [vmem:[#allocation2 + $0x28] sm:$0xff] }
 0x1bb   : > { %1692 = vmatmul.mubr.bf16.gmra.mrb[48].mxu1 %v3358_v25 }
 0x1bc   : > { %1699 = vmatprep.mubr.bf16.mxu1 %v3362_v26 }
 0x1bf   : > { %1539 = vmatmul.mubr.bf16.gmra.mrb[52].mxu0 %v3361_v27 }
 0x1c0   : > { %1546 = vmatprep.mubr.bf16.mxu0 %v3365_v28 }
 0x1c3   : > { %1700 = vmatmul.mubr.bf16.gmra.mrb[52].mxu1 %v3364_v29 }
 0x1c4   : > { %1707 = vmatprep.mubr.bf16.mxu1 %v3368_v30 }
 0x1c7   : > { %1547 = vmatmul.mubr.bf16.gmra.mrb[56].mxu0 %v3367_v31 }
 0x1c8   : > { %1554 = vmatprep.mubr.bf16.mxu0 %v3371_v32 }
 0x1cb   : > { %1708 = vmatmul.mubr.bf16.gmra.mrb[56].mxu1 %v3370_v33 }
 0x1cc   : > { %1715 = vmatprep.mubr.bf16.mxu1 %v3374_v34 }
 0x1cf   : > { %1555 = vmatmul.mubr.bf16.gmra.mrb[60].mxu0 %v3373_v35 }
 0x1d3   : > { %1716 = vmatmul.mubr.bf16.gmra.mrb[60].mxu1 %v3376_v36 }
 0x22a   : > { %v2924_v37 = vpop.f32.mrb[0].mxu0 }
 0x22b   : > { %v2925_v38 = vpop.f32.mrb[1].mxu0 }
 0x22c   : > { %v2926_v39 = vadd.f32 %v2925_v38, %v2924_v37  ;;  %v2927_v40 = vpop.f32.mrb[2].mxu0  ;;  %v992_v37 = vld [vmem:[#allocation2 + $0x30] sm:$0xff] }
 0x22d   : > { %v2928_v41 = vpop.f32.mrb[3].mxu0 }
 0x22e   : > { %v2929_v42 = vadd.f32 %v2928_v41, %v2927_v40  ;;  %v3036_v43 = vpop.f32.mrb[0].mxu1 }
 0x22f   : > { %v3037_v44 = vpop.f32.mrb[1].mxu1 }
 0x230   : > { %v3038_v6 = vadd.f32 %v3037_v44, %v3036_v43  ;;  %v3039_v45 = vpop.f32.mrb[2].mxu1 }
 0x231   : > { %v3040_v47 = vpop.f32.mrb[3].mxu1 }
 0x232   : > { %v1598_v48 = vadd.f32 %v3038_v6, %v2926_v39  ;;  %v3041_v49 = vadd.f32 %v3040_v47, %v3039_v45  ;;  %v2930_v50 = vpop.f32.mrb[4].mxu0 }
 0x233   : > { %v2931_v52 = vpop.f32.mrb[5].mxu0 }
 0x234   : > { %v1724_v53 = vadd.f32 %v1598_v48, %v986_v46  ;;  %v1601_v54 = vadd.f32 %v3041_v49, %v2929_v42  ;;  %v2932_v55 = vadd.f32 %v2931_v52, %v2930_v50  ;;  %v2933_v56 = vpop.f32.mrb[6].mxu0  ;;  %v993_v42 = vld [vmem:[#allocation2 + $0x38] sm:$0xff] }
 0x235   : > { %v2934_v57 = vpop.f32.mrb[7].mxu0 }
 0x236   : > { %1756 = vst [vmem:[#allocation2] sm:$0xff] %v1724_v53  ;;  %v1725_v58 = vadd.f32 %v1601_v54, %v987_v51  ;;  %v2935_v59 = vadd.f32 %v2934_v57, %v2933_v56  ;;  %v3042_v60 = vpop.f32.mrb[4].mxu1  ;;  %v994_v54 = vld [vmem:[#allocation2 + $0x40] sm:$0xff] }
 0x237   : > { %v3043_v61 = vpop.f32.mrb[5].mxu1 }
 0x238   : > { %1757 = vst [vmem:[#allocation2 + $0x8] sm:$0xff] %v1725_v58  ;;  %v3044_v62 = vadd.f32 %v3043_v61, %v3042_v60  ;;  %v3045_v63 = vpop.f32.mrb[6].mxu1 }
 0x239   : > { %v3046_v1 = vpop.f32.mrb[7].mxu1 }
 0x23a   : > { %v1606_v2 = vadd.f32 %v3044_v62, %v2932_v55  ;;  %v3047_v3 = vadd.f32 %v3046_v1, %v3045_v63  ;;  %v2936_v4 = vpop.f32.mrb[8].mxu0 }
 0x23b   : > { %v2937_v7 = vpop.f32.mrb[9].mxu0 }
 0x23c   : > { %v1726_v8 = vadd.f32 %v1606_v2, %v988_v0  ;;  %v1609_v9 = vadd.f32 %v3047_v3, %v2935_v59  ;;  %v2938_v10 = vadd.f32 %v2937_v7, %v2936_v4  ;;  %v2939_v11 = vpop.f32.mrb[10].mxu0  ;;  %v995_v59 = vld [vmem:[#allocation2 + $0x48] sm:$0xff] }
 0x23d   : > { %v2940_v12 = vpop.f32.mrb[11].mxu0 }
 0x23e   : > { %1758 = vst [vmem:[#allocation2 + $0x10] sm:$0xff] %v1726_v8  ;;  %v1727_v13 = vadd.f32 %v1609_v9, %v989_v5  ;;  %v2941_v14 = vadd.f32 %v2940_v12, %v2939_v11  ;;  %v3048_v15 = vpop.f32.mrb[8].mxu1  ;;  %v996_v9 = vld [vmem:[#allocation2 + $0x50] sm:$0xff] }
 0x23f   : > { %v3049_v16 = vpop.f32.mrb[9].mxu1 }
 0x240   : > { %1759 = vst [vmem:[#allocation2 + $0x18] sm:$0xff] %v1727_v13  ;;  %v3050_v17 = vadd.f32 %v3049_v16, %v3048_v15  ;;  %v3051_v18 = vpop.f32.mrb[10].mxu1 }
 0x241   : > { %v3052_v20 = vpop.f32.mrb[11].mxu1 }
 0x242   : > { %v1614_v21 = vadd.f32 %v3050_v17, %v2938_v10  ;;  %v3053_v22 = vadd.f32 %v3052_v20, %v3051_v18  ;;  %v2942_v23 = vpop.f32.mrb[12].mxu0 }
 0x243   : > { %v2943_v25 = vpop.f32.mrb[13].mxu0 }
 0x244   : > { %v1728_v26 = vadd.f32 %v1614_v21, %v990_v19  ;;  %v1617_v27 = vadd.f32 %v3053_v22, %v2941_v14  ;;  %v2944_v28 = vadd.f32 %v2943_v25, %v2942_v23  ;;  %v2945_v29 = vpop.f32.mrb[14].mxu0  ;;  %v997_v14 = vld [vmem:[#allocation2 + $0x58] sm:$0xff] }
 0x245   : > { %v2946_v30 = vpop.f32.mrb[15].mxu0 }
 0x246   : > { %1760 = vst [vmem:[#allocation2 + $0x20] sm:$0xff] %v1728_v26  ;;  %v1729_v31 = vadd.f32 %v1617_v27, %v991_v24  ;;  %v2947_v32 = vadd.f32 %v2946_v30, %v2945_v29  ;;  %v3054_v33 = vpop.f32.mrb[12].mxu1  ;;  %v998_v27 = vld [vmem:[#allocation2 + $0x60] sm:$0xff] }
 0x247   : > { %v3055_v34 = vpop.f32.mrb[13].mxu1 }
 0x248   : > { %1761 = vst [vmem:[#allocation2 + $0x28] sm:$0xff] %v1729_v31  ;;  %v3056_v35 = vadd.f32 %v3055_v34, %v3054_v33  ;;  %v3057_v36 = vpop.f32.mrb[14].mxu1 }
 0x249   : > { %v3058_v38 = vpop.f32.mrb[15].mxu1 }
 0x24a   : > { %v1622_v39 = vadd.f32 %v3056_v35, %v2944_v28  ;;  %v3059_v40 = vadd.f32 %v3058_v38, %v3057_v36  ;;  %v2948_v41 = vpop.f32.mrb[16].mxu0 }
 0x24b   : > { %v2949_v43 = vpop.f32.mrb[17].mxu0 }
 0x24c   : > { %v1730_v44 = vadd.f32 %v1622_v39, %v992_v37  ;;  %v1625_v6 = vadd.f32 %v3059_v40, %v2947_v32  ;;  %v2950_v45 = vadd.f32 %v2949_v43, %v2948_v41  ;;  %v2951_v46 = vpop.f32.mrb[18].mxu0  ;;  %v999_v32 = vld [vmem:[#allocation2 + $0x68] sm:$0xff] }
 0x24d   : > { %v2952_v47 = vpop.f32.mrb[19].mxu0 }
 0x24e   : > { %1762 = vst [vmem:[#allocation2 + $0x30] sm:$0xff] %v1730_v44  ;;  %v1731_v48 = vadd.f32 %v1625_v6, %v993_v42  ;;  %v2953_v49 = vadd.f32 %v2952_v47, %v2951_v46  ;;  %v3060_v50 = vpop.f32.mrb[16].mxu1  ;;  %v1000_v6 = vld [vmem:[#allocation2 + $0x70] sm:$0xff] }
 0x24f   : > { %v3061_v51 = vpop.f32.mrb[17].mxu1 }
 0x250   : > { %1763 = vst [vmem:[#allocation2 + $0x38] sm:$0xff] %v1731_v48  ;;  %v3062_v52 = vadd.f32 %v3061_v51, %v3060_v50  ;;  %v3063_v53 = vpop.f32.mrb[18].mxu1 }
 0x251   : > { %v3064_v55 = vpop.f32.mrb[19].mxu1 }
 0x252   : > { %v1630_v56 = vadd.f32 %v3062_v52, %v2950_v45  ;;  %v3065_v57 = vadd.f32 %v3064_v55, %v3063_v53  ;;  %v2954_v58 = vpop.f32.mrb[20].mxu0 }
 0x253   : > { %v2955_v60 = vpop.f32.mrb[21].mxu0 }
 0x254   : > { %v1732_v61 = vadd.f32 %v1630_v56, %v994_v54  ;;  %v1633_v62 = vadd.f32 %v3065_v57, %v2953_v49  ;;  %v2956_v63 = vadd.f32 %v2955_v60, %v2954_v58  ;;  %v2957_v0 = vpop.f32.mrb[22].mxu0  ;;  %v1001_v49 = vld [vmem:[#allocation2 + $0x78] sm:$0xff] }
 0x255   : > { %v2958_v1 = vpop.f32.mrb[23].mxu0 }
 0x256   : > { %1764 = vst [vmem:[#allocation2 + $0x40] sm:$0xff] %v1732_v61  ;;  %v1733_v2 = vadd.f32 %v1633_v62, %v995_v59  ;;  %v2959_v3 = vadd.f32 %v2958_v1, %v2957_v0  ;;  %v3066_v4 = vpop.f32.mrb[20].mxu1  ;;  %v1002_v62 = vld [vmem:[#allocation2 + $0x80] sm:$0xff] }
 0x257   : > { %v3067_v5 = vpop.f32.mrb[21].mxu1 }
 0x258   : > { %1765 = vst [vmem:[#allocation2 + $0x48] sm:$0xff] %v1733_v2  ;;  %v3068_v7 = vadd.f32 %v3067_v5, %v3066_v4  ;;  %v3069_v8 = vpop.f32.mrb[22].mxu1 }
 0x259   : > { %v3070_v10 = vpop.f32.mrb[23].mxu1 }
 0x25a   : > { %v1638_v11 = vadd.f32 %v3068_v7, %v2956_v63  ;;  %v3071_v12 = vadd.f32 %v3070_v10, %v3069_v8  ;;  %v2960_v13 = vpop.f32.mrb[24].mxu0 }
 0x25b   : > { %v2961_v15 = vpop.f32.mrb[25].mxu0 }
 0x25c   : > { %v1734_v16 = vadd.f32 %v1638_v11, %v996_v9  ;;  %v1641_v17 = vadd.f32 %v3071_v12, %v2959_v3  ;;  %v2962_v18 = vadd.f32 %v2961_v15, %v2960_v13  ;;  %v2963_v19 = vpop.f32.mrb[26].mxu0  ;;  %v1003_v3 = vld [vmem:[#allocation2 + $0x88] sm:$0xff] }
 0x25d   : > { %v2964_v20 = vpop.f32.mrb[27].mxu0 }
 0x25e   : > { %1766 = vst [vmem:[#allocation2 + $0x50] sm:$0xff] %v1734_v16  ;;  %v1735_v21 = vadd.f32 %v1641_v17, %v997_v14  ;;  %v2965_v22 = vadd.f32 %v2964_v20, %v2963_v19  ;;  %v3072_v23 = vpop.f32.mrb[24].mxu1  ;;  %v1004_v17 = vld [vmem:[#allocation2 + $0x90] sm:$0xff] }
 0x25f   : > { %v3073_v24 = vpop.f32.mrb[25].mxu1 }
 0x260   : > { %1767 = vst [vmem:[#allocation2 + $0x58] sm:$0xff] %v1735_v21  ;;  %v3074_v25 = vadd.f32 %v3073_v24, %v3072_v23  ;;  %v3075_v26 = vpop.f32.mrb[26].mxu1 }
 0x261   : > { %v3076_v28 = vpop.f32.mrb[27].mxu1 }
 0x262   : > { %v1646_v29 = vadd.f32 %v3074_v25, %v2962_v18  ;;  %v3077_v30 = vadd.f32 %v3076_v28, %v3075_v26  ;;  %v2966_v31 = vpop.f32.mrb[28].mxu0 }
 0x263   : > { %v2967_v33 = vpop.f32.mrb[29].mxu0 }
 0x264   : > { %v1736_v34 = vadd.f32 %v1646_v29, %v998_v27  ;;  %v1649_v35 = vadd.f32 %v3077_v30, %v2965_v22  ;;  %v2968_v36 = vadd.f32 %v2967_v33, %v2966_v31  ;;  %v2969_v37 = vpop.f32.mrb[30].mxu0  ;;  %v1005_v22 = vld [vmem:[#allocation2 + $0x98] sm:$0xff] }
 0x265   : > { %v2970_v38 = vpop.f32.mrb[31].mxu0 }
 0x266   : > { %1768 = vst [vmem:[#allocation2 + $0x60] sm:$0xff] %v1736_v34  ;;  %v1737_v39 = vadd.f32 %v1649_v35, %v999_v32  ;;  %v2971_v40 = vadd.f32 %v2970_v38, %v2969_v37  ;;  %v3078_v41 = vpop.f32.mrb[28].mxu1  ;;  %v1006_v35 = vld [vmem:[#allocation2 + $0xa0] sm:$0xff] }
 0x267   : > { %v3079_v42 = vpop.f32.mrb[29].mxu1 }
 0x268   : > { %1769 = vst [vmem:[#allocation2 + $0x68] sm:$0xff] %v1737_v39  ;;  %v3080_v43 = vadd.f32 %v3079_v42, %v3078_v41  ;;  %v3081_v44 = vpop.f32.mrb[30].mxu1 }
 0x269   : > { %v3082_v45 = vpop.f32.mrb[31].mxu1 }
 0x26a   : > { %v1654_v46 = vadd.f32 %v3080_v43, %v2968_v36  ;;  %v3083_v47 = vadd.f32 %v3082_v45, %v3081_v44  ;;  %v2972_v48 = vpop.f32.mrb[32].mxu0 }
 0x26b   : > { %v2973_v50 = vpop.f32.mrb[33].mxu0 }
 0x26c   : > { %v1738_v51 = vadd.f32 %v1654_v46, %v1000_v6  ;;  %v1657_v52 = vadd.f32 %v3083_v47, %v2971_v40  ;;  %v2974_v53 = vadd.f32 %v2973_v50, %v2972_v48  ;;  %v2975_v54 = vpop.f32.mrb[34].mxu0  ;;  %v1007_v40 = vld [vmem:[#allocation2 + $0xa8] sm:$0xff] }
 0x26d   : > { %v2976_v55 = vpop.f32.mrb[35].mxu0 }
 0x26e   : > { %1770 = vst [vmem:[#allocation2 + $0x70] sm:$0xff] %v1738_v51  ;;  %v1739_v56 = vadd.f32 %v1657_v52, %v1001_v49  ;;  %v2977_v57 = vadd.f32 %v2976_v55, %v2975_v54  ;;  %v3084_v58 = vpop.f32.mrb[32].mxu1  ;;  %v1008_v52 = vld [vmem:[#allocation2 + $0xb0] sm:$0xff] }
 0x26f   : > { %v3085_v59 = vpop.f32.mrb[33].mxu1 }
 0x270   : > { %1771 = vst [vmem:[#allocation2 + $0x78] sm:$0xff] %v1739_v56  ;;  %v3086_v60 = vadd.f32 %v3085_v59, %v3084_v58  ;;  %v3087_v61 = vpop.f32.mrb[34].mxu1 }
 0x271   : > { %v3088_v63 = vpop.f32.mrb[35].mxu1 }
 0x272   : > { %v1662_v0 = vadd.f32 %v3086_v60, %v2974_v53  ;;  %v3089_v1 = vadd.f32 %v3088_v63, %v3087_v61  ;;  %v2978_v2 = vpop.f32.mrb[36].mxu0 }
 0x273   : > { %v2979_v4 = vpop.f32.mrb[37].mxu0 }
 0x274   : > { %v1740_v5 = vadd.f32 %v1662_v0, %v1002_v62  ;;  %v1665_v7 = vadd.f32 %v3089_v1, %v2977_v57  ;;  %v2980_v8 = vadd.f32 %v2979_v4, %v2978_v2  ;;  %v2981_v9 = vpop.f32.mrb[38].mxu0  ;;  %v1009_v57 = vld [vmem:[#allocation2 + $0xb8] sm:$0xff] }
 0x275   : > { %v2982_v10 = vpop.f32.mrb[39].mxu0 }
 0x276   : > { %1772 = vst [vmem:[#allocation2 + $0x80] sm:$0xff] %v1740_v5  ;;  %v1741_v11 = vadd.f32 %v1665_v7, %v1003_v3  ;;  %v2983_v12 = vadd.f32 %v2982_v10, %v2981_v9  ;;  %v3090_v13 = vpop.f32.mrb[36].mxu1  ;;  %v1010_v7 = vld [vmem:[#allocation2 + $0xc0] sm:$0xff] }
 0x277   : > { %v3091_v14 = vpop.f32.mrb[37].mxu1 }
 0x278   : > { %1773 = vst [vmem:[#allocation2 + $0x88] sm:$0xff] %v1741_v11  ;;  %v3092_v15 = vadd.f32 %v3091_v14, %v3090_v13  ;;  %v3093_v16 = vpop.f32.mrb[38].mxu1 }
 0x279   : > { %v3094_v18 = vpop.f32.mrb[39].mxu1 }
 0x27a   : > { %v1670_v19 = vadd.f32 %v3092_v15, %v2980_v8  ;;  %v3095_v20 = vadd.f32 %v3094_v18, %v3093_v16  ;;  %v2984_v21 = vpop.f32.mrb[40].mxu0 }
 0x27b   : > { %v2985_v23 = vpop.f32.mrb[41].mxu0 }
 0x27c   : > { %v1742_v24 = vadd.f32 %v1670_v19, %v1004_v17  ;;  %v1673_v25 = vadd.f32 %v3095_v20, %v2983_v12  ;;  %v2986_v26 = vadd.f32 %v2985_v23, %v2984_v21  ;;  %v2987_v27 = vpop.f32.mrb[42].mxu0  ;;  %v1011_v12 = vld [vmem:[#allocation2 + $0xc8] sm:$0xff] }
 0x27d   : > { %v2988_v28 = vpop.f32.mrb[43].mxu0 }
 0x27e   : > { %1774 = vst [vmem:[#allocation2 + $0x90] sm:$0xff] %v1742_v24  ;;  %v1743_v29 = vadd.f32 %v1673_v25, %v1005_v22  ;;  %v2989_v30 = vadd.f32 %v2988_v28, %v2987_v27  ;;  %v3096_v31 = vpop.f32.mrb[40].mxu1  ;;  %v1012_v25 = vld [vmem:[#allocation2 + $0xd0] sm:$0xff] }
 0x27f   : > { %v3097_v32 = vpop.f32.mrb[41].mxu1 }
 0x280   : > { %1775 = vst [vmem:[#allocation2 + $0x98] sm:$0xff] %v1743_v29  ;;  %v3098_v33 = vadd.f32 %v3097_v32, %v3096_v31  ;;  %v3099_v34 = vpop.f32.mrb[42].mxu1 }
 0x281   : > { %v3100_v36 = vpop.f32.mrb[43].mxu1 }
 0x282   : > { %v1678_v37 = vadd.f32 %v3098_v33, %v2986_v26  ;;  %v3101_v38 = vadd.f32 %v3100_v36, %v3099_v34  ;;  %v2990_v39 = vpop.f32.mrb[44].mxu0 }
 0x283   : > { %v2991_v41 = vpop.f32.mrb[45].mxu0 }
 0x284   : > { %v1744_v42 = vadd.f32 %v1678_v37, %v1006_v35  ;;  %v1681_v43 = vadd.f32 %v3101_v38, %v2989_v30  ;;  %v2992_v44 = vadd.f32 %v2991_v41, %v2990_v39  ;;  %v2993_v6 = vpop.f32.mrb[46].mxu0  ;;  %v1013_v30 = vld [vmem:[#allocation2 + $0xd8] sm:$0xff] }
 0x285   : > { %v2994_v45 = vpop.f32.mrb[47].mxu0 }
 0x286   : > { %1776 = vst [vmem:[#allocation2 + $0xa0] sm:$0xff] %v1744_v42  ;;  %v1745_v46 = vadd.f32 %v1681_v43, %v1007_v40  ;;  %v2995_v47 = vadd.f32 %v2994_v45, %v2993_v6  ;;  %v3102_v48 = vpop.f32.mrb[44].mxu1  ;;  %v1014_v43 = vld [vmem:[#allocation2 + $0xe0] sm:$0xff] }
 0x287   : > { %v3103_v49 = vpop.f32.mrb[45].mxu1 }
 0x288   : > { %1777 = vst [vmem:[#allocation2 + $0xa8] sm:$0xff] %v1745_v46  ;;  %v3104_v50 = vadd.f32 %v3103_v49, %v3102_v48  ;;  %v3105_v51 = vpop.f32.mrb[46].mxu1 }
 0x289   : > { %v3106_v53 = vpop.f32.mrb[47].mxu1 }
 0x28a   : > { %v1686_v54 = vadd.f32 %v3104_v50, %v2992_v44  ;;  %v3107_v55 = vadd.f32 %v3106_v53, %v3105_v51  ;;  %v2996_v56 = vpop.f32.mrb[48].mxu0 }
 0x28b   : > { %v2997_v58 = vpop.f32.mrb[49].mxu0 }
 0x28c   : > { %v1746_v59 = vadd.f32 %v1686_v54, %v1008_v52  ;;  %v1689_v60 = vadd.f32 %v3107_v55, %v2995_v47  ;;  %v2998_v61 = vadd.f32 %v2997_v58, %v2996_v56  ;;  %v2999_v62 = vpop.f32.mrb[50].mxu0  ;;  %v1015_v47 = vld [vmem:[#allocation2 + $0xe8] sm:$0xff] }
 0x28d   : > { %v3000_v63 = vpop.f32.mrb[51].mxu0 }
 0x28e   : > { %1778 = vst [vmem:[#allocation2 + $0xb0] sm:$0xff] %v1746_v59  ;;  %v1747_v0 = vadd.f32 %v1689_v60, %v1009_v57  ;;  %v3001_v1 = vadd.f32 %v3000_v63, %v2999_v62  ;;  %v3108_v2 = vpop.f32.mrb[48].mxu1  ;;  %v1016_v60 = vld [vmem:[#allocation2 + $0xf0] sm:$0xff] }
 0x28f   : > { %v3109_v3 = vpop.f32.mrb[49].mxu1 }
 0x290   : > { %1779 = vst [vmem:[#allocation2 + $0xb8] sm:$0xff] %v1747_v0  ;;  %v3110_v4 = vadd.f32 %v3109_v3, %v3108_v2  ;;  %v3111_v5 = vpop.f32.mrb[50].mxu1  ;;  %v1017_v0 = vld [vmem:[#allocation2 + $0xf8] sm:$0xff] }
 0x291   : > { %v3112_v8 = vpop.f32.mrb[51].mxu1 }
 0x292   : > { %v1694_v9 = vadd.f32 %v3110_v4, %v2998_v61  ;;  %v3113_v10 = vadd.f32 %v3112_v8, %v3111_v5  ;;  %v3002_v11 = vpop.f32.mrb[52].mxu0  ;;  %v1808_v4 = vld [vmem:[%s3686_s19 + $0x80] sm:$0xff] (!%p2736_p13)  ;;  %v1809_v8 = vld [vmem:[%s3686_s19 + $0x88] sm:$0xff] (!%p2736_p13) }
 0x293   : > { %v3003_v13 = vpop.f32.mrb[53].mxu0  ;;  %v1792_v5 = vld [vmem:[%s3686_s19] sm:$0xff] (!%p2736_p13) }
 0x294   : > { %v1748_v14 = vadd.f32 %v1694_v9, %v1010_v7  ;;  %v1697_v15 = vadd.f32 %v3113_v10, %v3001_v1  ;;  %v3004_v16 = vadd.f32 %v3003_v13, %v3002_v11  ;;  %v3005_v17 = vpop.f32.mrb[54].mxu0  ;;  %v3445_v7 = vmov (!%p2736_p13), 0   ;;  %v1793_v9 = vld [vmem:[%s3686_s19 + $0x8] sm:$0xff] (!%p2736_p13)  ;;  %v1795_v10 = vld [vmem:[%s3686_s19 + $0x18] sm:$0xff] (!%p2736_p13)  ;;  %v1794_v11 = vld [vmem:[%s3686_s19 + $0x10] sm:$0xff] (!%p2736_p13) }
 0x295   : > { %v3006_v18 = vpop.f32.mrb[55].mxu0  ;;  %3378 = vset.pattern.permute.xlu1 (!%p2736_p13), %v3445_v7  ;;  %3377 = vset.pattern.permute.xlu0 (!%p2736_p13), %v3445_v7  ;;  %v1810_v13 = vld [vmem:[%s3686_s19 + $0x90] sm:$0xff] (!%p2736_p13) }
 0x296   : > { %1780 = vst [vmem:[#allocation2 + $0xc0] sm:$0xff] %v1748_v14  ;;  %v1749_v19 = vadd.f32 %v1697_v15, %v1011_v12  ;;  %v3007_v20 = vadd.f32 %v3006_v18, %v3005_v17  ;;  %v3114_v21 = vpop.f32.mrb[52].mxu1  ;;  %1938 = vperm.xlu1 (!%p2736_p13), %3378, %v1808_v4   ;;  %1858 = vperm.xlu0 (!%p2736_p13), %3377, %v1792_v5   ;;  %v1811_v12 = vld [vmem:[%s3686_s19 + $0x98] sm:$0xff] (!%p2736_p13)  ;;  %v3379_v14 = vld [vmem:[%s4157_s5] sm:$0xff] (!%p2736_p13)   ;;  %v3380_v15 = vld [vmem:[%s4157_s5 + $0x8] sm:$0xff] (!%p2736_p13)  }
 0x297   : > { %v3115_v22 = vpop.f32.mrb[53].mxu1  ;;  %3156 = vmatprep.subr.bf16.mxu0 (!%p2736_p13), %v3379_v14  ;;  %3204 = vmatprep.subr.bf16.mxu1 (!%p2736_p13), %v3379_v14  ;;  %v1796_v17 = vld [vmem:[%s3686_s19 + $0x20] sm:$0xff] (!%p2736_p13)  ;;  %v3381_v18 = vld [vmem:[%s4157_s5 + $0x10] sm:$0xff] (!%p2736_p13)  }
 0x298   : > { %1781 = vst [vmem:[#allocation2 + $0xc8] sm:$0xff] %v1749_v19  ;;  %v3116_v23 = vadd.f32 %v3115_v22, %v3114_v21  ;;  %v3117_v24 = vpop.f32.mrb[54].mxu1  ;;  %3157 = vmatpush3.bf16.msra.mxu0 (!%p2736_p13), %v3379_v14  ;;  %3212 = vmatpush3.bf16.msra.mxu1 (!%p2736_p13), %v3379_v14  ;;  %v1813_v19 = vld [vmem:[%s3686_s19 + $0xa8] sm:$0xff] (!%p2736_p13)  ;;  %v3382_v21 = vld [vmem:[%s4157_s5 + $0x18] sm:$0xff] (!%p2736_p13)  }
 0x299   : > { %v3118_v26 = vpop.f32.mrb[55].mxu1  ;;  %3158 = vmatprep.subr.bf16.mxu0 (!%p2736_p13), %v3380_v15  ;;  %3205 = vmatprep.subr.bf16.mxu1 (!%p2736_p13), %v3380_v15  ;;  %v1799_v22 = vld [vmem:[%s3686_s19 + $0x38] sm:$0xff] (!%p2736_p13) }
 0x29a   : > { %v1702_v27 = vadd.f32 %v3116_v23, %v3004_v16  ;;  %v3119_v28 = vadd.f32 %v3118_v26, %v3117_v24  ;;  %v3008_v29 = vpop.f32.mrb[56].mxu0  ;;  %1943 = vperm.xlu1 (!%p2736_p13), %3378, %v1809_v8   ;;  %1863 = vperm.xlu0 (!%p2736_p13), %3377, %v1793_v9   ;;  %v1797_v16 = vld [vmem:[%s3686_s19 + $0x28] sm:$0xff] (!%p2736_p13)  ;;  %v1798_v23 = vld [vmem:[%s3686_s19 + $0x30] sm:$0xff] (!%p2736_p13)  ;;  %v3383_v24 = vld [vmem:[%s4157_s5 + $0x20] sm:$0xff] (!%p2736_p13)  }
 0x29b   : > { %v3009_v31 = vpop.f32.mrb[57].mxu0  ;;  %v1814_v26 = vld [vmem:[%s3686_s19 + $0xb0] sm:$0xff] (!%p2736_p13)  ;;  %v1843_v9 = vld [vmem:[#allocation2 + $0x98] sm:$0xff] (!%p2736_p13) }
 0x29c   : > { %v1750_v32 = vadd.f32 %v1702_v27, %v1012_v25  ;;  %v1705_v33 = vadd.f32 %v3119_v28, %v3007_v20  ;;  %v3010_v34 = vadd.f32 %v3009_v31, %v3008_v29  ;;  %v3011_v35 = vpop.f32.mrb[58].mxu0  ;;  %v1812_v20 = vld [vmem:[%s3686_s19 + $0xa0] sm:$0xff] (!%p2736_p13)  ;;  %3159 = vmatpush3.bf16.msra.mxu0 (!%p2736_p13), %v3380_v15  ;;  %3213 = vmatpush3.bf16.msra.mxu1 (!%p2736_p13), %v3380_v15  ;;  %v1815_v25 = vld [vmem:[%s3686_s19 + $0xb8] sm:$0xff] (!%p2736_p13)  ;;  %v3384_v27 = vld [vmem:[%s4157_s5 + $0x28] sm:$0xff] (!%p2736_p13)  }
 0x29d   : > { %v3012_v36 = vpop.f32.mrb[59].mxu0  ;;  %3160 = vmatprep.subr.bf16.mxu0 (!%p2736_p13), %v3381_v18  ;;  %3206 = vmatprep.subr.bf16.mxu1 (!%p2736_p13), %v3381_v18  ;;  %v1801_v28 = vld [vmem:[%s3686_s19 + $0x48] sm:$0xff] (!%p2736_p13)  ;;  %v1800_v29 = vld [vmem:[%s3686_s19 + $0x40] sm:$0xff] (!%p2736_p13) }
 0x29e   : > { %1782 = vst [vmem:[#allocation2 + $0xd0] sm:$0xff] %v1750_v32  ;;  %v1751_v37 = vadd.f32 %v1705_v33, %v1013_v30  ;;  %v3013_v38 = vadd.f32 %v3012_v36, %v3011_v35  ;;  %v3120_v39 = vpop.f32.mrb[56].mxu1  ;;  %1873 = vperm.xlu1 (!%p2736_p13), %3378, %v1795_v10   ;;  %1868 = vperm.xlu0 (!%p2736_p13), %3377, %v1794_v11   ;;  %v3385_v30 = vld [vmem:[%s4157_s5 + $0x30] sm:$0xff] (!%p2736_p13)   ;;  %v1817_v31 = vld [vmem:[%s3686_s19 + $0xc8] sm:$0xff] (!%p2736_p13)  ;;  %v1816_v32 = vld [vmem:[%s3686_s19 + $0xc0] sm:$0xff] (!%p2736_p13) }
 0x29f   : > { %v3121_v40 = vpop.f32.mrb[57].mxu1  ;;  %v3386_v33 = vld [vmem:[%s4157_s5 + $0x38] sm:$0xff] (!%p2736_p13)   ;;  %v1802_v35 = vld [vmem:[%s3686_s19 + $0x50] sm:$0xff] (!%p2736_p13) }
 0x2a0   : > { %1783 = vst [vmem:[#allocation2 + $0xd8] sm:$0xff] %v1751_v37  ;;  %v3122_v41 = vadd.f32 %v3121_v40, %v3120_v39  ;;  %v3123_v42 = vpop.f32.mrb[58].mxu1  ;;  %3161 = vmatpush3.bf16.msra.mxu0 (!%p2736_p13), %v3381_v18  ;;  %3214 = vmatpush3.bf16.msra.mxu1 (!%p2736_p13), %v3381_v18  ;;  %v1819_v36 = vld [vmem:[%s3686_s19 + $0xd8] sm:$0xff] (!%p2736_p13)  ;;  %v1818_v37 = vld [vmem:[%s3686_s19 + $0xd0] sm:$0xff] (!%p2736_p13)  ;;  %v1804_v39 = vld [vmem:[%s3686_s19 + $0x60] sm:$0xff] (!%p2736_p13) }
 0x2a1   : > { %v3124_v44 = vpop.f32.mrb[59].mxu1  ;;  %3162 = vmatprep.subr.bf16.mxu0 (!%p2736_p13), %v3382_v21  ;;  %3207 = vmatprep.subr.bf16.mxu1 (!%p2736_p13), %v3382_v21  ;;  %v1821_v40 = vld [vmem:[%s3686_s19 + $0xe8] sm:$0xff] (!%p2736_p13)  ;;  %v1842_v10 = vld [vmem:[#allocation2 + $0x90] sm:$0xff] (!%p2736_p13) }
 0x2a2   : > { %v1710_v6 = vadd.f32 %v3122_v41, %v3010_v34  ;;  %v3125_v45 = vadd.f32 %v3124_v44, %v3123_v42  ;;  %v3014_v46 = vpop.f32.mrb[60].mxu0  ;;  %1953 = vperm.xlu1 (!%p2736_p13), %3378, %v1811_v12   ;;  %1948 = vperm.xlu0 (!%p2736_p13), %3377, %v1810_v13   ;;  %v1803_v34 = vld [vmem:[%s3686_s19 + $0x58] sm:$0xff] (!%p2736_p13)  ;;  %v1820_v41 = vld [vmem:[%s3686_s19 + $0xe0] sm:$0xff] (!%p2736_p13) }
 0x2a3   : > { %v3015_v48 = vpop.f32.mrb[61].mxu0  ;;  %v1807_v42 = vld [vmem:[%s3686_s19 + $0x78] sm:$0xff] (!%p2736_p13) }
 0x2a4   : > { %v1752_v49 = vadd.f32 %v1710_v6, %v1014_v43  ;;  %v1713_v50 = vadd.f32 %v3125_v45, %v3013_v38  ;;  %v3016_v51 = vadd.f32 %v3015_v48, %v3014_v46  ;;  %v3017_v52 = vpop.f32.mrb[62].mxu0  ;;  %3163 = vmatpush3.bf16.msra.mxu0 (!%p2736_p13), %v3382_v21  ;;  %3215 = vmatpush3.bf16.msra.mxu1 (!%p2736_p13), %v3382_v21  ;;  %v1805_v38 = vld [vmem:[%s3686_s19 + $0x68] sm:$0xff] (!%p2736_p13)  ;;  %v1806_v43 = vld [vmem:[%s3686_s19 + $0x70] sm:$0xff] (!%p2736_p13)  ;;  %v1823_v44 = vld [vmem:[%s3686_s19 + $0xf8] sm:$0xff] (!%p2736_p13) }
 0x2a5   : > { %v3018_v53 = vpop.f32.mrb[63].mxu0  ;;  %3164 = vmatprep.subr.bf16.mxu0 (!%p2736_p13), %v3383_v24  ;;  %3208 = vmatprep.subr.bf16.mxu1 (!%p2736_p13), %v3383_v24  ;;  %v1822_v6 = vld [vmem:[%s3686_s19 + $0xf0] sm:$0xff] (!%p2736_p13)  ;;  %v1840_v45 = vld [vmem:[#allocation2 + $0x80] sm:$0xff] (!%p2736_p13)  ;;  %v1829_v21 = vld [vmem:[#allocation2 + $0x28] sm:$0xff] (!%p2736_p13) }
 0x2a6   : > { %1784 = vst [vmem:[#allocation2 + $0xe0] sm:$0xff] %v1752_v49  ;;  %v1753_v54 = vadd.f32 %v1713_v50, %v1015_v47  ;;  %v3019_v55 = vadd.f32 %v3018_v53, %v3017_v52  ;;  %v3126_v56 = vpop.f32.mrb[60].mxu1  ;;  %1883 = vperm.xlu1 (!%p2736_p13), %3378, %v1797_v16   ;;  %1878 = vperm.xlu0 (!%p2736_p13), %3377, %v1796_v17   ;;  %v1824_v46 = vld [vmem:[#allocation2] sm:$0xff] (!%p2736_p13)  ;;  %v1841_v52 = vld [vmem:[#allocation2 + $0x88] sm:$0xff] (!%p2736_p13) }
 0x2a7   : > { %v3127_v57 = vpop.f32.mrb[61].mxu1  ;;  %v1825_v53 = vld [vmem:[#allocation2 + $0x8] sm:$0xff] (!%p2736_p13) }
 0x2a8   : > { %1785 = vst [vmem:[#allocation2 + $0xe8] sm:$0xff] %v1753_v54  ;;  %v3128_v58 = vadd.f32 %v3127_v57, %v3126_v56  ;;  %v3129_v59 = vpop.f32.mrb[62].mxu1  ;;  %3165 = vmatpush3.bf16.msra.mxu0 (!%p2736_p13), %v3383_v24  ;;  %3216 = vmatpush3.bf16.msra.mxu1 (!%p2736_p13), %v3383_v24 }
 0x2a9   : > { %v3130_v61 = vpop.f32.mrb[63].mxu1  ;;  %3166 = vmatprep.subr.bf16.mxu0 (!%p2736_p13), %v3384_v27  ;;  %3209 = vmatprep.subr.bf16.mxu1 (!%p2736_p13), %v3384_v27 }
 0x2aa   : > { %v1718_v62 = vadd.f32 %v3128_v58, %v3016_v51  ;;  %v3131_v63 = vadd.f32 %v3130_v61, %v3129_v59  ;;  %1791 = sbr.rel (%p2736_p13) target bundleno = 1078 (0x436), region = 75  ;;  %1963 = vperm.xlu1 (!%p2736_p13), %3378, %v1813_v19   ;;  %1958 = vperm.xlu0 (!%p2736_p13), %3377, %v1812_v20   ;;  %v3959_v51 = vld [vmem:[%s4156_s4] ss:$0 sm:$0xff] (!%p2736_p13)  ;;  %v1826_v61 = vld [vmem:[#allocation2 + $0x10] sm:$0xff] (!%p2736_p13) }
 0x2ac   : > { %v1754_v1 = vadd.f32 %v1718_v62, %v1016_v60  ;;  %v1721_v2 = vadd.f32 %v3131_v63, %v3019_v55  ;;  %3167 = vmatpush3.bf16.msra.mxu0 (!%p2736_p13), %v3384_v27  ;;  %3217 = vmatpush3.bf16.msra.mxu1 (!%p2736_p13), %v3384_v27  ;;  %v1827_v60 = vld [vmem:[#allocation2 + $0x18] sm:$0xff] (!%p2736_p13) }
 0x2ad   : > { %3168 = vmatprep.subr.bf16.mxu0 (!%p2736_p13), %v3385_v30  ;;  %3210 = vmatprep.subr.bf16.mxu1 (!%p2736_p13), %v3385_v30 }
 0x2ae   : > { %1786 = vst [vmem:[#allocation2 + $0xf0] sm:$0xff] %v1754_v1  ;;  %v1755_v3 = vadd.f32 %v1721_v2, %v1017_v0  ;;  %1893 = vperm.xlu1 (!%p2736_p13), %3378, %v1799_v22   ;;  %1888 = vperm.xlu0 (!%p2736_p13), %3377, %v1798_v23   ;;  %v1828_v22 = vld [vmem:[#allocation2 + $0x20] sm:$0xff] (!%p2736_p13) }
 0x2b0   : > { %1787 = vst [vmem:[#allocation2 + $0xf8] sm:$0xff] %v1755_v3  ;;  %3169 = vmatpush3.bf16.msra.mxu0 (!%p2736_p13), %v3385_v30  ;;  %3218 = vmatpush3.bf16.msra.mxu1 (!%p2736_p13), %v3385_v30 }
 0x2b1   : > { %3170 = vmatprep.subr.bf16.mxu0 %v3386_v33  ;;  %3211 = vmatprep.subr.bf16.mxu1 %v3386_v33 }
 0x2b2   : > { %1973 = vperm.xlu1 %3378, %v1815_v25   ;;  %1968 = vperm.xlu0 %3377, %v1814_v26  }
 0x2b4   : > { %3171 = vmatpush3.bf16.msra.mxu0 %v3386_v33  ;;  %3219 = vmatpush3.bf16.msra.mxu1 %v3386_v33  ;;  %v1844_v33 = vld [vmem:[#allocation2 + $0xa0] sm:$0xff] }
 0x2b6   : > { %1903 = vperm.xlu1 %3378, %v1801_v28   ;;  %1898 = vperm.xlu0 %3377, %v1800_v29  }
 0x2ba   : > { %1983 = vperm.xlu1 %3378, %v1817_v31   ;;  %1978 = vperm.xlu0 %3377, %v1816_v32   ;;  %v1845_v32 = vld [vmem:[#allocation2 + $0xa8] sm:$0xff] }
 0x2be   : > { %1913 = vperm.xlu1 %3378, %v1803_v34   ;;  %1908 = vperm.xlu0 %3377, %v1802_v35  }
 0x2c2   : > { %1993 = vperm.xlu1 %3378, %v1819_v36   ;;  %1988 = vperm.xlu0 %3377, %v1818_v37  }
 0x2c6   : > { %1923 = vperm.xlu1 %3378, %v1805_v38   ;;  %1918 = vperm.xlu0 %3377, %v1804_v39  }
 0x2ca   : > { %2003 = vperm.xlu1 %3378, %v1821_v40   ;;  %1998 = vperm.xlu0 %3377, %v1820_v41  }
 0x2ce   : > { %1933 = vperm.xlu1 %3378, %v1807_v42   ;;  %1928 = vperm.xlu0 %3377, %v1806_v43   ;;  %v1831_v43 = vld [vmem:[#allocation2 + $0x38] sm:$0xff] }
 0x2d2   : > { %2013 = vperm.xlu1 %3378, %v1823_v44   ;;  %2008 = vperm.xlu0 %3377, %v1822_v6   ;;  %v1830_v44 = vld [vmem:[#allocation2 + $0x30] sm:$0xff] }
 0x315   : > { %v3950_v47 = vpop.permute.xlu1 %1938  ;;  %v3952_v48 = vpop.permute.xlu0 %1858 }
 0x316   : > { %v2032_v49 = vmul.f32 %v3950_v47, %v1840_v45  ;;  %v2016_v50 = vmul.f32 %v3952_v48, %v1824_v46 }
 0x318   : > { %v2055_v56 = vadd.f32 %v3959_v51, %v2016_v50  ;;  %v2071_v57 = vadd.f32 %v3959_v51, %v2032_v49 }
 0x319   : > { %v3961_v54 = vpop.permute.xlu1 %1943  ;;  %v3963_v55 = vpop.permute.xlu0 %1863 }
 0x31a   : > { %v2033_v58 = vmul.f32 %v3961_v54, %v1841_v52  ;;  %v2017_v59 = vmul.f32 %v3963_v55, %v1825_v53  ;;  %v2087_v2 = vmax.f32 %v2055_v56, 0.0  ;;  %v2103_v3 = vmax.f32 %v2071_v57, 0.0 }
 0x31c   : > { %v2056_v62 = vadd.f32 %v3959_v51, %v2017_v59  ;;  %v2072_v63 = vadd.f32 %v3959_v51, %v2033_v58  ;;  %v1847_v58 = vld [vmem:[#allocation2 + $0xb8] sm:$0xff]  ;;  %v1846_v59 = vld [vmem:[#allocation2 + $0xb0] sm:$0xff] }
 0x31d   : > { %v3971_v0 = vpop.permute.xlu1 %1873  ;;  %v3973_v1 = vpop.permute.xlu0 %1868 }
 0x31e   : > { %v2019_v4 = vmul.f32 %v3971_v0, %v1827_v60  ;;  %v2018_v5 = vmul.f32 %v3973_v1, %v1826_v61  ;;  %v2088_v7 = vmax.f32 %v2056_v62, 0.0  ;;  %v2104_v8 = vmax.f32 %v2072_v63, 0.0 }
 0x320   : > { %v2058_v11 = vadd.f32 %v3959_v51, %v2019_v4  ;;  %v2057_v12 = vadd.f32 %v3959_v51, %v2018_v5  ;;  %v2119_v13 = vpack.c.bf16 %v2088_v7, %v2087_v2  ;;  %v2127_v14 = vpack.c.bf16 %v2104_v8, %v2103_v3  ;;  %v1833_v8 = vld [vmem:[#allocation2 + $0x48] sm:$0xff] }
 0x321   : > { %v3979_v15 = vpop.permute.xlu1 %1953  ;;  %v3981_v16 = vpop.permute.xlu0 %1948 }
 0x322   : > { %v2090_v17 = vmax.f32 %v2058_v11, 0.0  ;;  %v2089_v18 = vmax.f32 %v2057_v12, 0.0  ;;  %v2035_v19 = vmul.f32 %v3979_v15, %v1843_v9  ;;  %v2034_v20 = vmul.f32 %v3981_v16, %v1842_v10  ;;  %3172 = vmatprep.mubr.bf16.mxu0 %v2119_v13  ;;  %3188 = vmatprep.mubr.bf16.mxu1 %v2127_v14  ;;  %v1832_v9 = vld [vmem:[#allocation2 + $0x40] sm:$0xff] }
 0x324   : > { %v2074_v23 = vadd.f32 %v3959_v51, %v2035_v19  ;;  %v2073_v24 = vadd.f32 %v3959_v51, %v2034_v20  ;;  %v2120_v25 = vpack.c.bf16 %v2090_v17, %v2089_v18 }
 0x325   : > { %v3987_v26 = vpop.permute.xlu1 %1883  ;;  %v3989_v27 = vpop.permute.xlu0 %1878 }
 0x326   : > { %v2106_v28 = vmax.f32 %v2074_v23, 0.0  ;;  %v2105_v29 = vmax.f32 %v2073_v24, 0.0  ;;  %v2021_v30 = vmul.f32 %v3987_v26, %v1829_v21  ;;  %v2020_v31 = vmul.f32 %v3989_v27, %v1828_v22  ;;  %3173 = vmatmul.mubr.bf16.vlgmr.msra.gmra.mrb[0].mxu0 %v2120_v25  ;;  %v1849_v21 = vld [vmem:[#allocation2 + $0xc8] sm:$0xff]  ;;  %v1848_v22 = vld [vmem:[#allocation2 + $0xc0] sm:$0xff] }
 0x328   : > { %v2060_v34 = vadd.f32 %v3959_v51, %v2021_v30  ;;  %v2059_v35 = vadd.f32 %v3959_v51, %v2020_v31  ;;  %v2128_v36 = vpack.c.bf16 %v2106_v28, %v2105_v29 }
 0x329   : > { %v3995_v37 = vpop.permute.xlu1 %1963  ;;  %v3997_v38 = vpop.permute.xlu0 %1958 }
 0x32a   : > { %v2092_v39 = vmax.f32 %v2060_v34, 0.0  ;;  %v2091_v40 = vmax.f32 %v2059_v35, 0.0  ;;  %v2037_v41 = vmul.f32 %v3995_v37, %v1845_v32  ;;  %v2036_v42 = vmul.f32 %v3997_v38, %v1844_v33  ;;  %3189 = vmatmul.mubr.bf16.vlgmr.msra.gmra.mrb[0].mxu1 %v2128_v36  ;;  %v1835_v34 = vld [vmem:[#allocation2 + $0x58] sm:$0xff]  ;;  %v1834_v35 = vld [vmem:[#allocation2 + $0x50] sm:$0xff] }
 0x32c   : > { %v2076_v6 = vadd.f32 %v3959_v51, %v2037_v41  ;;  %v2075_v45 = vadd.f32 %v3959_v51, %v2036_v42  ;;  %v2121_v46 = vpack.c.bf16 %v2092_v39, %v2091_v40 }
 0x32d   : > { %v4003_v49 = vpop.permute.xlu1 %1893  ;;  %v4005_v50 = vpop.permute.xlu0 %1888 }
 0x32e   : > { %v2108_v52 = vmax.f32 %v2076_v6, 0.0  ;;  %v2107_v53 = vmax.f32 %v2075_v45, 0.0  ;;  %v2023_v56 = vmul.f32 %v4003_v49, %v1831_v43  ;;  %v2022_v57 = vmul.f32 %v4005_v50, %v1830_v44  ;;  %3176 = vmatprep.mubr.bf16.mxu0 %v2121_v46  ;;  %v1851_v46 = vld [vmem:[#allocation2 + $0xd8] sm:$0xff] }
 0x330   : > { %v2062_v60 = vadd.f32 %v3959_v51, %v2023_v56  ;;  %v2061_v61 = vadd.f32 %v3959_v51, %v2022_v57  ;;  %v2129_v62 = vpack.c.bf16 %v2108_v52, %v2107_v53  ;;  %v1850_v52 = vld [vmem:[#allocation2 + $0xd0] sm:$0xff] }
 0x331   : > { %v4011_v63 = vpop.permute.xlu1 %1973  ;;  %v4013_v2 = vpop.permute.xlu0 %1968 }
 0x332   : > { %v2094_v3 = vmax.f32 %v2062_v60, 0.0  ;;  %v2093_v4 = vmax.f32 %v2061_v61, 0.0  ;;  %v2039_v5 = vmul.f32 %v4011_v63, %v1847_v58  ;;  %v2038_v7 = vmul.f32 %v4013_v2, %v1846_v59  ;;  %3192 = vmatprep.mubr.bf16.mxu1 %v2129_v62 }
 0x334   : > { %v2078_v10 = vadd.f32 %v3959_v51, %v2039_v5  ;;  %v2077_v11 = vadd.f32 %v3959_v51, %v2038_v7  ;;  %v2122_v12 = vpack.c.bf16 %v2094_v3, %v2093_v4  ;;  %v1837_v4 = vld [vmem:[#allocation2 + $0x68] sm:$0xff]  ;;  %v1836_v5 = vld [vmem:[#allocation2 + $0x60] sm:$0xff] }
 0x335   : > { %v4019_v13 = vpop.permute.xlu1 %1903  ;;  %v4021_v14 = vpop.permute.xlu0 %1898 }
 0x336   : > { %v2110_v17 = vmax.f32 %v2078_v10, 0.0  ;;  %v2109_v18 = vmax.f32 %v2077_v11, 0.0  ;;  %v2025_v19 = vmul.f32 %v4019_v13, %v1833_v8  ;;  %v2024_v20 = vmul.f32 %v4021_v14, %v1832_v9  ;;  %3177 = vmatmul.mubr.bf16.gmra.mrb[4].mxu0 %v2122_v12 }
 0x338   : > { %v2064_v23 = vadd.f32 %v3959_v51, %v2025_v19  ;;  %v2063_v24 = vadd.f32 %v3959_v51, %v2024_v20  ;;  %v2130_v25 = vpack.c.bf16 %v2110_v17, %v2109_v18  ;;  %v1853_v20 = vld [vmem:[#allocation2 + $0xe8] sm:$0xff] }
 0x339   : > { %v4027_v28 = vpop.permute.xlu1 %1983  ;;  %v4029_v29 = vpop.permute.xlu0 %1978 }
 0x33a   : > { %v2096_v30 = vmax.f32 %v2064_v23, 0.0  ;;  %v2095_v31 = vmax.f32 %v2063_v24, 0.0  ;;  %v2041_v32 = vmul.f32 %v4027_v28, %v1849_v21  ;;  %v2040_v33 = vmul.f32 %v4029_v29, %v1848_v22  ;;  %3193 = vmatmul.mubr.bf16.gmra.mrb[4].mxu1 %v2130_v25  ;;  %v1852_v21 = vld [vmem:[#allocation2 + $0xe0] sm:$0xff] }
 0x33c   : > { %v2080_v36 = vadd.f32 %v3959_v51, %v2041_v32  ;;  %v2079_v39 = vadd.f32 %v3959_v51, %v2040_v33  ;;  %v2123_v40 = vpack.c.bf16 %v2096_v30, %v2095_v31 }
 0x33d   : > { %v4035_v41 = vpop.permute.xlu1 %1913  ;;  %v4037_v42 = vpop.permute.xlu0 %1908 }
 0x33e   : > { %v2112_v43 = vmax.f32 %v2080_v36, 0.0  ;;  %v2111_v44 = vmax.f32 %v2079_v39, 0.0  ;;  %v2027_v6 = vmul.f32 %v4035_v41, %v1835_v34  ;;  %v2026_v45 = vmul.f32 %v4037_v42, %v1834_v35  ;;  %3180 = vmatprep.mubr.bf16.mxu0 %v2123_v40  ;;  %v1839_v35 = vld [vmem:[#allocation2 + $0x78] sm:$0xff]  ;;  %v1838_v36 = vld [vmem:[#allocation2 + $0x70] sm:$0xff] }
 0x340   : > { %v2066_v53 = vadd.f32 %v3959_v51, %v2027_v6  ;;  %v2065_v56 = vadd.f32 %v3959_v51, %v2026_v45  ;;  %v2131_v57 = vpack.c.bf16 %v2112_v43, %v2111_v44 }
 0x341   : > { %v4043_v58 = vpop.permute.xlu1 %1993  ;;  %v4045_v59 = vpop.permute.xlu0 %1988 }
 0x342   : > { %v2098_v60 = vmax.f32 %v2066_v53, 0.0  ;;  %v2097_v61 = vmax.f32 %v2065_v56, 0.0  ;;  %v2043_v62 = vmul.f32 %v4043_v58, %v1851_v46  ;;  %v2042_v3 = vmul.f32 %v4045_v59, %v1850_v52  ;;  %3196 = vmatprep.mubr.bf16.mxu1 %v2131_v57  ;;  %v1855_v56 = vld [vmem:[#allocation2 + $0xf8] sm:$0xff]  ;;  %v1854_v57 = vld [vmem:[#allocation2 + $0xf0] sm:$0xff] }
 0x344   : > { %v2082_v7 = vadd.f32 %v3959_v51, %v2043_v62  ;;  %v2081_v8 = vadd.f32 %v3959_v51, %v2042_v3  ;;  %v2124_v9 = vpack.c.bf16 %v2098_v60, %v2097_v61 }
 0x345   : > { %v4051_v10 = vpop.permute.xlu1 %1923  ;;  %v4053_v11 = vpop.permute.xlu0 %1918 }
 0x346   : > { %v2114_v12 = vmax.f32 %v2082_v7, 0.0  ;;  %v2113_v17 = vmax.f32 %v2081_v8, 0.0  ;;  %v2029_v18 = vmul.f32 %v4051_v10, %v1837_v4  ;;  %v2028_v19 = vmul.f32 %v4053_v11, %v1836_v5  ;;  %3181 = vmatmul.mubr.bf16.gmra.mrb[8].mxu0 %v2124_v9 }
 0x348   : > { %v2068_v22 = vadd.f32 %v3959_v51, %v2029_v18  ;;  %v2067_v23 = vadd.f32 %v3959_v51, %v2028_v19  ;;  %v2132_v24 = vpack.c.bf16 %v2114_v12, %v2113_v17 }
 0x349   : > { %v4059_v25 = vpop.permute.xlu1 %2003  ;;  %v4061_v30 = vpop.permute.xlu0 %1998 }
 0x34a   : > { %v2100_v31 = vmax.f32 %v2068_v22, 0.0  ;;  %v2099_v32 = vmax.f32 %v2067_v23, 0.0  ;;  %v2045_v33 = vmul.f32 %v4059_v25, %v1853_v20  ;;  %v2044_v34 = vmul.f32 %v4061_v30, %v1852_v21  ;;  %3197 = vmatmul.mubr.bf16.gmra.mrb[8].mxu1 %v2132_v24 }
 0x34c   : > { %v2084_v39 = vadd.f32 %v3959_v51, %v2045_v33  ;;  %v2083_v40 = vadd.f32 %v3959_v51, %v2044_v34  ;;  %v2125_v43 = vpack.c.bf16 %v2100_v31, %v2099_v32 }
 0x34d   : > { %v4067_v44 = vpop.permute.xlu1 %1933  ;;  %v4069_v6 = vpop.permute.xlu0 %1928 }
 0x34e   : > { %v2116_v45 = vmax.f32 %v2084_v39, 0.0  ;;  %v2115_v46 = vmax.f32 %v2083_v40, 0.0  ;;  %v2031_v52 = vmul.f32 %v4067_v44, %v1839_v35  ;;  %v2030_v53 = vmul.f32 %v4069_v6, %v1838_v36  ;;  %3184 = vmatprep.mubr.bf16.mxu0 %v2125_v43 }
 0x350   : > { %v2070_v60 = vadd.f32 %v3959_v51, %v2031_v52  ;;  %v2069_v61 = vadd.f32 %v3959_v51, %v2030_v53  ;;  %v2133_v62 = vpack.c.bf16 %v2116_v45, %v2115_v46 }
 0x351   : > { %v4075_v3 = vpop.permute.xlu1 %2013  ;;  %v4077_v4 = vpop.permute.xlu0 %2008 }
 0x352   : > { %v2102_v5 = vmax.f32 %v2070_v60, 0.0  ;;  %v2101_v7 = vmax.f32 %v2069_v61, 0.0  ;;  %v2047_v8 = vmul.f32 %v4075_v3, %v1855_v56  ;;  %v2046_v9 = vmul.f32 %v4077_v4, %v1854_v57  ;;  %3200 = vmatprep.mubr.bf16.mxu1 %v2133_v62 }
 0x354   : > { %v2086_v12 = vadd.f32 %v3959_v51, %v2047_v8  ;;  %v2085_v17 = vadd.f32 %v3959_v51, %v2046_v9  ;;  %v2126_v18 = vpack.c.bf16 %v2102_v5, %v2101_v7 }
 0x356   : > { %v2118_v19 = vmax.f32 %v2086_v12, 0.0  ;;  %v2117_v20 = vmax.f32 %v2085_v17, 0.0  ;;  %3185 = vmatmul.mubr.bf16.gmra.mrb[12].mxu0 %v2126_v18 }
 0x358   : > { %v2134_v21 = vpack.c.bf16 %v2118_v19, %v2117_v20 }
 0x35a   : > { %3201 = vmatmul.mubr.bf16.gmra.mrb[12].mxu1 %v2134_v21 }
 0x3f9   : > { %v3174_v22 = vpop.f32.mrb[0].mxu0 }
 0x3fa   : > { %v2233_v23 = vpop.f32.mrb[1].mxu0  ;;  %v2362_v31 = vmul.f32 %v3174_v22, %v3973_v1 }
 0x3fb   : > { %v3175_v24 = vpop.f32.mrb[2].mxu0  ;;  %v2360_v34 = vmul.f32 %v2233_v23, %v3952_v48 }
 0x3fc   : > { %v2363_v32 = vmul.f32 %v3175_v24, %v3971_v0  ;;  %v2236_v33 = vpop.f32.mrb[3].mxu0 }
 0x3fd   : > { %v2361_v51 = vmul.f32 %v2236_v33, %v3963_v55  ;;  %v3190_v35 = vpop.f32.mrb[0].mxu1 }
 0x3fe   : > { %v2821_v36 = vpack.c.bf16 %v2363_v32, %v2362_v31  ;;  %v2297_v39 = vpop.f32.mrb[1].mxu1  ;;  %v2378_v45 = vmul.f32 %v3190_v35, %v3981_v16 }
 0x3ff   : > { %v2816_v40 = vpack.c.bf16 %v2361_v51, %v2360_v34  ;;  %v3191_v43 = vpop.f32.mrb[2].mxu1  ;;  %v2376_v0 = vmul.f32 %v2297_v39, %v3950_v47 }
 0x400   : > { %2893 = vst [vmem:[%s3691_s24 + $0x8] sm:$0xff] %v2821_v36   ;;  %v2379_v46 = vmul.f32 %v3191_v43, %v3979_v15  ;;  %v2300_v1 = vpop.f32.mrb[3].mxu1 }
 0x401   : > { %2817 = vst [vmem:[%s3691_s24] sm:$0xff] %v2816_v40   ;;  %v2377_v48 = vmul.f32 %v2300_v1, %v3961_v54 }
 0x402   : > { %v2861_v52 = vpack.c.bf16 %v2379_v46, %v2378_v45 }
 0x403   : > { %v2856_v53 = vpack.c.bf16 %v2377_v48, %v2376_v0 }
 0x404   : > { %2901 = vst [vmem:[%s3691_s24 + $0x48] sm:$0xff] %v2861_v52  }
 0x405   : > { %2900 = vst [vmem:[%s3691_s24 + $0x40] sm:$0xff] %v2856_v53  }
 0x409   : > { %v3178_v55 = vpop.f32.mrb[4].mxu0 }
 0x40a   : > { %v2249_v56 = vpop.f32.mrb[5].mxu0  ;;  %v2366_v60 = vmul.f32 %v3178_v55, %v4005_v50 }
 0x40b   : > { %v3179_v57 = vpop.f32.mrb[6].mxu0  ;;  %v2364_v61 = vmul.f32 %v2249_v56, %v3989_v27 }
 0x40c   : > { %v2367_v16 = vmul.f32 %v3179_v57, %v4003_v49  ;;  %v2252_v15 = vpop.f32.mrb[7].mxu0 }
 0x40d   : > { %v2365_v47 = vmul.f32 %v2252_v15, %v3987_v26  ;;  %v3194_v54 = vpop.f32.mrb[4].mxu1 }
 0x40e   : > { %v2831_v62 = vpack.c.bf16 %v2367_v16, %v2366_v60  ;;  %v2313_v5 = vpop.f32.mrb[5].mxu1  ;;  %v2382_v9 = vmul.f32 %v3194_v54, %v4013_v2 }
 0x40f   : > { %v2826_v7 = vpack.c.bf16 %v2365_v47, %v2364_v61  ;;  %v3195_v8 = vpop.f32.mrb[6].mxu1  ;;  %v2380_v49 = vmul.f32 %v2313_v5, %v3997_v38 }
 0x410   : > { %2895 = vst [vmem:[%s3691_s24 + $0x18] sm:$0xff] %v2831_v62   ;;  %v2383_v12 = vmul.f32 %v3195_v8, %v4011_v63  ;;  %v2316_v50 = vpop.f32.mrb[7].mxu1 }
 0x411   : > { %2894 = vst [vmem:[%s3691_s24 + $0x10] sm:$0xff] %v2826_v7   ;;  %v2381_v27 = vmul.f32 %v2316_v50, %v3995_v37 }
 0x412   : > { %v2871_v17 = vpack.c.bf16 %v2383_v12, %v2382_v9 }
 0x413   : > { %v2866_v18 = vpack.c.bf16 %v2381_v27, %v2380_v49 }
 0x414   : > { %2903 = vst [vmem:[%s3691_s24 + $0x58] sm:$0xff] %v2871_v17  }
 0x415   : > { %2902 = vst [vmem:[%s3691_s24 + $0x50] sm:$0xff] %v2866_v18  }
 0x419   : > { %v3182_v26 = vpop.f32.mrb[8].mxu0 }
 0x41a   : > { %v2265_v19 = vpop.f32.mrb[9].mxu0  ;;  %v2370_v21 = vmul.f32 %v3182_v26, %v4037_v42 }
 0x41b   : > { %v3183_v20 = vpop.f32.mrb[10].mxu0  ;;  %v2368_v22 = vmul.f32 %v2265_v19, %v4021_v14 }
 0x41c   : > { %v2371_v2 = vmul.f32 %v3183_v20, %v4035_v41  ;;  %v2268_v63 = vpop.f32.mrb[11].mxu0 }
 0x41d   : > { %v2369_v38 = vmul.f32 %v2268_v63, %v4019_v13  ;;  %v3198_v37 = vpop.f32.mrb[8].mxu1 }
 0x41e   : > { %v2841_v23 = vpack.c.bf16 %v2371_v2, %v2370_v21  ;;  %v2329_v24 = vpop.f32.mrb[9].mxu1  ;;  %v2386_v33 = vmul.f32 %v3198_v37, %v4045_v59 }
 0x41f   : > { %v2836_v31 = vpack.c.bf16 %v2369_v38, %v2368_v22  ;;  %v3199_v32 = vpop.f32.mrb[10].mxu1  ;;  %v2384_v41 = vmul.f32 %v2329_v24, %v4029_v29 }
 0x420   : > { %2897 = vst [vmem:[%s3691_s24 + $0x28] sm:$0xff] %v2841_v23   ;;  %v2387_v34 = vmul.f32 %v3199_v32, %v4043_v58  ;;  %v2332_v42 = vpop.f32.mrb[11].mxu1 }
 0x421   : > { %2896 = vst [vmem:[%s3691_s24 + $0x20] sm:$0xff] %v2836_v31   ;;  %v2385_v14 = vmul.f32 %v2332_v42, %v4027_v28 }
 0x422   : > { %v2881_v51 = vpack.c.bf16 %v2387_v34, %v2386_v33 }
 0x423   : > { %v2876_v35 = vpack.c.bf16 %v2385_v14, %v2384_v41 }
 0x424   : > { %2905 = vst [vmem:[%s3691_s24 + $0x68] sm:$0xff] %v2881_v51  }
 0x425   : > { %2904 = vst [vmem:[%s3691_s24 + $0x60] sm:$0xff] %v2876_v35  }
 0x429   : > { %v3186_v13 = vpop.f32.mrb[12].mxu0 }
 0x42a   : > { %v2281_v36 = vpop.f32.mrb[13].mxu0  ;;  %v2374_v40 = vmul.f32 %v3186_v13, %v4069_v6 }
 0x42b   : > { %v3187_v39 = vpop.f32.mrb[14].mxu0  ;;  %v2372_v43 = vmul.f32 %v2281_v36, %v4053_v11 }
 0x42c   : > { %v2375_v59 = vmul.f32 %v3187_v39, %v4067_v44  ;;  %v2284_v58 = vpop.f32.mrb[15].mxu0 }
 0x42d   : > { %v2373_v29 = vmul.f32 %v2284_v58, %v4051_v10  ;;  %v3202_v28 = vpop.f32.mrb[12].mxu1 }
 0x42e   : > { %v2851_v45 = vpack.c.bf16 %v2375_v59, %v2374_v40  ;;  %v2345_v46 = vpop.f32.mrb[13].mxu1  ;;  %v2390_v48 = vmul.f32 %v3202_v28, %v4077_v4 }
 0x42f   : > { %v2846_v1 = vpack.c.bf16 %v2373_v29, %v2372_v43  ;;  %v3203_v0 = vpop.f32.mrb[14].mxu1  ;;  %v2388_v44 = vmul.f32 %v2345_v46, %v4061_v30 }
 0x430   : > { %2899 = vst [vmem:[%s3691_s24 + $0x38] sm:$0xff] %v2851_v45   ;;  %v2391_v52 = vmul.f32 %v3203_v0, %v4075_v3  ;;  %v2348_v6 = vpop.f32.mrb[15].mxu1 }
 0x431   : > { %2898 = vst [vmem:[%s3691_s24 + $0x30] sm:$0xff] %v2846_v1   ;;  %v2389_v11 = vmul.f32 %v2348_v6, %v4059_v25 }
 0x432   : > { %v2891_v53 = vpack.c.bf16 %v2391_v52, %v2390_v48 }
 0x433   : > { %v2886_v55 = vpack.c.bf16 %v2389_v11, %v2388_v44 }
 0x434   : > { %2907 = vst [vmem:[%s3691_s24 + $0x78] sm:$0xff] %v2891_v53  }
 0x435   : > { %2906 = vst [vmem:[%s3691_s24 + $0x70] sm:$0xff] %v2886_v55  }
 0x436 PF: > { %s16_s27 = sadd.s32 1, %s3441_s27   ;;  %s4159_s21 = smov %s3421_s22 }
 0x437   : > { %p13_p0 = scmp.ge.s32.totalorder %s16_s27, 10   ;;  %s4160_s22 = smov %s3532_s10 }
 0x438   : > { %s4161_s23 = smov %s3433_s25  ;;  %s4162_s24 = smov %s3437_s26 }
 0x439   : > { %s4163_s25 = smov %s4166_s28  ;;  %s4164_s26 = smov %s4170_s29 }
 0x43a   :  { %15 = sbr.rel (!%p13_p0) target bundleno = 4 (0x4), region = 116 }

// kernel: bppgcn_forward.3
= control target key start
LH: loop header
LB: loop body
LE: loop exit
PB: predicated region body
PF: predicated region fallthrough
CT: control target
= control target key end

     0   :  { %s2554_s15 = smov 0   ;;  %s2556_s16 = smov 0   ;;  %s2988_s0 = inlined_call_operand.vmem [shape: bf16[1024,1024], index: 0, kind: input, shape index: {}]   ;;  %s2989_s1 = inlined_call_operand.vmem [shape: bf16[1024,128], index: 1, kind: input, shape index: {}]   ;;  %s2990_s2 = inlined_call_operand.vmem [shape: f32[1024,1], index: 2, kind: input, shape index: {}]   ;;  %s2991_s3 = inlined_call_operand.vmem [shape: f32[1,128], index: 3, kind: input, shape index: {}]   ;;  %s2992_s4 = inlined_call_operand.vmem [shape: f32[1024,128], index: 4, kind: output, shape index: {}]  }
   0x1   :  { %s2558_s17 = smov 0   ;;  %s2560_s18 = smov 0  }
   0x2   :  { %s2562_s19 = smov 0   ;;  %s2564_s20 = smov 0  }
   0x3   :  { %s2566_s21 = smov 0  }
   0x4 LB: > { %s23_s22 = sadd.s32 1, %s2517_s19  ;;  %s26_s23 = sadd.s32 1, %s2521_s20  ;;  %s2525_s21 = sphi %s2566_s21, %s14_s21   ;;  %s2521_s20 = sphi %s2564_s20, %s2998_s20   ;;  %s2517_s19 = sphi %s2562_s19, %s2997_s19   ;;  %s2513_s18 = sphi %s2560_s18, %s2996_s18   ;;  %s2509_s17 = sphi %s2558_s17, %s2995_s17   ;;  %s2505_s16 = sphi %s2556_s16, %s2994_s16   ;;  %s2501_s15 = sphi %s2554_s15, %s2993_s15  }
   0x5   : > { %p24_p0 = scmp.ge.s32.totalorder %s23_s22, 2  ;;  %p42_p1 = scmp.ne.s32.totalorder %s2505_s16, %s2501_s15 }
   0x6   : > { %p43_p2 = scmp.eq.s32.totalorder %s2525_s21, 0  ;;  %s35_s27 = sadd.s32 1, %s2505_s16 }
   0x7   : > { %s3000_s22 = smov (%p24_p0, %s23_s22), 0  ;;  %s3002_s23 = smov (!%p24_p0, %s26_s23), %s2521_s20 }
   0x8   : > { %p44_p3 = por %p43_p2, %p42_p1  ;;  %p28_p4 = scmp.ge.s32.totalorder %s3002_s23, 4 }
   0x9   : > { %s31_s24 = ssub.s32 %s2517_s19, %s3000_s22  ;;  %p1943_p6 = scmp.ge.s32.totalorder %s2525_s21, 8 }
   0xa   : > { %s3004_s23 = smov (%p28_p4, %s3002_s23), 0 }
   0xb   : > { %s30_s25 = ssub.s32 %s2521_s20, %s3004_s23  ;;  %168 = sbr.rel (%p1943_p6) target bundleno = 57 (0x39), region = 24 }
   0xc   : > { %s32_s26 = sor.u32 %s31_s24, %s30_s25 }
   0xd   : > { %p33_p5 = scmp.eq.s32.totalorder %s32_s26, 0 }
   0xf   : > { %s2605_s28 = scalar_select %p33_p5, %s2505_s16, %s35_s27  }
  0x12   : > { %171 = sbr.rel (!%p44_p3) target bundleno = 57 (0x39), region = 28  ;;  %s173_s29 = sand.u32 (%p44_p3), 1, %s2505_s16  }
  0x13   : > { %s1946_s30 = sshll.u32 (%p44_p3), %s2517_s19, 2  ;;  %s1944_s5 = sshll.u32 (%p44_p3), %s173_s29, 9 }
  0x14   : > { %s2058_s6 = sshll.u32 (%p44_p3), %s2521_s20, 8  ;;  %s2619_s12 = scalar_lea.vmem (%p44_p3), [#allocation3], %s1944_s5 }
  0x15   : > { %s179_s7 = sadd.s32 (%p44_p3), %s2058_s6, %s1946_s30 }
  0x16   : > { %s1948_s8 = sshll.u32 (%p44_p3), %s179_s7, 2 }
  0x17   : > { %s2614_s11 = scalar_lea.vmem (%p44_p3), %s2988_s0, %s1948_s8 }
  0x18   : > { %v194_v0 = vld [vmem:[%s2614_s11] sm:$0xff] (%p44_p3)  ;;  %v196_v1 = vld [vmem:[%s2614_s11 + $0x8] sm:$0xff] (%p44_p3) }
  0x19   : > { %v198_v2 = vld [vmem:[%s2614_s11 + $0x20] sm:$0xff]  ;;  %195 = vst [vmem:[%s2619_s12] sm:$0xff] %v194_v0  ;;  %197 = vst [vmem:[%s2619_s12 + $0x8] sm:$0xff] %v196_v1  ;;  %v200_v3 = vld [vmem:[%s2614_s11 + $0x28] sm:$0xff] }
  0x1a   : > { %199 = vst [vmem:[%s2619_s12 + $0x10] sm:$0xff] %v198_v2  ;;  %v202_v4 = vld [vmem:[%s2614_s11 + $0x40] sm:$0xff]  ;;  %v204_v5 = vld [vmem:[%s2614_s11 + $0x48] sm:$0xff]  ;;  %201 = vst [vmem:[%s2619_s12 + $0x18] sm:$0xff] %v200_v3 }
  0x1b   : > { %203 = vst [vmem:[%s2619_s12 + $0x20] sm:$0xff] %v202_v4  ;;  %205 = vst [vmem:[%s2619_s12 + $0x28] sm:$0xff] %v204_v5  ;;  %v206_v6 = vld [vmem:[%s2614_s11 + $0x60] sm:$0xff]  ;;  %v208_v7 = vld [vmem:[%s2614_s11 + $0x68] sm:$0xff] }
  0x1c   : > { %v210_v8 = vld [vmem:[%s2614_s11 + $0x80] sm:$0xff]  ;;  %207 = vst [vmem:[%s2619_s12 + $0x30] sm:$0xff] %v206_v6  ;;  %209 = vst [vmem:[%s2619_s12 + $0x38] sm:$0xff] %v208_v7  ;;  %v212_v9 = vld [vmem:[%s2614_s11 + $0x88] sm:$0xff] }
  0x1d   : > { %211 = vst [vmem:[%s2619_s12 + $0x40] sm:$0xff] %v210_v8  ;;  %v214_v10 = vld [vmem:[%s2614_s11 + $0xa0] sm:$0xff]  ;;  %v216_v11 = vld [vmem:[%s2614_s11 + $0xa8] sm:$0xff]  ;;  %213 = vst [vmem:[%s2619_s12 + $0x48] sm:$0xff] %v212_v9 }
  0x1e   : > { %215 = vst [vmem:[%s2619_s12 + $0x50] sm:$0xff] %v214_v10  ;;  %217 = vst [vmem:[%s2619_s12 + $0x58] sm:$0xff] %v216_v11  ;;  %v218_v12 = vld [vmem:[%s2614_s11 + $0xc0] sm:$0xff]  ;;  %v220_v13 = vld [vmem:[%s2614_s11 + $0xc8] sm:$0xff] }
  0x1f   : > { %v222_v14 = vld [vmem:[%s2614_s11 + $0xe0] sm:$0xff]  ;;  %219 = vst [vmem:[%s2619_s12 + $0x60] sm:$0xff] %v218_v12  ;;  %221 = vst [vmem:[%s2619_s12 + $0x68] sm:$0xff] %v220_v13  ;;  %v224_v15 = vld [vmem:[%s2614_s11 + $0xe8] sm:$0xff] }
  0x20   : > { %223 = vst [vmem:[%s2619_s12 + $0x70] sm:$0xff] %v222_v14  ;;  %v226_v16 = vld [vmem:[%s2614_s11 + $0x100] sm:$0xff]  ;;  %v228_v17 = vld [vmem:[%s2614_s11 + $0x108] sm:$0xff]  ;;  %225 = vst [vmem:[%s2619_s12 + $0x78] sm:$0xff] %v224_v15 }
  0x21   : > { %227 = vst [vmem:[%s2619_s12 + $0x80] sm:$0xff] %v226_v16  ;;  %229 = vst [vmem:[%s2619_s12 + $0x88] sm:$0xff] %v228_v17  ;;  %v230_v18 = vld [vmem:[%s2614_s11 + $0x120] sm:$0xff]  ;;  %v232_v19 = vld [vmem:[%s2614_s11 + $0x128] sm:$0xff] }
  0x22   : > { %v234_v20 = vld [vmem:[%s2614_s11 + $0x140] sm:$0xff]  ;;  %231 = vst [vmem:[%s2619_s12 + $0x90] sm:$0xff] %v230_v18  ;;  %233 = vst [vmem:[%s2619_s12 + $0x98] sm:$0xff] %v232_v19  ;;  %v236_v21 = vld [vmem:[%s2614_s11 + $0x148] sm:$0xff] }
  0x23   : > { %235 = vst [vmem:[%s2619_s12 + $0xa0] sm:$0xff] %v234_v20  ;;  %v238_v22 = vld [vmem:[%s2614_s11 + $0x160] sm:$0xff]  ;;  %v240_v23 = vld [vmem:[%s2614_s11 + $0x168] sm:$0xff]  ;;  %237 = vst [vmem:[%s2619_s12 + $0xa8] sm:$0xff] %v236_v21 }
  0x24   : > { %239 = vst [vmem:[%s2619_s12 + $0xb0] sm:$0xff] %v238_v22  ;;  %241 = vst [vmem:[%s2619_s12 + $0xb8] sm:$0xff] %v240_v23  ;;  %v242_v24 = vld [vmem:[%s2614_s11 + $0x180] sm:$0xff]  ;;  %v244_v25 = vld [vmem:[%s2614_s11 + $0x188] sm:$0xff] }
  0x25   : > { %v246_v26 = vld [vmem:[%s2614_s11 + $0x1a0] sm:$0xff]  ;;  %243 = vst [vmem:[%s2619_s12 + $0xc0] sm:$0xff] %v242_v24  ;;  %245 = vst [vmem:[%s2619_s12 + $0xc8] sm:$0xff] %v244_v25  ;;  %v248_v27 = vld [vmem:[%s2614_s11 + $0x1a8] sm:$0xff] }
  0x26   : > { %247 = vst [vmem:[%s2619_s12 + $0xd0] sm:$0xff] %v246_v26  ;;  %v250_v28 = vld [vmem:[%s2614_s11 + $0x1c0] sm:$0xff]  ;;  %v252_v29 = vld [vmem:[%s2614_s11 + $0x1c8] sm:$0xff]  ;;  %249 = vst [vmem:[%s2619_s12 + $0xd8] sm:$0xff] %v248_v27 }
  0x27   : > { %251 = vst [vmem:[%s2619_s12 + $0xe0] sm:$0xff] %v250_v28  ;;  %253 = vst [vmem:[%s2619_s12 + $0xe8] sm:$0xff] %v252_v29  ;;  %v254_v30 = vld [vmem:[%s2614_s11 + $0x1e0] sm:$0xff]  ;;  %v256_v31 = vld [vmem:[%s2614_s11 + $0x1e8] sm:$0xff] }
  0x28   : > { %v258_v32 = vld [vmem:[%s2614_s11 + $0x200] sm:$0xff]  ;;  %255 = vst [vmem:[%s2619_s12 + $0xf0] sm:$0xff] %v254_v30  ;;  %257 = vst [vmem:[%s2619_s12 + $0xf8] sm:$0xff] %v256_v31  ;;  %v260_v33 = vld [vmem:[%s2614_s11 + $0x208] sm:$0xff] }
  0x29   : > { %259 = vst [vmem:[%s2619_s12 + $0x100] sm:$0xff] %v258_v32  ;;  %v262_v34 = vld [vmem:[%s2614_s11 + $0x220] sm:$0xff]  ;;  %v264_v35 = vld [vmem:[%s2614_s11 + $0x228] sm:$0xff]  ;;  %261 = vst [vmem:[%s2619_s12 + $0x108] sm:$0xff] %v260_v33 }
  0x2a   : > { %263 = vst [vmem:[%s2619_s12 + $0x110] sm:$0xff] %v262_v34  ;;  %265 = vst [vmem:[%s2619_s12 + $0x118] sm:$0xff] %v264_v35  ;;  %v266_v36 = vld [vmem:[%s2614_s11 + $0x240] sm:$0xff]  ;;  %v268_v37 = vld [vmem:[%s2614_s11 + $0x248] sm:$0xff] }
  0x2b   : > { %v270_v38 = vld [vmem:[%s2614_s11 + $0x260] sm:$0xff]  ;;  %267 = vst [vmem:[%s2619_s12 + $0x120] sm:$0xff] %v266_v36  ;;  %269 = vst [vmem:[%s2619_s12 + $0x128] sm:$0xff] %v268_v37  ;;  %v272_v39 = vld [vmem:[%s2614_s11 + $0x268] sm:$0xff] }
  0x2c   : > { %271 = vst [vmem:[%s2619_s12 + $0x130] sm:$0xff] %v270_v38  ;;  %v274_v40 = vld [vmem:[%s2614_s11 + $0x280] sm:$0xff]  ;;  %v276_v41 = vld [vmem:[%s2614_s11 + $0x288] sm:$0xff]  ;;  %273 = vst [vmem:[%s2619_s12 + $0x138] sm:$0xff] %v272_v39 }
  0x2d   : > { %275 = vst [vmem:[%s2619_s12 + $0x140] sm:$0xff] %v274_v40  ;;  %277 = vst [vmem:[%s2619_s12 + $0x148] sm:$0xff] %v276_v41  ;;  %v278_v42 = vld [vmem:[%s2614_s11 + $0x2a0] sm:$0xff]  ;;  %v280_v43 = vld [vmem:[%s2614_s11 + $0x2a8] sm:$0xff] }
  0x2e   : > { %v282_v44 = vld [vmem:[%s2614_s11 + $0x2c0] sm:$0xff]  ;;  %279 = vst [vmem:[%s2619_s12 + $0x150] sm:$0xff] %v278_v42  ;;  %281 = vst [vmem:[%s2619_s12 + $0x158] sm:$0xff] %v280_v43  ;;  %v284_v45 = vld [vmem:[%s2614_s11 + $0x2c8] sm:$0xff] }
  0x2f   : > { %283 = vst [vmem:[%s2619_s12 + $0x160] sm:$0xff] %v282_v44  ;;  %v286_v46 = vld [vmem:[%s2614_s11 + $0x2e0] sm:$0xff]  ;;  %v288_v47 = vld [vmem:[%s2614_s11 + $0x2e8] sm:$0xff]  ;;  %285 = vst [vmem:[%s2619_s12 + $0x168] sm:$0xff] %v284_v45 }
  0x30   : > { %287 = vst [vmem:[%s2619_s12 + $0x170] sm:$0xff] %v286_v46  ;;  %289 = vst [vmem:[%s2619_s12 + $0x178] sm:$0xff] %v288_v47  ;;  %v290_v48 = vld [vmem:[%s2614_s11 + $0x300] sm:$0xff]  ;;  %v292_v49 = vld [vmem:[%s2614_s11 + $0x308] sm:$0xff] }
  0x31   : > { %v294_v50 = vld [vmem:[%s2614_s11 + $0x320] sm:$0xff]  ;;  %291 = vst [vmem:[%s2619_s12 + $0x180] sm:$0xff] %v290_v48  ;;  %293 = vst [vmem:[%s2619_s12 + $0x188] sm:$0xff] %v292_v49  ;;  %v296_v51 = vld [vmem:[%s2614_s11 + $0x328] sm:$0xff] }
  0x32   : > { %295 = vst [vmem:[%s2619_s12 + $0x190] sm:$0xff] %v294_v50  ;;  %v298_v52 = vld [vmem:[%s2614_s11 + $0x340] sm:$0xff]  ;;  %v300_v53 = vld [vmem:[%s2614_s11 + $0x348] sm:$0xff]  ;;  %297 = vst [vmem:[%s2619_s12 + $0x198] sm:$0xff] %v296_v51 }
  0x33   : > { %299 = vst [vmem:[%s2619_s12 + $0x1a0] sm:$0xff] %v298_v52  ;;  %301 = vst [vmem:[%s2619_s12 + $0x1a8] sm:$0xff] %v300_v53  ;;  %v302_v54 = vld [vmem:[%s2614_s11 + $0x360] sm:$0xff]  ;;  %v304_v55 = vld [vmem:[%s2614_s11 + $0x368] sm:$0xff] }
  0x34   : > { %v306_v56 = vld [vmem:[%s2614_s11 + $0x380] sm:$0xff]  ;;  %303 = vst [vmem:[%s2619_s12 + $0x1b0] sm:$0xff] %v302_v54  ;;  %305 = vst [vmem:[%s2619_s12 + $0x1b8] sm:$0xff] %v304_v55  ;;  %v308_v57 = vld [vmem:[%s2614_s11 + $0x388] sm:$0xff] }
  0x35   : > { %307 = vst [vmem:[%s2619_s12 + $0x1c0] sm:$0xff] %v306_v56  ;;  %v310_v58 = vld [vmem:[%s2614_s11 + $0x3a0] sm:$0xff]  ;;  %v312_v59 = vld [vmem:[%s2614_s11 + $0x3a8] sm:$0xff]  ;;  %309 = vst [vmem:[%s2619_s12 + $0x1c8] sm:$0xff] %v308_v57 }
  0x36   : > { %311 = vst [vmem:[%s2619_s12 + $0x1d0] sm:$0xff] %v310_v58  ;;  %313 = vst [vmem:[%s2619_s12 + $0x1d8] sm:$0xff] %v312_v59  ;;  %v314_v60 = vld [vmem:[%s2614_s11 + $0x3c0] sm:$0xff]  ;;  %v316_v61 = vld [vmem:[%s2614_s11 + $0x3c8] sm:$0xff] }
  0x37   : > { %v318_v62 = vld [vmem:[%s2614_s11 + $0x3e0] sm:$0xff]  ;;  %315 = vst [vmem:[%s2619_s12 + $0x1e0] sm:$0xff] %v314_v60  ;;  %317 = vst [vmem:[%s2619_s12 + $0x1e8] sm:$0xff] %v316_v61  ;;  %v320_v63 = vld [vmem:[%s2614_s11 + $0x3e8] sm:$0xff] }
  0x38   : > { %319 = vst [vmem:[%s2619_s12 + $0x1f0] sm:$0xff] %v318_v62  ;;  %321 = vst [vmem:[%s2619_s12 + $0x1f8] sm:$0xff] %v320_v63 }
  0x39 PF: > { %p1949_p7 = scmp.ge.s32.totalorder %s2525_s21, 1  ;;  %p335_p8 = scmp.lt.s32.totalorder %s2525_s21, 9 }
  0x3b   : > { %p336_p9 = pnand %p1949_p7, %p335_p8 }
  0x3c   : > { %s342_s13 = sand.u32 (!%p336_p9), 1, %s2501_s15   ;;  %s1951_s14 = sshll.u32 (!%p336_p9), %s2513_s18, 5 }
  0x3d   : > { %339 = sbr.rel (%p336_p9) target bundleno = 635 (0x27b), region = 55  ;;  %s1950_s24 = sshll.u32 (!%p336_p9), %s342_s13, 9 }
  0x3e   : > { %p375_p10 = scmp.lt.s32.totalorder (!%p336_p9), %s1951_s14, 127  ;;  %s2760_s7 = scalar_lea.vmem (!%p336_p9), [#allocation3], %s1950_s24 }
  0x3f   : > { %p1955_p11 = scmp.ne.s32.totalorder (!%p336_p9), %s2509_s17, 0 }
  0x44   : > { %s3006_s14 = smov (!%p375_p10, %s1951_s14), 127  ;;  %390 = sbr.rel (%p1955_p11) target bundleno = 86 (0x56), region = 63 }
  0x45   : > { %s1952_s25 = sshll.u32 %s3006_s14, 3  ;;  %v2527_v0 = vmov (!%p1955_p11), 0.0  }
  0x46   : > { %s2753_s29 = scalar_lea.vmem %s2990_s2, %s1952_s25  ;;  %s2758_s6 = scalar_lea.vmem %s2992_s4, %s1952_s25  ;;  %391 = vst [vmem:[#allocation2] sm:$0xff] (!%p1955_p11), %v2527_v0  ;;  %392 = vst [vmem:[#allocation2 + $0x8] sm:$0xff] (!%p1955_p11), %v2527_v0 }
  0x47   : > { %393 = vst [vmem:[#allocation2 + $0x10] sm:$0xff] (!%p1955_p11), %v2527_v0  ;;  %394 = vst [vmem:[#allocation2 + $0x18] sm:$0xff] (!%p1955_p11), %v2527_v0 }
  0x48   : > { %395 = vst [vmem:[#allocation2 + $0x20] sm:$0xff] (!%p1955_p11), %v2527_v0  ;;  %396 = vst [vmem:[#allocation2 + $0x28] sm:$0xff] (!%p1955_p11), %v2527_v0 }
  0x49   : > { %397 = vst [vmem:[#allocation2 + $0x30] sm:$0xff] (!%p1955_p11), %v2527_v0  ;;  %398 = vst [vmem:[#allocation2 + $0x38] sm:$0xff] (!%p1955_p11), %v2527_v0 }
  0x4a   : > { %399 = vst [vmem:[#allocation2 + $0x40] sm:$0xff] (!%p1955_p11), %v2527_v0  ;;  %400 = vst [vmem:[#allocation2 + $0x48] sm:$0xff] (!%p1955_p11), %v2527_v0 }
  0x4b   : > { %401 = vst [vmem:[#allocation2 + $0x50] sm:$0xff] %v2527_v0  ;;  %402 = vst [vmem:[#allocation2 + $0x58] sm:$0xff] %v2527_v0 }
  0x4c   : > { %403 = vst [vmem:[#allocation2 + $0x60] sm:$0xff] %v2527_v0  ;;  %404 = vst [vmem:[#allocation2 + $0x68] sm:$0xff] %v2527_v0 }
  0x4d   : > { %405 = vst [vmem:[#allocation2 + $0x70] sm:$0xff] %v2527_v0  ;;  %406 = vst [vmem:[#allocation2 + $0x78] sm:$0xff] %v2527_v0 }
  0x4e   : > { %407 = vst [vmem:[#allocation2 + $0x80] sm:$0xff] %v2527_v0  ;;  %408 = vst [vmem:[#allocation2 + $0x88] sm:$0xff] %v2527_v0 }
  0x4f   : > { %409 = vst [vmem:[#allocation2 + $0x90] sm:$0xff] %v2527_v0  ;;  %410 = vst [vmem:[#allocation2 + $0x98] sm:$0xff] %v2527_v0 }
  0x50   : > { %411 = vst [vmem:[#allocation2 + $0xa0] sm:$0xff] %v2527_v0  ;;  %412 = vst [vmem:[#allocation2 + $0xa8] sm:$0xff] %v2527_v0 }
  0x51   : > { %413 = vst [vmem:[#allocation2 + $0xb0] sm:$0xff] %v2527_v0  ;;  %414 = vst [vmem:[#allocation2 + $0xb8] sm:$0xff] %v2527_v0 }
  0x52   : > { %415 = vst [vmem:[#allocation2 + $0xc0] sm:$0xff] %v2527_v0  ;;  %416 = vst [vmem:[#allocation2 + $0xc8] sm:$0xff] %v2527_v0 }
  0x53   : > { %417 = vst [vmem:[#allocation2 + $0xd0] sm:$0xff] %v2527_v0  ;;  %418 = vst [vmem:[#allocation2 + $0xd8] sm:$0xff] %v2527_v0 }
  0x54   : > { %419 = vst [vmem:[#allocation2 + $0xe0] sm:$0xff] %v2527_v0  ;;  %420 = vst [vmem:[#allocation2 + $0xe8] sm:$0xff] %v2527_v0 }
  0x55   : > { %421 = vst [vmem:[#allocation2 + $0xf0] sm:$0xff] %v2527_v0  ;;  %422 = vst [vmem:[#allocation2 + $0xf8] sm:$0xff] %v2527_v0 }
  0x56 PF: > { %s1956_s15 = sshll.u32 %s2509_s17, 9  ;;  %v2375_v1 = vld [vmem:[%s2760_s7 + $0x4] ss:$16 sps:$4 sm:$0xff]   ;;  %v2378_v2 = vld [vmem:[%s2760_s7 + $0xc] ss:$16 sps:$4 sm:$0xff]   ;;  %p2054_p12 = scmp.ne.s32.totalorder %s2509_s17, 1 }
  0x57   : > { %s520_s18 = sshra.s32 %s1956_s15, 3  ;;  %1132 = vmatprep.mubr.bf16.mxu0 %v2375_v1  ;;  %1293 = vmatprep.mubr.bf16.mxu1 %v2378_v2  ;;  %v2373_v33 = vld [vmem:[%s2760_s7] ss:$16 sps:$4 sm:$0xff]   ;;  %v2376_v36 = vld [vmem:[%s2760_s7 + $0x8] ss:$16 sps:$4 sm:$0xff]  }
  0x58   : > { %s1957_s8 = sshll.u32 %s520_s18, 2  ;;  %v2379_v37 = vld [vmem:[%s2760_s7 + $0x24] ss:$16 sps:$4 sm:$0xff]   ;;  %v2381_v38 = vld [vmem:[%s2760_s7 + $0x2c] ss:$16 sps:$4 sm:$0xff]  }
  0x59   : > { %s2769_s11 = scalar_lea.vmem %s2989_s1, %s1957_s8  ;;  %v2383_v39 = vld [vmem:[%s2760_s7 + $0x20] ss:$16 sps:$4 sm:$0xff]   ;;  %v2384_v40 = vld [vmem:[%s2760_s7 + $0x28] ss:$16 sps:$4 sm:$0xff]   ;;  %v2385_v41 = vld [vmem:[%s2760_s7 + $0x44] ss:$16 sps:$4 sm:$0xff]  }
  0x5a   : > { %v2341_v3 = vld [vmem:[%s2769_s11 + $0x40] sm:$0xff]   ;;  %v2345_v7 = vld [vmem:[%s2769_s11 + $0x48] sm:$0xff]   ;;  %v2349_v11 = vld [vmem:[%s2769_s11 + $0x50] sm:$0xff]  }
  0x5b   : > { %v2342_v4 = vld [vmem:[%s2769_s11 + $0xc0] sm:$0xff]   ;;  %2059 = vmatprep.subr.bf16.mxu0 %v2341_v3  ;;  %v2346_v8 = vld [vmem:[%s2769_s11 + $0xc8] sm:$0xff]   ;;  %v2350_v12 = vld [vmem:[%s2769_s11 + $0xd0] sm:$0xff]  }
  0x5c   : > { %v2343_v5 = vld [vmem:[%s2769_s11] sm:$0xff]   ;;  %2171 = vmatprep.subr.bf16.mxu1 %v2342_v4  ;;  %v2347_v9 = vld [vmem:[%s2769_s11 + $0x8] sm:$0xff]   ;;  %v2351_v13 = vld [vmem:[%s2769_s11 + $0x10] sm:$0xff]  }
  0x5d   : > { %v2344_v6 = vld [vmem:[%s2769_s11 + $0x80] sm:$0xff]   ;;  %2060 = vmatpush3.bf16.msra.mxu0 %v2343_v5  ;;  %v2348_v10 = vld [vmem:[%s2769_s11 + $0x88] sm:$0xff]   ;;  %v2352_v14 = vld [vmem:[%s2769_s11 + $0x90] sm:$0xff]  }
  0x5e   : > { %2172 = vmatpush3.bf16.msra.mxu1 %v2344_v6  ;;  %2061 = vmatprep.subr.bf16.mxu0 %v2345_v7  ;;  %v2353_v15 = vld [vmem:[%s2769_s11 + $0x58] sm:$0xff]   ;;  %v2357_v19 = vld [vmem:[%s2769_s11 + $0x60] sm:$0xff]   ;;  %v2361_v23 = vld [vmem:[%s2769_s11 + $0x68] sm:$0xff]  }
  0x5f   : > { %2173 = vmatprep.subr.bf16.mxu1 %v2346_v8  ;;  %v2354_v16 = vld [vmem:[%s2769_s11 + $0xd8] sm:$0xff]   ;;  %v2358_v20 = vld [vmem:[%s2769_s11 + $0xe0] sm:$0xff]   ;;  %v2362_v24 = vld [vmem:[%s2769_s11 + $0xe8] sm:$0xff]  }
  0x60   : > { %v2355_v17 = vld [vmem:[%s2769_s11 + $0x18] sm:$0xff]   ;;  %v2359_v21 = vld [vmem:[%s2769_s11 + $0x20] sm:$0xff]   ;;  %v2363_v25 = vld [vmem:[%s2769_s11 + $0x28] sm:$0xff]  }
  0x61   : > { %2062 = vmatpush3.bf16.msra.mxu0 %v2347_v9  ;;  %v2356_v18 = vld [vmem:[%s2769_s11 + $0x98] sm:$0xff]   ;;  %v2360_v22 = vld [vmem:[%s2769_s11 + $0xa0] sm:$0xff]   ;;  %v2364_v26 = vld [vmem:[%s2769_s11 + $0xa8] sm:$0xff]  }
  0x62   : > { %2174 = vmatpush3.bf16.msra.mxu1 %v2348_v10  ;;  %2063 = vmatprep.subr.bf16.mxu0 %v2349_v11  ;;  %v2365_v27 = vld [vmem:[%s2769_s11 + $0x70] sm:$0xff]   ;;  %v2369_v31 = vld [vmem:[%s2769_s11 + $0x78] sm:$0xff]  }
  0x63   : > { %2175 = vmatprep.subr.bf16.mxu1 %v2350_v12  ;;  %v2366_v28 = vld [vmem:[%s2769_s11 + $0xf0] sm:$0xff]   ;;  %v2370_v32 = vld [vmem:[%s2769_s11 + $0xf8] sm:$0xff]  }
  0x64   : > { %v2367_v29 = vld [vmem:[%s2769_s11 + $0x30] sm:$0xff]   ;;  %v2371_v34 = vld [vmem:[%s2769_s11 + $0x38] sm:$0xff]  }
  0x65   : > { %2064 = vmatpush3.bf16.msra.mxu0 %v2351_v13  ;;  %v2368_v30 = vld [vmem:[%s2769_s11 + $0xb0] sm:$0xff]   ;;  %v2372_v35 = vld [vmem:[%s2769_s11 + $0xb8] sm:$0xff]  }
  0x66   : > { %2176 = vmatpush3.bf16.msra.mxu1 %v2352_v14  ;;  %2065 = vmatprep.subr.bf16.mxu0 %v2353_v15  ;;  %v2387_v42 = vld [vmem:[%s2760_s7 + $0x4c] ss:$16 sps:$4 sm:$0xff]   ;;  %v2389_v43 = vld [vmem:[%s2760_s7 + $0x40] ss:$16 sps:$4 sm:$0xff]   ;;  %v2390_v44 = vld [vmem:[%s2760_s7 + $0x48] ss:$16 sps:$4 sm:$0xff]  }
  0x67   : > { %2177 = vmatprep.subr.bf16.mxu1 %v2354_v16  ;;  %v2391_v45 = vld [vmem:[%s2760_s7 + $0x64] ss:$16 sps:$4 sm:$0xff]   ;;  %v2393_v46 = vld [vmem:[%s2760_s7 + $0x6c] ss:$16 sps:$4 sm:$0xff]   ;;  %v2395_v47 = vld [vmem:[%s2760_s7 + $0x60] ss:$16 sps:$4 sm:$0xff]  }
  0x68   : > { %v2396_v48 = vld [vmem:[%s2760_s7 + $0x68] ss:$16 sps:$4 sm:$0xff]   ;;  %v2397_v49 = vld [vmem:[%s2760_s7 + $0x84] ss:$16 sps:$4 sm:$0xff]   ;;  %v2399_v50 = vld [vmem:[%s2760_s7 + $0x8c] ss:$16 sps:$4 sm:$0xff]  }
  0x69   : > { %2066 = vmatpush3.bf16.msra.mxu0 %v2355_v17  ;;  %v2401_v51 = vld [vmem:[%s2760_s7 + $0x80] ss:$16 sps:$4 sm:$0xff]   ;;  %v2402_v52 = vld [vmem:[%s2760_s7 + $0x88] ss:$16 sps:$4 sm:$0xff]   ;;  %v2403_v53 = vld [vmem:[%s2760_s7 + $0xa4] ss:$16 sps:$4 sm:$0xff]  }
  0x6a   : > { %2178 = vmatpush3.bf16.msra.mxu1 %v2356_v18  ;;  %2067 = vmatprep.subr.bf16.mxu0 %v2357_v19  ;;  %v2405_v54 = vld [vmem:[%s2760_s7 + $0xac] ss:$16 sps:$4 sm:$0xff]   ;;  %v2407_v55 = vld [vmem:[%s2760_s7 + $0xa0] ss:$16 sps:$4 sm:$0xff]   ;;  %v2408_v56 = vld [vmem:[%s2760_s7 + $0xa8] ss:$16 sps:$4 sm:$0xff]  }
  0x6b   : > { %2179 = vmatprep.subr.bf16.mxu1 %v2358_v20  ;;  %v2409_v57 = vld [vmem:[%s2760_s7 + $0xc4] ss:$16 sps:$4 sm:$0xff]   ;;  %v2411_v58 = vld [vmem:[%s2760_s7 + $0xcc] ss:$16 sps:$4 sm:$0xff]   ;;  %v2413_v59 = vld [vmem:[%s2760_s7 + $0xc0] ss:$16 sps:$4 sm:$0xff]  }
  0x6c   : > { %v2414_v60 = vld [vmem:[%s2760_s7 + $0xc8] ss:$16 sps:$4 sm:$0xff]   ;;  %v2415_v61 = vld [vmem:[%s2760_s7 + $0xe4] ss:$16 sps:$4 sm:$0xff]   ;;  %v2417_v62 = vld [vmem:[%s2760_s7 + $0xec] ss:$16 sps:$4 sm:$0xff]  }
  0x6d   : > { %2068 = vmatpush3.bf16.msra.mxu0 %v2359_v21  ;;  %v2419_v63 = vld [vmem:[%s2760_s7 + $0xe0] ss:$16 sps:$4 sm:$0xff]   ;;  %v2420_v0 = vld [vmem:[%s2760_s7 + $0xe8] ss:$16 sps:$4 sm:$0xff]   ;;  %v2421_v1 = vld [vmem:[%s2760_s7 + $0x104] ss:$16 sps:$4 sm:$0xff]  }
  0x6e   : > { %2180 = vmatpush3.bf16.msra.mxu1 %v2360_v22  ;;  %2069 = vmatprep.subr.bf16.mxu0 %v2361_v23  ;;  %v2423_v2 = vld [vmem:[%s2760_s7 + $0x10c] ss:$16 sps:$4 sm:$0xff]   ;;  %v2425_v3 = vld [vmem:[%s2760_s7 + $0x100] ss:$16 sps:$4 sm:$0xff]   ;;  %v2426_v4 = vld [vmem:[%s2760_s7 + $0x108] ss:$16 sps:$4 sm:$0xff]  }
  0x6f   : > { %2181 = vmatprep.subr.bf16.mxu1 %v2362_v24  ;;  %v2427_v5 = vld [vmem:[%s2760_s7 + $0x124] ss:$16 sps:$4 sm:$0xff]   ;;  %v2429_v6 = vld [vmem:[%s2760_s7 + $0x12c] ss:$16 sps:$4 sm:$0xff]   ;;  %v2431_v7 = vld [vmem:[%s2760_s7 + $0x120] ss:$16 sps:$4 sm:$0xff]  }
  0x70   : > { %v2432_v8 = vld [vmem:[%s2760_s7 + $0x128] ss:$16 sps:$4 sm:$0xff]   ;;  %v2433_v9 = vld [vmem:[%s2760_s7 + $0x144] ss:$16 sps:$4 sm:$0xff]   ;;  %v2435_v10 = vld [vmem:[%s2760_s7 + $0x14c] ss:$16 sps:$4 sm:$0xff]  }
  0x71   : > { %2070 = vmatpush3.bf16.msra.mxu0 %v2363_v25  ;;  %v2437_v11 = vld [vmem:[%s2760_s7 + $0x140] ss:$16 sps:$4 sm:$0xff]   ;;  %v2438_v12 = vld [vmem:[%s2760_s7 + $0x148] ss:$16 sps:$4 sm:$0xff]   ;;  %v2439_v13 = vld [vmem:[%s2760_s7 + $0x164] ss:$16 sps:$4 sm:$0xff]  }
  0x72   : > { %2182 = vmatpush3.bf16.msra.mxu1 %v2364_v26  ;;  %2071 = vmatprep.subr.bf16.mxu0 %v2365_v27  ;;  %v2441_v14 = vld [vmem:[%s2760_s7 + $0x16c] ss:$16 sps:$4 sm:$0xff]   ;;  %v2443_v15 = vld [vmem:[%s2760_s7 + $0x160] ss:$16 sps:$4 sm:$0xff]   ;;  %v2444_v16 = vld [vmem:[%s2760_s7 + $0x168] ss:$16 sps:$4 sm:$0xff]  }
  0x73   : > { %2183 = vmatprep.subr.bf16.mxu1 %v2366_v28  ;;  %v2445_v17 = vld [vmem:[%s2760_s7 + $0x184] ss:$16 sps:$4 sm:$0xff]   ;;  %v2447_v18 = vld [vmem:[%s2760_s7 + $0x18c] ss:$16 sps:$4 sm:$0xff]   ;;  %v2449_v19 = vld [vmem:[%s2760_s7 + $0x180] ss:$16 sps:$4 sm:$0xff]  }
  0x74   : > { %v2450_v20 = vld [vmem:[%s2760_s7 + $0x188] ss:$16 sps:$4 sm:$0xff]   ;;  %v2451_v21 = vld [vmem:[%s2760_s7 + $0x1a4] ss:$16 sps:$4 sm:$0xff]   ;;  %v2453_v22 = vld [vmem:[%s2760_s7 + $0x1ac] ss:$16 sps:$4 sm:$0xff]  }
  0x75   : > { %2072 = vmatpush3.bf16.msra.mxu0 %v2367_v29  ;;  %v2455_v23 = vld [vmem:[%s2760_s7 + $0x1a0] ss:$16 sps:$4 sm:$0xff]   ;;  %v2456_v24 = vld [vmem:[%s2760_s7 + $0x1a8] ss:$16 sps:$4 sm:$0xff]   ;;  %v2457_v25 = vld [vmem:[%s2760_s7 + $0x1c4] ss:$16 sps:$4 sm:$0xff]  }
  0x76   : > { %2184 = vmatpush3.bf16.msra.mxu1 %v2368_v30  ;;  %2073 = vmatprep.subr.bf16.mxu0 %v2369_v31  ;;  %v2459_v26 = vld [vmem:[%s2760_s7 + $0x1cc] ss:$16 sps:$4 sm:$0xff]   ;;  %v2461_v27 = vld [vmem:[%s2760_s7 + $0x1c0] ss:$16 sps:$4 sm:$0xff]   ;;  %v2462_v28 = vld [vmem:[%s2760_s7 + $0x1c8] ss:$16 sps:$4 sm:$0xff]  }
  0x77   : > { %2185 = vmatprep.subr.bf16.mxu1 %v2370_v32  ;;  %v2463_v29 = vld [vmem:[%s2760_s7 + $0x1e4] ss:$16 sps:$4 sm:$0xff]   ;;  %v2465_v30 = vld [vmem:[%s2760_s7 + $0x1ec] ss:$16 sps:$4 sm:$0xff]   ;;  %v2467_v31 = vld [vmem:[%s2760_s7 + $0x1e0] ss:$16 sps:$4 sm:$0xff]  }
  0x78   : > { %v2468_v32 = vld [vmem:[%s2760_s7 + $0x1e8] ss:$16 sps:$4 sm:$0xff]  }
  0x79   : > { %2074 = vmatpush3.bf16.msra.mxu0 %v2371_v34 }
  0x7a   : > { %2186 = vmatpush3.bf16.msra.mxu1 %v2372_v35 }
  0x7c   : > { %1133 = vmatmul.mubr.bf16.vlgmr.msra.gmra.mrb[0].mxu0 %v2373_v33 }
  0x7d   : > { %1294 = vmatmul.mubr.bf16.vlgmr.msra.gmra.mrb[0].mxu1 %v2376_v36  ;;  %1140 = vmatprep.mubr.bf16.mxu0 %v2379_v37 }
  0x7e   : > { %1301 = vmatprep.mubr.bf16.mxu1 %v2381_v38 }
  0x84   : > { %1141 = vmatmul.mubr.bf16.gmra.mrb[4].mxu0 %v2383_v39 }
  0x85   : > { %1302 = vmatmul.mubr.bf16.gmra.mrb[4].mxu1 %v2384_v40  ;;  %1148 = vmatprep.mubr.bf16.mxu0 %v2385_v41 }
  0x86   : > { %1309 = vmatprep.mubr.bf16.mxu1 %v2387_v42  ;;  %v424_v42 = vld [vmem:[#allocation2] sm:$0xff] }
  0x8c   : > { %1149 = vmatmul.mubr.bf16.gmra.mrb[8].mxu0 %v2389_v43 }
  0x8d   : > { %1310 = vmatmul.mubr.bf16.gmra.mrb[8].mxu1 %v2390_v44  ;;  %1156 = vmatprep.mubr.bf16.mxu0 %v2391_v45 }
  0x8e   : > { %1317 = vmatprep.mubr.bf16.mxu1 %v2393_v46 }
  0x94   : > { %1157 = vmatmul.mubr.bf16.gmra.mrb[12].mxu0 %v2395_v47  ;;  %v425_v47 = vld [vmem:[#allocation2 + $0x8] sm:$0xff] }
  0x95   : > { %1318 = vmatmul.mubr.bf16.gmra.mrb[12].mxu1 %v2396_v48  ;;  %1164 = vmatprep.mubr.bf16.mxu0 %v2397_v49 }
  0x96   : > { %1325 = vmatprep.mubr.bf16.mxu1 %v2399_v50 }
  0x9c   : > { %1165 = vmatmul.mubr.bf16.gmra.mrb[16].mxu0 %v2401_v51 }
  0x9d   : > { %1326 = vmatmul.mubr.bf16.gmra.mrb[16].mxu1 %v2402_v52  ;;  %1172 = vmatprep.mubr.bf16.mxu0 %v2403_v53 }
  0x9e   : > { %1333 = vmatprep.mubr.bf16.mxu1 %v2405_v54 }
  0xa4   : > { %1173 = vmatmul.mubr.bf16.gmra.mrb[20].mxu0 %v2407_v55 }
  0xa5   : > { %1334 = vmatmul.mubr.bf16.gmra.mrb[20].mxu1 %v2408_v56  ;;  %1180 = vmatprep.mubr.bf16.mxu0 %v2409_v57 }
  0xa6   : > { %1341 = vmatprep.mubr.bf16.mxu1 %v2411_v58 }
  0xac   : > { %1181 = vmatmul.mubr.bf16.gmra.mrb[24].mxu0 %v2413_v59 }
  0xad   : > { %1342 = vmatmul.mubr.bf16.gmra.mrb[24].mxu1 %v2414_v60  ;;  %1188 = vmatprep.mubr.bf16.mxu0 %v2415_v61  ;;  %v426_v60 = vld [vmem:[#allocation2 + $0x10] sm:$0xff] }
  0xae   : > { %1349 = vmatprep.mubr.bf16.mxu1 %v2417_v62 }
  0xb4   : > { %1189 = vmatmul.mubr.bf16.gmra.mrb[28].mxu0 %v2419_v63 }
  0xb5   : > { %1350 = vmatmul.mubr.bf16.gmra.mrb[28].mxu1 %v2420_v0  ;;  %1196 = vmatprep.mubr.bf16.mxu0 %v2421_v1  ;;  %v427_v1 = vld [vmem:[#allocation2 + $0x18] sm:$0xff] }
  0xb6   : > { %1357 = vmatprep.mubr.bf16.mxu1 %v2423_v2 }
  0xbc   : > { %1197 = vmatmul.mubr.bf16.gmra.mrb[32].mxu0 %v2425_v3 }
  0xbd   : > { %1358 = vmatmul.mubr.bf16.gmra.mrb[32].mxu1 %v2426_v4  ;;  %1204 = vmatprep.mubr.bf16.mxu0 %v2427_v5 }
  0xbe   : > { %1365 = vmatprep.mubr.bf16.mxu1 %v2429_v6 }
  0xc4   : > { %1205 = vmatmul.mubr.bf16.gmra.mrb[36].mxu0 %v2431_v7 }
  0xc5   : > { %1366 = vmatmul.mubr.bf16.gmra.mrb[36].mxu1 %v2432_v8  ;;  %1212 = vmatprep.mubr.bf16.mxu0 %v2433_v9 }
  0xc6   : > { %1373 = vmatprep.mubr.bf16.mxu1 %v2435_v10 }
  0xcc   : > { %1213 = vmatmul.mubr.bf16.gmra.mrb[40].mxu0 %v2437_v11 }
  0xcd   : > { %1374 = vmatmul.mubr.bf16.gmra.mrb[40].mxu1 %v2438_v12  ;;  %1220 = vmatprep.mubr.bf16.mxu0 %v2439_v13 }
  0xce   : > { %1381 = vmatprep.mubr.bf16.mxu1 %v2441_v14  ;;  %v428_v14 = vld [vmem:[#allocation2 + $0x20] sm:$0xff] }
  0xd4   : > { %1221 = vmatmul.mubr.bf16.gmra.mrb[44].mxu0 %v2443_v15 }
  0xd5   : > { %1382 = vmatmul.mubr.bf16.gmra.mrb[44].mxu1 %v2444_v16  ;;  %1228 = vmatprep.mubr.bf16.mxu0 %v2445_v17 }
  0xd6   : > { %1389 = vmatprep.mubr.bf16.mxu1 %v2447_v18 }
  0xdc   : > { %1229 = vmatmul.mubr.bf16.gmra.mrb[48].mxu0 %v2449_v19  ;;  %v429_v19 = vld [vmem:[#allocation2 + $0x28] sm:$0xff] }
  0xdd   : > { %1390 = vmatmul.mubr.bf16.gmra.mrb[48].mxu1 %v2450_v20  ;;  %1236 = vmatprep.mubr.bf16.mxu0 %v2451_v21 }
  0xde   : > { %1397 = vmatprep.mubr.bf16.mxu1 %v2453_v22 }
  0xe4   : > { %1237 = vmatmul.mubr.bf16.gmra.mrb[52].mxu0 %v2455_v23 }
  0xe5   : > { %1398 = vmatmul.mubr.bf16.gmra.mrb[52].mxu1 %v2456_v24  ;;  %1244 = vmatprep.mubr.bf16.mxu0 %v2457_v25 }
  0xe6   : > { %1405 = vmatprep.mubr.bf16.mxu1 %v2459_v26 }
  0xec   : > { %1245 = vmatmul.mubr.bf16.gmra.mrb[56].mxu0 %v2461_v27 }
  0xed   : > { %1406 = vmatmul.mubr.bf16.gmra.mrb[56].mxu1 %v2462_v28  ;;  %1252 = vmatprep.mubr.bf16.mxu0 %v2463_v29 }
  0xee   : > { %1413 = vmatprep.mubr.bf16.mxu1 %v2465_v30 }
  0xf4   : > { %1253 = vmatmul.mubr.bf16.gmra.mrb[60].mxu0 %v2467_v31 }
  0xf5   : > { %1414 = vmatmul.mubr.bf16.gmra.mrb[60].mxu1 %v2468_v32  ;;  %v430_v32 = vld [vmem:[#allocation2 + $0x30] sm:$0xff] }
 0x14f   : > { %v2075_v33 = vpop.f32.mrb[0].mxu0 }
 0x150   : > { %v2187_v34 = vpop.f32.mrb[0].mxu1  ;;  %v2076_v35 = vpop.f32.mrb[1].mxu0 }
 0x151   : > { %v2077_v36 = vadd.f32 %v2076_v35, %v2075_v33  ;;  %v2188_v37 = vpop.f32.mrb[1].mxu1  ;;  %v2078_v38 = vpop.f32.mrb[2].mxu0 }
 0x152   : > { %v2189_v39 = vadd.f32 %v2188_v37, %v2187_v34  ;;  %v2190_v40 = vpop.f32.mrb[2].mxu1  ;;  %v2079_v41 = vpop.f32.mrb[3].mxu0  ;;  %v431_v37 = vld [vmem:[#allocation2 + $0x38] sm:$0xff] }
 0x153   : > { %v2080_v43 = vadd.f32 %v2079_v41, %v2078_v38  ;;  %v2191_v44 = vpop.f32.mrb[3].mxu1 }
 0x154   : > { %v1296_v45 = vadd.f32 %v2189_v39, %v2077_v36  ;;  %v2192_v46 = vadd.f32 %v2191_v44, %v2190_v40 }
 0x156   : > { %v1422_v48 = vadd.f32 %v1296_v45, %v424_v42  ;;  %v1299_v49 = vadd.f32 %v2192_v46, %v2080_v43 }
 0x157   : > { %v2081_v50 = vpop.f32.mrb[4].mxu0 }
 0x158   : > { %1454 = vst [vmem:[#allocation2] sm:$0xff] %v1422_v48  ;;  %v1423_v51 = vadd.f32 %v1299_v49, %v425_v47  ;;  %v2193_v52 = vpop.f32.mrb[4].mxu1  ;;  %v2082_v53 = vpop.f32.mrb[5].mxu0 }
 0x159   : > { %v2083_v54 = vadd.f32 %v2082_v53, %v2081_v50  ;;  %v2194_v55 = vpop.f32.mrb[5].mxu1  ;;  %v2084_v56 = vpop.f32.mrb[6].mxu0  ;;  %v432_v50 = vld [vmem:[#allocation2 + $0x40] sm:$0xff] }
 0x15a   : > { %1455 = vst [vmem:[#allocation2 + $0x8] sm:$0xff] %v1423_v51  ;;  %v2195_v57 = vadd.f32 %v2194_v55, %v2193_v52  ;;  %v2196_v58 = vpop.f32.mrb[6].mxu1  ;;  %v2085_v59 = vpop.f32.mrb[7].mxu0  ;;  %v433_v55 = vld [vmem:[#allocation2 + $0x48] sm:$0xff] }
 0x15b   : > { %v2086_v61 = vadd.f32 %v2085_v59, %v2084_v56  ;;  %v2197_v62 = vpop.f32.mrb[7].mxu1 }
 0x15c   : > { %v1304_v63 = vadd.f32 %v2195_v57, %v2083_v54  ;;  %v2198_v0 = vadd.f32 %v2197_v62, %v2196_v58 }
 0x15e   : > { %v1424_v2 = vadd.f32 %v1304_v63, %v426_v60  ;;  %v1307_v3 = vadd.f32 %v2198_v0, %v2086_v61 }
 0x15f   : > { %v2087_v4 = vpop.f32.mrb[8].mxu0 }
 0x160   : > { %1456 = vst [vmem:[#allocation2 + $0x10] sm:$0xff] %v1424_v2  ;;  %v1425_v5 = vadd.f32 %v1307_v3, %v427_v1  ;;  %v2199_v6 = vpop.f32.mrb[8].mxu1  ;;  %v2088_v7 = vpop.f32.mrb[9].mxu0 }
 0x161   : > { %v2089_v8 = vadd.f32 %v2088_v7, %v2087_v4  ;;  %v2200_v9 = vpop.f32.mrb[9].mxu1  ;;  %v2090_v10 = vpop.f32.mrb[10].mxu0  ;;  %v434_v4 = vld [vmem:[#allocation2 + $0x50] sm:$0xff] }
 0x162   : > { %1457 = vst [vmem:[#allocation2 + $0x18] sm:$0xff] %v1425_v5  ;;  %v2201_v11 = vadd.f32 %v2200_v9, %v2199_v6  ;;  %v2202_v12 = vpop.f32.mrb[10].mxu1  ;;  %v2091_v13 = vpop.f32.mrb[11].mxu0  ;;  %v435_v9 = vld [vmem:[#allocation2 + $0x58] sm:$0xff] }
 0x163   : > { %v2092_v15 = vadd.f32 %v2091_v13, %v2090_v10  ;;  %v2203_v16 = vpop.f32.mrb[11].mxu1 }
 0x164   : > { %v1312_v17 = vadd.f32 %v2201_v11, %v2089_v8  ;;  %v2204_v18 = vadd.f32 %v2203_v16, %v2202_v12 }
 0x166   : > { %v1426_v20 = vadd.f32 %v1312_v17, %v428_v14  ;;  %v1315_v21 = vadd.f32 %v2204_v18, %v2092_v15 }
 0x167   : > { %v2093_v22 = vpop.f32.mrb[12].mxu0 }
 0x168   : > { %1458 = vst [vmem:[#allocation2 + $0x20] sm:$0xff] %v1426_v20  ;;  %v1427_v23 = vadd.f32 %v1315_v21, %v429_v19  ;;  %v2205_v24 = vpop.f32.mrb[12].mxu1  ;;  %v2094_v25 = vpop.f32.mrb[13].mxu0 }
 0x169   : > { %v2095_v26 = vadd.f32 %v2094_v25, %v2093_v22  ;;  %v2206_v27 = vpop.f32.mrb[13].mxu1  ;;  %v2096_v28 = vpop.f32.mrb[14].mxu0  ;;  %v436_v22 = vld [vmem:[#allocation2 + $0x60] sm:$0xff] }
 0x16a   : > { %1459 = vst [vmem:[#allocation2 + $0x28] sm:$0xff] %v1427_v23  ;;  %v2207_v29 = vadd.f32 %v2206_v27, %v2205_v24  ;;  %v2208_v30 = vpop.f32.mrb[14].mxu1  ;;  %v2097_v31 = vpop.f32.mrb[15].mxu0  ;;  %v437_v27 = vld [vmem:[#allocation2 + $0x68] sm:$0xff] }
 0x16b   : > { %v2098_v33 = vadd.f32 %v2097_v31, %v2096_v28  ;;  %v2209_v34 = vpop.f32.mrb[15].mxu1 }
 0x16c   : > { %v1320_v35 = vadd.f32 %v2207_v29, %v2095_v26  ;;  %v2210_v36 = vadd.f32 %v2209_v34, %v2208_v30 }
 0x16e   : > { %v1428_v38 = vadd.f32 %v1320_v35, %v430_v32  ;;  %v1323_v39 = vadd.f32 %v2210_v36, %v2098_v33 }
 0x16f   : > { %v2099_v40 = vpop.f32.mrb[16].mxu0 }
 0x170   : > { %1460 = vst [vmem:[#allocation2 + $0x30] sm:$0xff] %v1428_v38  ;;  %v1429_v41 = vadd.f32 %v1323_v39, %v431_v37  ;;  %v2211_v42 = vpop.f32.mrb[16].mxu1  ;;  %v2100_v43 = vpop.f32.mrb[17].mxu0 }
 0x171   : > { %v2101_v44 = vadd.f32 %v2100_v43, %v2099_v40  ;;  %v2212_v45 = vpop.f32.mrb[17].mxu1  ;;  %v2102_v46 = vpop.f32.mrb[18].mxu0  ;;  %v438_v40 = vld [vmem:[#allocation2 + $0x70] sm:$0xff] }
 0x172   : > { %1461 = vst [vmem:[#allocation2 + $0x38] sm:$0xff] %v1429_v41  ;;  %v2213_v47 = vadd.f32 %v2212_v45, %v2211_v42  ;;  %v2214_v48 = vpop.f32.mrb[18].mxu1  ;;  %v2103_v49 = vpop.f32.mrb[19].mxu0  ;;  %v439_v45 = vld [vmem:[#allocation2 + $0x78] sm:$0xff] }
 0x173   : > { %v2104_v51 = vadd.f32 %v2103_v49, %v2102_v46  ;;  %v2215_v52 = vpop.f32.mrb[19].mxu1 }
 0x174   : > { %v1328_v53 = vadd.f32 %v2213_v47, %v2101_v44  ;;  %v2216_v54 = vadd.f32 %v2215_v52, %v2214_v48 }
 0x176   : > { %v1430_v56 = vadd.f32 %v1328_v53, %v432_v50  ;;  %v1331_v57 = vadd.f32 %v2216_v54, %v2104_v51 }
 0x177   : > { %v2105_v58 = vpop.f32.mrb[20].mxu0 }
 0x178   : > { %1462 = vst [vmem:[#allocation2 + $0x40] sm:$0xff] %v1430_v56  ;;  %v1431_v59 = vadd.f32 %v1331_v57, %v433_v55  ;;  %v2217_v60 = vpop.f32.mrb[20].mxu1  ;;  %v2106_v61 = vpop.f32.mrb[21].mxu0 }
 0x179   : > { %v2107_v62 = vadd.f32 %v2106_v61, %v2105_v58  ;;  %v2218_v63 = vpop.f32.mrb[21].mxu1  ;;  %v2108_v0 = vpop.f32.mrb[22].mxu0  ;;  %v440_v58 = vld [vmem:[#allocation2 + $0x80] sm:$0xff] }
 0x17a   : > { %1463 = vst [vmem:[#allocation2 + $0x48] sm:$0xff] %v1431_v59  ;;  %v2219_v1 = vadd.f32 %v2218_v63, %v2217_v60  ;;  %v2220_v2 = vpop.f32.mrb[22].mxu1  ;;  %v2109_v3 = vpop.f32.mrb[23].mxu0  ;;  %v441_v63 = vld [vmem:[#allocation2 + $0x88] sm:$0xff] }
 0x17b   : > { %v2110_v5 = vadd.f32 %v2109_v3, %v2108_v0  ;;  %v2221_v6 = vpop.f32.mrb[23].mxu1 }
 0x17c   : > { %v1336_v7 = vadd.f32 %v2219_v1, %v2107_v62  ;;  %v2222_v8 = vadd.f32 %v2221_v6, %v2220_v2 }
 0x17e   : > { %v1432_v10 = vadd.f32 %v1336_v7, %v434_v4  ;;  %v1339_v11 = vadd.f32 %v2222_v8, %v2110_v5 }
 0x17f   : > { %v2111_v12 = vpop.f32.mrb[24].mxu0 }
 0x180   : > { %1464 = vst [vmem:[#allocation2 + $0x50] sm:$0xff] %v1432_v10  ;;  %v1433_v13 = vadd.f32 %v1339_v11, %v435_v9  ;;  %v2223_v14 = vpop.f32.mrb[24].mxu1  ;;  %v2112_v15 = vpop.f32.mrb[25].mxu0 }
 0x181   : > { %v2113_v16 = vadd.f32 %v2112_v15, %v2111_v12  ;;  %v2224_v17 = vpop.f32.mrb[25].mxu1  ;;  %v2114_v18 = vpop.f32.mrb[26].mxu0  ;;  %v442_v12 = vld [vmem:[#allocation2 + $0x90] sm:$0xff] }
 0x182   : > { %1465 = vst [vmem:[#allocation2 + $0x58] sm:$0xff] %v1433_v13  ;;  %v2225_v19 = vadd.f32 %v2224_v17, %v2223_v14  ;;  %v2226_v20 = vpop.f32.mrb[26].mxu1  ;;  %v2115_v21 = vpop.f32.mrb[27].mxu0  ;;  %v443_v17 = vld [vmem:[#allocation2 + $0x98] sm:$0xff] }
 0x183   : > { %v2116_v23 = vadd.f32 %v2115_v21, %v2114_v18  ;;  %v2227_v24 = vpop.f32.mrb[27].mxu1 }
 0x184   : > { %v1344_v25 = vadd.f32 %v2225_v19, %v2113_v16  ;;  %v2228_v26 = vadd.f32 %v2227_v24, %v2226_v20 }
 0x186   : > { %v1434_v28 = vadd.f32 %v1344_v25, %v436_v22  ;;  %v1347_v29 = vadd.f32 %v2228_v26, %v2116_v23 }
 0x187   : > { %v2117_v30 = vpop.f32.mrb[28].mxu0 }
 0x188   : > { %1466 = vst [vmem:[#allocation2 + $0x60] sm:$0xff] %v1434_v28  ;;  %v1435_v31 = vadd.f32 %v1347_v29, %v437_v27  ;;  %v2229_v32 = vpop.f32.mrb[28].mxu1  ;;  %v2118_v33 = vpop.f32.mrb[29].mxu0 }
 0x189   : > { %v2119_v34 = vadd.f32 %v2118_v33, %v2117_v30  ;;  %v2230_v35 = vpop.f32.mrb[29].mxu1  ;;  %v2120_v36 = vpop.f32.mrb[30].mxu0  ;;  %v444_v30 = vld [vmem:[#allocation2 + $0xa0] sm:$0xff] }
 0x18a   : > { %1467 = vst [vmem:[#allocation2 + $0x68] sm:$0xff] %v1435_v31  ;;  %v2231_v37 = vadd.f32 %v2230_v35, %v2229_v32  ;;  %v2232_v38 = vpop.f32.mrb[30].mxu1  ;;  %v2121_v39 = vpop.f32.mrb[31].mxu0  ;;  %v445_v35 = vld [vmem:[#allocation2 + $0xa8] sm:$0xff] }
 0x18b   : > { %v2122_v41 = vadd.f32 %v2121_v39, %v2120_v36  ;;  %v2233_v42 = vpop.f32.mrb[31].mxu1 }
 0x18c   : > { %v1352_v43 = vadd.f32 %v2231_v37, %v2119_v34  ;;  %v2234_v44 = vadd.f32 %v2233_v42, %v2232_v38 }
 0x18e   : > { %v1436_v46 = vadd.f32 %v1352_v43, %v438_v40  ;;  %v1355_v47 = vadd.f32 %v2234_v44, %v2122_v41 }
 0x18f   : > { %v2123_v48 = vpop.f32.mrb[32].mxu0 }
 0x190   : > { %1468 = vst [vmem:[#allocation2 + $0x70] sm:$0xff] %v1436_v46  ;;  %v1437_v49 = vadd.f32 %v1355_v47, %v439_v45  ;;  %v2235_v50 = vpop.f32.mrb[32].mxu1  ;;  %v2124_v51 = vpop.f32.mrb[33].mxu0 }
 0x191   : > { %v2125_v52 = vadd.f32 %v2124_v51, %v2123_v48  ;;  %v2236_v53 = vpop.f32.mrb[33].mxu1  ;;  %v2126_v54 = vpop.f32.mrb[34].mxu0  ;;  %v446_v48 = vld [vmem:[#allocation2 + $0xb0] sm:$0xff] }
 0x192   : > { %1469 = vst [vmem:[#allocation2 + $0x78] sm:$0xff] %v1437_v49  ;;  %v2237_v55 = vadd.f32 %v2236_v53, %v2235_v50  ;;  %v2238_v56 = vpop.f32.mrb[34].mxu1  ;;  %v2127_v57 = vpop.f32.mrb[35].mxu0  ;;  %v447_v53 = vld [vmem:[#allocation2 + $0xb8] sm:$0xff] }
 0x193   : > { %v2128_v59 = vadd.f32 %v2127_v57, %v2126_v54  ;;  %v2239_v60 = vpop.f32.mrb[35].mxu1 }
 0x194   : > { %v1360_v61 = vadd.f32 %v2237_v55, %v2125_v52  ;;  %v2240_v62 = vadd.f32 %v2239_v60, %v2238_v56 }
 0x196   : > { %v1438_v0 = vadd.f32 %v1360_v61, %v440_v58  ;;  %v1363_v1 = vadd.f32 %v2240_v62, %v2128_v59 }
 0x197   : > { %v2129_v2 = vpop.f32.mrb[36].mxu0 }
 0x198   : > { %1470 = vst [vmem:[#allocation2 + $0x80] sm:$0xff] %v1438_v0  ;;  %v1439_v3 = vadd.f32 %v1363_v1, %v441_v63  ;;  %v2241_v4 = vpop.f32.mrb[36].mxu1  ;;  %v2130_v5 = vpop.f32.mrb[37].mxu0 }
 0x199   : > { %v2131_v6 = vadd.f32 %v2130_v5, %v2129_v2  ;;  %v2242_v7 = vpop.f32.mrb[37].mxu1  ;;  %v2132_v8 = vpop.f32.mrb[38].mxu0  ;;  %v448_v2 = vld [vmem:[#allocation2 + $0xc0] sm:$0xff] }
 0x19a   : > { %1471 = vst [vmem:[#allocation2 + $0x88] sm:$0xff] %v1439_v3  ;;  %v2243_v9 = vadd.f32 %v2242_v7, %v2241_v4  ;;  %v2244_v10 = vpop.f32.mrb[38].mxu1  ;;  %v2133_v11 = vpop.f32.mrb[39].mxu0  ;;  %v449_v7 = vld [vmem:[#allocation2 + $0xc8] sm:$0xff] }
 0x19b   : > { %v2134_v13 = vadd.f32 %v2133_v11, %v2132_v8  ;;  %v2245_v14 = vpop.f32.mrb[39].mxu1 }
 0x19c   : > { %v1368_v15 = vadd.f32 %v2243_v9, %v2131_v6  ;;  %v2246_v16 = vadd.f32 %v2245_v14, %v2244_v10 }
 0x19e   : > { %v1440_v18 = vadd.f32 %v1368_v15, %v442_v12  ;;  %v1371_v19 = vadd.f32 %v2246_v16, %v2134_v13 }
 0x19f   : > { %v2135_v20 = vpop.f32.mrb[40].mxu0 }
 0x1a0   : > { %1472 = vst [vmem:[#allocation2 + $0x90] sm:$0xff] %v1440_v18  ;;  %v1441_v21 = vadd.f32 %v1371_v19, %v443_v17  ;;  %v2247_v22 = vpop.f32.mrb[40].mxu1  ;;  %v2136_v23 = vpop.f32.mrb[41].mxu0 }
 0x1a1   : > { %v2137_v24 = vadd.f32 %v2136_v23, %v2135_v20  ;;  %v2248_v25 = vpop.f32.mrb[41].mxu1  ;;  %v2138_v26 = vpop.f32.mrb[42].mxu0  ;;  %v450_v20 = vld [vmem:[#allocation2 + $0xd0] sm:$0xff] }
 0x1a2   : > { %1473 = vst [vmem:[#allocation2 + $0x98] sm:$0xff] %v1441_v21  ;;  %v2249_v27 = vadd.f32 %v2248_v25, %v2247_v22  ;;  %v2250_v28 = vpop.f32.mrb[42].mxu1  ;;  %v2139_v29 = vpop.f32.mrb[43].mxu0  ;;  %v451_v25 = vld [vmem:[#allocation2 + $0xd8] sm:$0xff] }
 0x1a3   : > { %v2140_v31 = vadd.f32 %v2139_v29, %v2138_v26  ;;  %v2251_v32 = vpop.f32.mrb[43].mxu1 }
 0x1a4   : > { %v1376_v33 = vadd.f32 %v2249_v27, %v2137_v24  ;;  %v2252_v34 = vadd.f32 %v2251_v32, %v2250_v28 }
 0x1a6   : > { %v1442_v36 = vadd.f32 %v1376_v33, %v444_v30  ;;  %v1379_v37 = vadd.f32 %v2252_v34, %v2140_v31 }
 0x1a7   : > { %v2141_v38 = vpop.f32.mrb[44].mxu0 }
 0x1a8   : > { %1474 = vst [vmem:[#allocation2 + $0xa0] sm:$0xff] %v1442_v36  ;;  %v1443_v39 = vadd.f32 %v1379_v37, %v445_v35  ;;  %v2253_v40 = vpop.f32.mrb[44].mxu1  ;;  %v2142_v41 = vpop.f32.mrb[45].mxu0 }
 0x1a9   : > { %v2143_v42 = vadd.f32 %v2142_v41, %v2141_v38  ;;  %v2254_v43 = vpop.f32.mrb[45].mxu1  ;;  %v2144_v44 = vpop.f32.mrb[46].mxu0  ;;  %v452_v38 = vld [vmem:[#allocation2 + $0xe0] sm:$0xff] }
 0x1aa   : > { %1475 = vst [vmem:[#allocation2 + $0xa8] sm:$0xff] %v1443_v39  ;;  %v2255_v45 = vadd.f32 %v2254_v43, %v2253_v40  ;;  %v2256_v46 = vpop.f32.mrb[46].mxu1  ;;  %v2145_v47 = vpop.f32.mrb[47].mxu0  ;;  %v453_v43 = vld [vmem:[#allocation2 + $0xe8] sm:$0xff] }
 0x1ab   : > { %v2146_v49 = vadd.f32 %v2145_v47, %v2144_v44  ;;  %v2257_v50 = vpop.f32.mrb[47].mxu1 }
 0x1ac   : > { %v1384_v51 = vadd.f32 %v2255_v45, %v2143_v42  ;;  %v2258_v52 = vadd.f32 %v2257_v50, %v2256_v46 }
 0x1ae   : > { %v1444_v54 = vadd.f32 %v1384_v51, %v446_v48  ;;  %v1387_v55 = vadd.f32 %v2258_v52, %v2146_v49 }
 0x1af   : > { %v2147_v56 = vpop.f32.mrb[48].mxu0 }
 0x1b0   : > { %1476 = vst [vmem:[#allocation2 + $0xb0] sm:$0xff] %v1444_v54  ;;  %v1445_v57 = vadd.f32 %v1387_v55, %v447_v53  ;;  %v2259_v58 = vpop.f32.mrb[48].mxu1  ;;  %v2148_v59 = vpop.f32.mrb[49].mxu0 }
 0x1b1   : > { %v2149_v60 = vadd.f32 %v2148_v59, %v2147_v56  ;;  %v2260_v61 = vpop.f32.mrb[49].mxu1  ;;  %v2150_v62 = vpop.f32.mrb[50].mxu0  ;;  %v454_v56 = vld [vmem:[#allocation2 + $0xf0] sm:$0xff] }
 0x1b2   : > { %1477 = vst [vmem:[#allocation2 + $0xb8] sm:$0xff] %v1445_v57  ;;  %v2261_v63 = vadd.f32 %v2260_v61, %v2259_v58  ;;  %v2262_v0 = vpop.f32.mrb[50].mxu1  ;;  %v2151_v1 = vpop.f32.mrb[51].mxu0  ;;  %v455_v61 = vld [vmem:[#allocation2 + $0xf8] sm:$0xff] }
 0x1b3   : > { %v2152_v3 = vadd.f32 %v2151_v1, %v2150_v62  ;;  %v2263_v4 = vpop.f32.mrb[51].mxu1  ;;  %v1492_v1 = vld [vmem:[%s2753_s29 + $0x10] sm:$0xff] (!%p2054_p12) }
 0x1b4   : > { %v1392_v5 = vadd.f32 %v2261_v63, %v2149_v60  ;;  %v2264_v6 = vadd.f32 %v2263_v4, %v2262_v0  ;;  %v1493_v4 = vld [vmem:[%s2753_s29 + $0x18] sm:$0xff] (!%p2054_p12) }
 0x1b6   : > { %v1446_v8 = vadd.f32 %v1392_v5, %v448_v2  ;;  %v1395_v9 = vadd.f32 %v2264_v6, %v2152_v3  ;;  %v1490_v2 = vld [vmem:[%s2753_s29] sm:$0xff] (!%p2054_p12)  ;;  %v2528_v3 = vmov (!%p2054_p12), 0   ;;  %v1491_v5 = vld [vmem:[%s2753_s29 + $0x8] sm:$0xff] (!%p2054_p12) }
 0x1b7   : > { %v2153_v10 = vpop.f32.mrb[52].mxu0  ;;  %2470 = vset.pattern.permute.xlu1 (!%p2054_p12), %v2528_v3  ;;  %2469 = vset.pattern.permute.xlu0 (!%p2054_p12), %v2528_v3  ;;  %v1495_v6 = vld [vmem:[%s2753_s29 + $0x28] sm:$0xff] (!%p2054_p12) }
 0x1b8   : > { %1478 = vst [vmem:[#allocation2 + $0xc0] sm:$0xff] %v1446_v8  ;;  %v1447_v11 = vadd.f32 %v1395_v9, %v449_v7  ;;  %v2265_v12 = vpop.f32.mrb[52].mxu1  ;;  %v2154_v13 = vpop.f32.mrb[53].mxu0  ;;  %1566 = vperm.xlu1 (!%p2054_p12), %2470, %v1492_v1   ;;  %1556 = vperm.xlu0 (!%p2054_p12), %2469, %v1490_v2   ;;  %v1494_v7 = vld [vmem:[%s2753_s29 + $0x20] sm:$0xff] (!%p2054_p12)  ;;  %v1497_v8 = vld [vmem:[%s2753_s29 + $0x38] sm:$0xff] (!%p2054_p12)  ;;  %v1496_v9 = vld [vmem:[%s2753_s29 + $0x30] sm:$0xff] (!%p2054_p12) }
 0x1b9   : > { %v2155_v14 = vadd.f32 %v2154_v13, %v2153_v10  ;;  %v2266_v15 = vpop.f32.mrb[53].mxu1  ;;  %v2156_v16 = vpop.f32.mrb[54].mxu0  ;;  %v1499_v10 = vld [vmem:[%s2753_s29 + $0x48] sm:$0xff] (!%p2054_p12)  ;;  %v1500_v13 = vld [vmem:[%s2753_s29 + $0x50] sm:$0xff] (!%p2054_p12) }
 0x1ba   : > { %1479 = vst [vmem:[#allocation2 + $0xc8] sm:$0xff] %v1447_v11  ;;  %v2267_v17 = vadd.f32 %v2266_v15, %v2265_v12  ;;  %v2268_v18 = vpop.f32.mrb[54].mxu1  ;;  %v2157_v19 = vpop.f32.mrb[55].mxu0  ;;  %v1498_v11 = vld [vmem:[%s2753_s29 + $0x40] sm:$0xff] (!%p2054_p12)  ;;  %v1501_v12 = vld [vmem:[%s2753_s29 + $0x58] sm:$0xff] (!%p2054_p12) }
 0x1bb   : > { %v2158_v21 = vadd.f32 %v2157_v19, %v2156_v16  ;;  %v2269_v22 = vpop.f32.mrb[55].mxu1  ;;  %v1502_v15 = vld [vmem:[%s2753_s29 + $0x60] sm:$0xff] (!%p2054_p12)  ;;  %v1505_v16 = vld [vmem:[%s2753_s29 + $0x78] sm:$0xff] (!%p2054_p12) }
 0x1bc   : > { %v1400_v23 = vadd.f32 %v2267_v17, %v2155_v14  ;;  %v2270_v24 = vadd.f32 %v2269_v22, %v2268_v18  ;;  %1571 = vperm.xlu1 (!%p2054_p12), %2470, %v1493_v4   ;;  %1561 = vperm.xlu0 (!%p2054_p12), %2469, %v1491_v5   ;;  %v1503_v14 = vld [vmem:[%s2753_s29 + $0x68] sm:$0xff] (!%p2054_p12)  ;;  %v1504_v17 = vld [vmem:[%s2753_s29 + $0x70] sm:$0xff] (!%p2054_p12)  ;;  %v1506_v19 = vld [vmem:[%s2753_s29 + $0x80] sm:$0xff] (!%p2054_p12) }
 0x1bd   : > { %v1507_v18 = vld [vmem:[%s2753_s29 + $0x88] sm:$0xff] (!%p2054_p12) }
 0x1be   : > { %v1448_v26 = vadd.f32 %v1400_v23, %v450_v20  ;;  %v1403_v27 = vadd.f32 %v2270_v24, %v2158_v21  ;;  %v1509_v20 = vld [vmem:[%s2753_s29 + $0x98] sm:$0xff] (!%p2054_p12)  ;;  %v1508_v21 = vld [vmem:[%s2753_s29 + $0x90] sm:$0xff] (!%p2054_p12)  ;;  %v1511_v22 = vld [vmem:[%s2753_s29 + $0xa8] sm:$0xff] (!%p2054_p12) }
 0x1bf   : > { %v2159_v28 = vpop.f32.mrb[56].mxu0  ;;  %v1510_v23 = vld [vmem:[%s2753_s29 + $0xa0] sm:$0xff] (!%p2054_p12)  ;;  %v1513_v24 = vld [vmem:[%s2753_s29 + $0xb8] sm:$0xff] (!%p2054_p12) }
 0x1c0   : > { %1480 = vst [vmem:[#allocation2 + $0xd0] sm:$0xff] %v1448_v26  ;;  %v1449_v29 = vadd.f32 %v1403_v27, %v451_v25  ;;  %v2271_v30 = vpop.f32.mrb[56].mxu1  ;;  %v2160_v31 = vpop.f32.mrb[57].mxu0  ;;  %1581 = vperm.xlu1 (!%p2054_p12), %2470, %v1495_v6   ;;  %1576 = vperm.xlu0 (!%p2054_p12), %2469, %v1494_v7   ;;  %v1512_v25 = vld [vmem:[%s2753_s29 + $0xb0] sm:$0xff] (!%p2054_p12)  ;;  %v1515_v26 = vld [vmem:[%s2753_s29 + $0xc8] sm:$0xff] (!%p2054_p12)  ;;  %v1514_v27 = vld [vmem:[%s2753_s29 + $0xc0] sm:$0xff] (!%p2054_p12) }
 0x1c1   : > { %v2161_v32 = vadd.f32 %v2160_v31, %v2159_v28  ;;  %v2272_v33 = vpop.f32.mrb[57].mxu1  ;;  %v2162_v34 = vpop.f32.mrb[58].mxu0  ;;  %v1517_v28 = vld [vmem:[%s2753_s29 + $0xd8] sm:$0xff] (!%p2054_p12)  ;;  %v1518_v31 = vld [vmem:[%s2753_s29 + $0xe0] sm:$0xff] (!%p2054_p12)  ;;  %v1531_v7 = vld [vmem:[#allocation2 + $0x48] sm:$0xff] (!%p2054_p12) }
 0x1c2   : > { %1481 = vst [vmem:[#allocation2 + $0xd8] sm:$0xff] %v1449_v29  ;;  %v2273_v35 = vadd.f32 %v2272_v33, %v2271_v30  ;;  %v2274_v36 = vpop.f32.mrb[58].mxu1  ;;  %v2163_v37 = vpop.f32.mrb[59].mxu0  ;;  %v1516_v29 = vld [vmem:[%s2753_s29 + $0xd0] sm:$0xff] (!%p2054_p12)  ;;  %v1519_v30 = vld [vmem:[%s2753_s29 + $0xe8] sm:$0xff] (!%p2054_p12) }
 0x1c3   : > { %v2164_v39 = vadd.f32 %v2163_v37, %v2162_v34  ;;  %v2275_v40 = vpop.f32.mrb[59].mxu1  ;;  %v1520_v33 = vld [vmem:[%s2753_s29 + $0xf0] sm:$0xff] (!%p2054_p12) }
 0x1c4   : > { %v1408_v41 = vadd.f32 %v2273_v35, %v2161_v32  ;;  %v2276_v42 = vadd.f32 %v2275_v40, %v2274_v36  ;;  %1591 = vperm.xlu1 (!%p2054_p12), %2470, %v1497_v8   ;;  %1586 = vperm.xlu0 (!%p2054_p12), %2469, %v1496_v9   ;;  %v1521_v32 = vld [vmem:[%s2753_s29 + $0xf8] sm:$0xff] (!%p2054_p12)  ;;  %v1524_v34 = vld [vmem:[#allocation2 + $0x10] sm:$0xff] (!%p2054_p12)  ;;  %v1522_v35 = vld [vmem:[#allocation2] sm:$0xff] (!%p2054_p12) }
 0x1c5   : > { %v2901_v36 = vld [vmem:[%s2991_s3] ss:$0 sm:$0xff] (!%p2054_p12) }
 0x1c6   : > { %v1450_v44 = vadd.f32 %v1408_v41, %v452_v38  ;;  %v1411_v45 = vadd.f32 %v2276_v42, %v2164_v39  ;;  %v1525_v41 = vld [vmem:[#allocation2 + $0x18] sm:$0xff] (!%p2054_p12)  ;;  %v1523_v42 = vld [vmem:[#allocation2 + $0x8] sm:$0xff] (!%p2054_p12)  ;;  %v1530_v8 = vld [vmem:[#allocation2 + $0x40] sm:$0xff] (!%p2054_p12) }
 0x1c7   : > { %v2165_v46 = vpop.f32.mrb[60].mxu0 }
 0x1c8   : > { %1482 = vst [vmem:[#allocation2 + $0xe0] sm:$0xff] %v1450_v44  ;;  %v1451_v47 = vadd.f32 %v1411_v45, %v453_v43  ;;  %v2277_v48 = vpop.f32.mrb[60].mxu1  ;;  %v2166_v49 = vpop.f32.mrb[61].mxu0  ;;  %1601 = vperm.xlu1 (!%p2054_p12), %2470, %v1499_v10   ;;  %1596 = vperm.xlu0 (!%p2054_p12), %2469, %v1498_v11  }
 0x1c9   : > { %v2167_v50 = vadd.f32 %v2166_v49, %v2165_v46  ;;  %v2278_v51 = vpop.f32.mrb[61].mxu1  ;;  %v2168_v52 = vpop.f32.mrb[62].mxu0 }
 0x1ca   : > { %1483 = vst [vmem:[#allocation2 + $0xe8] sm:$0xff] %v1451_v47  ;;  %v2279_v53 = vadd.f32 %v2278_v51, %v2277_v48  ;;  %v2280_v54 = vpop.f32.mrb[62].mxu1  ;;  %v2169_v55 = vpop.f32.mrb[63].mxu0  ;;  %v1527_v51 = vld [vmem:[#allocation2 + $0x28] sm:$0xff] (!%p2054_p12) }
 0x1cb   : > { %v2170_v57 = vadd.f32 %v2169_v55, %v2168_v52  ;;  %v2281_v58 = vpop.f32.mrb[63].mxu1  ;;  %v1526_v52 = vld [vmem:[#allocation2 + $0x20] sm:$0xff] (!%p2054_p12) }
 0x1cc   : > { %v1416_v59 = vadd.f32 %v2279_v53, %v2167_v50  ;;  %v2282_v60 = vadd.f32 %v2281_v58, %v2280_v54  ;;  %1489 = sbr.rel (%p2054_p12) target bundleno = 635 (0x27b), region = 67  ;;  %1611 = vperm.xlu1 (!%p2054_p12), %2470, %v1501_v12   ;;  %1606 = vperm.xlu0 (!%p2054_p12), %2469, %v1500_v13  }
 0x1ce   : > { %v1452_v62 = vadd.f32 %v1416_v59, %v454_v56  ;;  %v1419_v63 = vadd.f32 %v2282_v60, %v2170_v57 }
 0x1d0   : > { %1484 = vst [vmem:[#allocation2 + $0xf0] sm:$0xff] %v1452_v62  ;;  %v1453_v0 = vadd.f32 %v1419_v63, %v455_v61  ;;  %1621 = vperm.xlu1 (!%p2054_p12), %2470, %v1503_v14   ;;  %1616 = vperm.xlu0 (!%p2054_p12), %2469, %v1502_v15   ;;  %v1529_v61 = vld [vmem:[#allocation2 + $0x38] sm:$0xff] (!%p2054_p12)  ;;  %v1528_v62 = vld [vmem:[#allocation2 + $0x30] sm:$0xff] (!%p2054_p12) }
 0x1d2   : > { %1485 = vst [vmem:[#allocation2 + $0xf8] sm:$0xff] %v1453_v0 }
 0x1d4   : > { %1631 = vperm.xlu1 %2470, %v1505_v16   ;;  %1626 = vperm.xlu0 %2469, %v1504_v17   ;;  %v1533_v17 = vld [vmem:[#allocation2 + $0x58] sm:$0xff] }
 0x1d8   : > { %1641 = vperm.xlu1 %2470, %v1507_v18   ;;  %1636 = vperm.xlu0 %2469, %v1506_v19   ;;  %v1532_v18 = vld [vmem:[#allocation2 + $0x50] sm:$0xff] }
 0x1dc   : > { %1651 = vperm.xlu1 %2470, %v1509_v20   ;;  %1646 = vperm.xlu0 %2469, %v1508_v21  }
 0x1e0   : > { %1661 = vperm.xlu1 %2470, %v1511_v22   ;;  %1656 = vperm.xlu0 %2469, %v1510_v23  }
 0x1e4   : > { %1671 = vperm.xlu1 %2470, %v1513_v24   ;;  %1666 = vperm.xlu0 %2469, %v1512_v25  }
 0x1e8   : > { %1681 = vperm.xlu1 %2470, %v1515_v26   ;;  %1676 = vperm.xlu0 %2469, %v1514_v27   ;;  %v1535_v27 = vld [vmem:[#allocation2 + $0x68] sm:$0xff] }
 0x1ec   : > { %1691 = vperm.xlu1 %2470, %v1517_v28   ;;  %1686 = vperm.xlu0 %2469, %v1516_v29   ;;  %v1534_v28 = vld [vmem:[#allocation2 + $0x60] sm:$0xff] }
 0x1f0   : > { %1701 = vperm.xlu1 %2470, %v1519_v30   ;;  %1696 = vperm.xlu0 %2469, %v1518_v31  }
 0x1f4   : > { %1711 = vperm.xlu1 %2470, %v1521_v32   ;;  %1706 = vperm.xlu0 %2469, %v1520_v33  }
 0x237   : > { %v1567_v37 = vpop.permute.xlu1 %1566  ;;  %v1557_v38 = vpop.permute.xlu0 %1556 }
 0x238   : > { %v1716_v39 = vmul.f32 %v1567_v37, %v1524_v34  ;;  %v1714_v40 = vmul.f32 %v1557_v38, %v1522_v35  ;;  %v1537_v38 = vld [vmem:[#allocation2 + $0x78] sm:$0xff] }
 0x23a   : > { %v1755_v43 = vadd.f32 %v2901_v36, %v1716_v39  ;;  %v1753_v44 = vadd.f32 %v2901_v36, %v1714_v40  ;;  %v1536_v39 = vld [vmem:[#allocation2 + $0x70] sm:$0xff] }
 0x23b   : > { %v1572_v45 = vpop.permute.xlu1 %1571  ;;  %v1562_v46 = vpop.permute.xlu0 %1561 }
 0x23c   : > { %v1787_v47 = vmax.f32 %v1755_v43, 0.0  ;;  %v1785_v48 = vmax.f32 %v1753_v44, 0.0  ;;  %v1717_v49 = vmul.f32 %v1572_v45, %v1525_v41  ;;  %v1715_v50 = vmul.f32 %v1562_v46, %v1523_v42 }
 0x23e   : > { %1819 = vst [vmem:[%s2758_s6 + $0x10] sm:$0xff] %v1787_v47  ;;  %1817 = vst [vmem:[%s2758_s6] sm:$0xff] %v1785_v48  ;;  %v1756_v53 = vadd.f32 %v2901_v36, %v1717_v49  ;;  %v1754_v54 = vadd.f32 %v2901_v36, %v1715_v50  ;;  %v1539_v48 = vld [vmem:[#allocation2 + $0x88] sm:$0xff]  ;;  %v1538_v49 = vld [vmem:[#allocation2 + $0x80] sm:$0xff] }
 0x23f   : > { %v1582_v55 = vpop.permute.xlu1 %1581  ;;  %v1577_v56 = vpop.permute.xlu0 %1576 }
 0x240   : > { %v1788_v57 = vmax.f32 %v1756_v53, 0.0  ;;  %v1786_v58 = vmax.f32 %v1754_v54, 0.0  ;;  %v1719_v59 = vmul.f32 %v1582_v55, %v1527_v51  ;;  %v1718_v60 = vmul.f32 %v1577_v56, %v1526_v52 }
 0x242   : > { %1820 = vst [vmem:[%s2758_s6 + $0x18] sm:$0xff] %v1788_v57  ;;  %1818 = vst [vmem:[%s2758_s6 + $0x8] sm:$0xff] %v1786_v58  ;;  %v1758_v63 = vadd.f32 %v2901_v36, %v1719_v59  ;;  %v1757_v0 = vadd.f32 %v2901_v36, %v1718_v60  ;;  %v1541_v58 = vld [vmem:[#allocation2 + $0x98] sm:$0xff]  ;;  %v1540_v59 = vld [vmem:[#allocation2 + $0x90] sm:$0xff] }
 0x243   : > { %v1592_v1 = vpop.permute.xlu1 %1591  ;;  %v1587_v2 = vpop.permute.xlu0 %1586 }
 0x244   : > { %v1790_v3 = vmax.f32 %v1758_v63, 0.0  ;;  %v1789_v4 = vmax.f32 %v1757_v0, 0.0  ;;  %v1721_v5 = vmul.f32 %v1592_v1, %v1529_v61  ;;  %v1720_v6 = vmul.f32 %v1587_v2, %v1528_v62 }
 0x246   : > { %1822 = vst [vmem:[%s2758_s6 + $0x28] sm:$0xff] %v1790_v3  ;;  %1821 = vst [vmem:[%s2758_s6 + $0x20] sm:$0xff] %v1789_v4  ;;  %v1760_v9 = vadd.f32 %v2901_v36, %v1721_v5  ;;  %v1759_v10 = vadd.f32 %v2901_v36, %v1720_v6  ;;  %v1543_v4 = vld [vmem:[#allocation2 + $0xa8] sm:$0xff]  ;;  %v1542_v5 = vld [vmem:[#allocation2 + $0xa0] sm:$0xff] }
 0x247   : > { %v1602_v11 = vpop.permute.xlu1 %1601  ;;  %v1597_v12 = vpop.permute.xlu0 %1596 }
 0x248   : > { %v1792_v13 = vmax.f32 %v1760_v9, 0.0  ;;  %v1791_v14 = vmax.f32 %v1759_v10, 0.0  ;;  %v1723_v15 = vmul.f32 %v1602_v11, %v1531_v7  ;;  %v1722_v16 = vmul.f32 %v1597_v12, %v1530_v8 }
 0x24a   : > { %1824 = vst [vmem:[%s2758_s6 + $0x38] sm:$0xff] %v1792_v13  ;;  %1823 = vst [vmem:[%s2758_s6 + $0x30] sm:$0xff] %v1791_v14  ;;  %v1762_v19 = vadd.f32 %v2901_v36, %v1723_v15  ;;  %v1761_v20 = vadd.f32 %v2901_v36, %v1722_v16  ;;  %v1545_v14 = vld [vmem:[#allocation2 + $0xb8] sm:$0xff]  ;;  %v1544_v15 = vld [vmem:[#allocation2 + $0xb0] sm:$0xff] }
 0x24b   : > { %v1612_v21 = vpop.permute.xlu1 %1611  ;;  %v1607_v22 = vpop.permute.xlu0 %1606 }
 0x24c   : > { %v1794_v23 = vmax.f32 %v1762_v19, 0.0  ;;  %v1793_v24 = vmax.f32 %v1761_v20, 0.0  ;;  %v1725_v25 = vmul.f32 %v1612_v21, %v1533_v17  ;;  %v1724_v26 = vmul.f32 %v1607_v22, %v1532_v18 }
 0x24e   : > { %1826 = vst [vmem:[%s2758_s6 + $0x48] sm:$0xff] %v1794_v23  ;;  %1825 = vst [vmem:[%s2758_s6 + $0x40] sm:$0xff] %v1793_v24  ;;  %v1764_v29 = vadd.f32 %v2901_v36, %v1725_v25  ;;  %v1763_v30 = vadd.f32 %v2901_v36, %v1724_v26  ;;  %v1547_v24 = vld [vmem:[#allocation2 + $0xc8] sm:$0xff]  ;;  %v1546_v25 = vld [vmem:[#allocation2 + $0xc0] sm:$0xff] }
 0x24f   : > { %v1622_v31 = vpop.permute.xlu1 %1621  ;;  %v1617_v32 = vpop.permute.xlu0 %1616 }
 0x250   : > { %v1796_v33 = vmax.f32 %v1764_v29, 0.0  ;;  %v1795_v34 = vmax.f32 %v1763_v30, 0.0  ;;  %v1727_v35 = vmul.f32 %v1622_v31, %v1535_v27  ;;  %v1726_v37 = vmul.f32 %v1617_v32, %v1534_v28 }
 0x252   : > { %1828 = vst [vmem:[%s2758_s6 + $0x58] sm:$0xff] %v1796_v33  ;;  %1827 = vst [vmem:[%s2758_s6 + $0x50] sm:$0xff] %v1795_v34  ;;  %v1766_v40 = vadd.f32 %v2901_v36, %v1727_v35  ;;  %v1765_v41 = vadd.f32 %v2901_v36, %v1726_v37  ;;  %v1549_v34 = vld [vmem:[#allocation2 + $0xd8] sm:$0xff]  ;;  %v1548_v35 = vld [vmem:[#allocation2 + $0xd0] sm:$0xff] }
 0x253   : > { %v1632_v42 = vpop.permute.xlu1 %1631  ;;  %v1627_v43 = vpop.permute.xlu0 %1626 }
 0x254   : > { %v1798_v44 = vmax.f32 %v1766_v40, 0.0  ;;  %v1797_v45 = vmax.f32 %v1765_v41, 0.0  ;;  %v1729_v46 = vmul.f32 %v1632_v42, %v1537_v38  ;;  %v1728_v47 = vmul.f32 %v1627_v43, %v1536_v39 }
 0x256   : > { %1830 = vst [vmem:[%s2758_s6 + $0x68] sm:$0xff] %v1798_v44  ;;  %1829 = vst [vmem:[%s2758_s6 + $0x60] sm:$0xff] %v1797_v45  ;;  %v1768_v50 = vadd.f32 %v2901_v36, %v1729_v46  ;;  %v1767_v51 = vadd.f32 %v2901_v36, %v1728_v47  ;;  %v1551_v45 = vld [vmem:[#allocation2 + $0xe8] sm:$0xff]  ;;  %v1550_v46 = vld [vmem:[#allocation2 + $0xe0] sm:$0xff] }
 0x257   : > { %v1642_v52 = vpop.permute.xlu1 %1641  ;;  %v1637_v53 = vpop.permute.xlu0 %1636 }
 0x258   : > { %v1800_v54 = vmax.f32 %v1768_v50, 0.0  ;;  %v1799_v55 = vmax.f32 %v1767_v51, 0.0  ;;  %v1731_v56 = vmul.f32 %v1642_v52, %v1539_v48  ;;  %v1730_v57 = vmul.f32 %v1637_v53, %v1538_v49 }
 0x25a   : > { %1832 = vst [vmem:[%s2758_s6 + $0x78] sm:$0xff] %v1800_v54  ;;  %1831 = vst [vmem:[%s2758_s6 + $0x70] sm:$0xff] %v1799_v55  ;;  %v1770_v60 = vadd.f32 %v2901_v36, %v1731_v56  ;;  %v1769_v61 = vadd.f32 %v2901_v36, %v1730_v57  ;;  %v1553_v55 = vld [vmem:[#allocation2 + $0xf8] sm:$0xff]  ;;  %v1552_v56 = vld [vmem:[#allocation2 + $0xf0] sm:$0xff] }
 0x25b   : > { %v1652_v62 = vpop.permute.xlu1 %1651  ;;  %v1647_v63 = vpop.permute.xlu0 %1646 }
 0x25c   : > { %v1802_v0 = vmax.f32 %v1770_v60, 0.0  ;;  %v1801_v1 = vmax.f32 %v1769_v61, 0.0  ;;  %v1733_v2 = vmul.f32 %v1652_v62, %v1541_v58  ;;  %v1732_v3 = vmul.f32 %v1647_v63, %v1540_v59 }
 0x25e   : > { %1834 = vst [vmem:[%s2758_s6 + $0x88] sm:$0xff] %v1802_v0  ;;  %1833 = vst [vmem:[%s2758_s6 + $0x80] sm:$0xff] %v1801_v1  ;;  %v1772_v6 = vadd.f32 %v2901_v36, %v1733_v2  ;;  %v1771_v7 = vadd.f32 %v2901_v36, %v1732_v3 }
 0x25f   : > { %v1662_v8 = vpop.permute.xlu1 %1661  ;;  %v1657_v9 = vpop.permute.xlu0 %1656 }
 0x260   : > { %v1804_v10 = vmax.f32 %v1772_v6, 0.0  ;;  %v1803_v11 = vmax.f32 %v1771_v7, 0.0  ;;  %v1735_v12 = vmul.f32 %v1662_v8, %v1543_v4  ;;  %v1734_v13 = vmul.f32 %v1657_v9, %v1542_v5 }
 0x262   : > { %1836 = vst [vmem:[%s2758_s6 + $0x98] sm:$0xff] %v1804_v10  ;;  %1835 = vst [vmem:[%s2758_s6 + $0x90] sm:$0xff] %v1803_v11  ;;  %v1774_v16 = vadd.f32 %v2901_v36, %v1735_v12  ;;  %v1773_v17 = vadd.f32 %v2901_v36, %v1734_v13 }
 0x263   : > { %v1672_v18 = vpop.permute.xlu1 %1671  ;;  %v1667_v19 = vpop.permute.xlu0 %1666 }
 0x264   : > { %v1806_v20 = vmax.f32 %v1774_v16, 0.0  ;;  %v1805_v21 = vmax.f32 %v1773_v17, 0.0  ;;  %v1737_v22 = vmul.f32 %v1672_v18, %v1545_v14  ;;  %v1736_v23 = vmul.f32 %v1667_v19, %v1544_v15 }
 0x266   : > { %1838 = vst [vmem:[%s2758_s6 + $0xa8] sm:$0xff] %v1806_v20  ;;  %1837 = vst [vmem:[%s2758_s6 + $0xa0] sm:$0xff] %v1805_v21  ;;  %v1776_v26 = vadd.f32 %v2901_v36, %v1737_v22  ;;  %v1775_v27 = vadd.f32 %v2901_v36, %v1736_v23 }
 0x267   : > { %v1682_v28 = vpop.permute.xlu1 %1681  ;;  %v1677_v29 = vpop.permute.xlu0 %1676 }
 0x268   : > { %v1808_v30 = vmax.f32 %v1776_v26, 0.0  ;;  %v1807_v31 = vmax.f32 %v1775_v27, 0.0  ;;  %v1739_v32 = vmul.f32 %v1682_v28, %v1547_v24  ;;  %v1738_v33 = vmul.f32 %v1677_v29, %v1546_v25 }
 0x26a   : > { %1840 = vst [vmem:[%s2758_s6 + $0xb8] sm:$0xff] %v1808_v30  ;;  %1839 = vst [vmem:[%s2758_s6 + $0xb0] sm:$0xff] %v1807_v31  ;;  %v1778_v37 = vadd.f32 %v2901_v36, %v1739_v32  ;;  %v1777_v38 = vadd.f32 %v2901_v36, %v1738_v33 }
 0x26b   : > { %v1692_v39 = vpop.permute.xlu1 %1691  ;;  %v1687_v40 = vpop.permute.xlu0 %1686 }
 0x26c   : > { %v1810_v41 = vmax.f32 %v1778_v37, 0.0  ;;  %v1809_v42 = vmax.f32 %v1777_v38, 0.0  ;;  %v1741_v43 = vmul.f32 %v1692_v39, %v1549_v34  ;;  %v1740_v44 = vmul.f32 %v1687_v40, %v1548_v35 }
 0x26e   : > { %1842 = vst [vmem:[%s2758_s6 + $0xc8] sm:$0xff] %v1810_v41  ;;  %1841 = vst [vmem:[%s2758_s6 + $0xc0] sm:$0xff] %v1809_v42  ;;  %v1780_v47 = vadd.f32 %v2901_v36, %v1741_v43  ;;  %v1779_v48 = vadd.f32 %v2901_v36, %v1740_v44 }
 0x26f   : > { %v1702_v49 = vpop.permute.xlu1 %1701  ;;  %v1697_v50 = vpop.permute.xlu0 %1696 }
 0x270   : > { %v1812_v51 = vmax.f32 %v1780_v47, 0.0  ;;  %v1811_v52 = vmax.f32 %v1779_v48, 0.0  ;;  %v1743_v53 = vmul.f32 %v1702_v49, %v1551_v45  ;;  %v1742_v54 = vmul.f32 %v1697_v50, %v1550_v46 }
 0x272   : > { %1844 = vst [vmem:[%s2758_s6 + $0xd8] sm:$0xff] %v1812_v51  ;;  %1843 = vst [vmem:[%s2758_s6 + $0xd0] sm:$0xff] %v1811_v52  ;;  %v1782_v57 = vadd.f32 %v2901_v36, %v1743_v53  ;;  %v1781_v58 = vadd.f32 %v2901_v36, %v1742_v54 }
 0x273   : > { %v1712_v59 = vpop.permute.xlu1 %1711  ;;  %v1707_v60 = vpop.permute.xlu0 %1706 }
 0x274   : > { %v1814_v61 = vmax.f32 %v1782_v57, 0.0  ;;  %v1813_v62 = vmax.f32 %v1781_v58, 0.0  ;;  %v1745_v63 = vmul.f32 %v1712_v59, %v1553_v55  ;;  %v1744_v0 = vmul.f32 %v1707_v60, %v1552_v56 }
 0x276   : > { %1846 = vst [vmem:[%s2758_s6 + $0xe8] sm:$0xff] %v1814_v61  ;;  %1845 = vst [vmem:[%s2758_s6 + $0xe0] sm:$0xff] %v1813_v62  ;;  %v1784_v1 = vadd.f32 %v2901_v36, %v1745_v63  ;;  %v1783_v2 = vadd.f32 %v2901_v36, %v1744_v0 }
 0x278   : > { %v1816_v3 = vmax.f32 %v1784_v1, 0.0  ;;  %v1815_v4 = vmax.f32 %v1783_v2, 0.0 }
 0x27a   : > { %1848 = vst [vmem:[%s2758_s6 + $0xf8] sm:$0xff] %v1816_v3  ;;  %1847 = vst [vmem:[%s2758_s6 + $0xf0] sm:$0xff] %v1815_v4 }
 0x27b PF: > { %s14_s21 = sadd.s32 1, %s2525_s21   ;;  %s2993_s15 = smov %s2505_s16 }
 0x27c   : > { %p11_p13 = scmp.ge.s32.totalorder %s14_s21, 10   ;;  %s2994_s16 = smov %s2605_s28 }
 0x27d   : > { %s2995_s17 = smov %s2517_s19  ;;  %s2996_s18 = smov %s2521_s20 }
 0x27e   : > { %s2997_s19 = smov %s3000_s22  ;;  %s2998_s20 = smov %s3004_s23 }
 0x27f   :  { %13 = sbr.rel (!%p11_p13) target bundleno = 4 (0x4), region = 106 }

</bundles_post_ra>
